<compile_context>
chip_gen: v7x
topology: tpu7x:2x2x1
jax: 0.10.0
libtpu: 0.0.40
codegen_flags: <defaults>
</compile_context>

<pallas_src>
import jax
import jax.numpy as jnp
import numpy as np
from jax import lax
from jax.experimental import pallas as pl
from jax.experimental.pallas import tpu as pltpu

LANE = 128


def _silu(x):
    return x * jax.nn.sigmoid(x)


def _mm(a, b):
    # bf16 MXU operands (weights are pre-cast in the wrapper), f32 accumulation.
    return jnp.dot(a.astype(jnp.bfloat16), b, preferred_element_type=jnp.float32)


def _round_up(v, m):
    return (v + m - 1) // m * m


# ------------------------------- kernel ------------------------------------

def _make_csp1x_kernel(num_res, TH, W, H):
    """One (batch, row-tile) grid point of CSP1X."""
    R = num_res                      # vertical halo rows (one per ResUnit 3x3)
    TH_ext = TH + 2 * R
    rows_c = TH * W                  # centre rows (written to output)
    rows_e = TH_ext * W              # halo-extended rows (branch two)

    def kernel(*refs):
        i = 0
        x_ref = refs[i]; i += 1
        if R > 0:
            halo_ref = refs[i]; i += 1
        w_one = refs[i][...]; b_one = refs[i + 1][...]; i += 2
        w_two = refs[i][...]; b_two = refs[i + 1][...]; i += 2
        res_w = []
        for _ in range(num_res):
            # (w1, b1, w3_stack_ref, b3); w3 kept as a ref, indexed per tap.
            res_w.append((refs[i][...], refs[i + 1][...], refs[i + 2],
                          refs[i + 3][...]))
            i += 4
        w_out_a = refs[i][...]; w_out_b = refs[i + 1][...]
        b_out = refs[i + 2][...]; i += 3
        o_ref = refs[i]; i += 1
        p_ref = refs[i] if R > 0 else None   # zero-bordered bf16 pad scratch

        cin = x_ref.shape[-1]
        mid = w_one.shape[-1]

        # ---- branch one: CBS 1x1 (in -> mid), centre rows only; bf16 early --
        xc = x_ref[...].reshape(rows_c, cin)        # W % 8 == 0 keeps this free
        part_one = _silu(_mm(xc, w_one) + b_one).astype(jnp.bfloat16)

        # ---- branch two: CBS 1x1 (in -> mid) on the halo-extended rows ------
        if R > 0:
            x_ext = jnp.concatenate(
                [halo_ref[0:R], x_ref[...], halo_ref[R:2 * R]], axis=0)
        else:
            x_ext = x_ref[...]
        t = _silu(_mm(x_ext.reshape(rows_e, cin), w_two) + b_two)   # f32

        if R > 0:
            c_half = p_ref.shape[-1]
            # Extended rows outside the image are the 3x3 conv's zero padding:
            # mask r1 there before every conv.
            j = pl.program_id(1)
            g = j * TH - R + lax.broadcasted_iota(jnp.int32, (TH_ext, 1, 1), 0)
            row_valid = jnp.logical_and(g >= 0, g < H)
            # Zero the persistent padded scratch once per grid step (only the
            # 1-wide border needs it; the interior is overwritten below).
            p_ref[...] = jnp.zeros_like(p_ref)

        for (w1, b1, w3_ref, b3) in res_w:
            # ResUnit: CBS 1x1 (mid -> mid//2) -> CBS 3x3 (mid//2 -> mid) + skip
            r1 = _silu(_mm(t, w1) + b1).astype(jnp.bfloat16)
            r1 = jnp.where(row_valid, r1.reshape(TH_ext, W, c_half), 0)
            p_ref[1:TH_ext + 1, 1:W + 1, :] = r1.astype(jnp.bfloat16)

            # 3x3 conv = 9 shift-accumulated matmuls from the padded bf16
            # scratch (no 9x im2col slab; K = c_half >= 128 after lane pad).
            acc = None
            for ky in range(3):
                for kx in range(3):
                    tap = p_ref[ky:ky + TH_ext, kx:kx + W, :].reshape(
                        rows_e, c_half)
                    part = jnp.dot(tap, w3_ref[ky * 3 + kx],
                                   preferred_element_type=jnp.float32)
                    acc = part if acc is None else acc + part
            t = t + _silu(acc + b3)              # residual add stays f32

        # ---- output CBS 1x1, concat-free: silu(p1 @ Wa + t_c @ Wb + b) ------
        if R > 0:
            t = t.reshape(TH_ext, W, mid)[R:R + TH].reshape(rows_c, mid)
        out = _silu(_mm(part_one, w_out_a) + _mm(t, w_out_b) + b_out)
        o_ref[...] = out.reshape(TH, W, out.shape[-1]).astype(o_ref.dtype)

    return kernel


# ------------------------------- wrapper -----------------------------------

def _pad2d(w, rows, cols, dtype):
    out = jnp.zeros((rows, cols), dtype)
    return out.at[:w.shape[0], :w.shape[1]].set(w.astype(dtype))


def _const_spec(arr):
    zeros = (0,) * arr.ndim
    return pl.BlockSpec(arr.shape, lambda n, j, z=zeros: z)


def _pick_row_tile(H, W):
    # Largest divisor of H keeping ~<=4K rows per tile (bounds VMEM on v7x's
    # 64 MiB); small images stay untiled.
    target = max(8, 4096 // max(W, 1))
    best = 1
    for d in range(1, H + 1):
        if H % d == 0 and d <= target:
            best = d
    return best


def csp1x_pallas_nhwc(x_nhwc, params, *, row_tile=None):
    """CSP1X forward: NHWC in -> NHWC bf16 out (no layout transposes)."""
    N, H, W, cin = x_nhwc.shape
    num_res = len(params['res'])
    R = num_res

    mid = params['one'][0].shape[-1]
    out_c = params['out'][0].shape[-1]
    c_half = params['res'][0][0].shape[-1] if num_res else 0

    mid_p = _round_up(mid, LANE)
    out_cp = _round_up(out_c, LANE)
    c_half_p = _round_up(c_half, LANE) if num_res else 0

    if row_tile is None:
        row_tile = _pick_row_tile(H, W)
    TH = row_tile
    if H % TH != 0:
        raise ValueError("row_tile must divide H")
    nT = H // TH
    TH_ext = TH + 2 * R

    bf16, f32 = jnp.bfloat16, jnp.float32

    def mat1x1(wt, ci_p, co_p):
        return _pad2d(wt.reshape(wt.shape[2], wt.shape[3]), ci_p, co_p, bf16)

    def vec(b, co_p):
        return _pad2d(b.reshape(1, -1), 1, co_p, f32)

    # Lane-pad all weight OUTPUT channels to 128-multiples (padded channels
    # remain exactly zero through the chain); biases stay f32 for the VPU.
    flat_weights = [mat1x1(params['one'][0], cin, mid_p),
                    vec(params['one'][1], mid_p),
                    mat1x1(params['two0'][0], cin, mid_p),
                    vec(params['two0'][1], mid_p)]
    for (w1, b1, w3, b3) in params['res']:
        w9 = jnp.zeros((9, c_half_p, mid_p), bf16)
        w9 = w9.at[:, :c_half, :mid].set(w3.reshape(9, c_half, mid).astype(bf16))
        flat_weights += [mat1x1(w1, mid_p, c_half_p), vec(b1, c_half_p),
                         w9, vec(b3, mid_p)]
    w_out = params['out'][0].reshape(2 * mid, out_c)
    flat_weights += [_pad2d(w_out[:mid], mid_p, out_cp, bf16),    # part_one rows
                     _pad2d(w_out[mid:], mid_p, out_cp, bf16),    # branch-two rows
                     vec(params['out'][1], out_cp)]

    x_bf = x_nhwc.astype(bf16)
    inputs = [x_bf]
    in_specs = [pl.BlockSpec((None, TH, W, cin), lambda n, j: (n, j, 0, 0))]

    halo_bytes = 0
    if R > 0:
        # Per-tile halo rows (num_res above / below each tile, zero at image
        # borders) -> plain non-overlapping BlockSpecs, tiny HBM overhead.
        x_pad = jnp.pad(x_bf, ((0, 0), (R, R), (0, 0), (0, 0)))
        halos = jnp.stack(
            [jnp.concatenate(
                [x_pad[:, j * TH: j * TH + R],
                 x_pad[:, j * TH + TH + R: j * TH + TH + 2 * R]], axis=1)
             for j in range(nT)], axis=1)                 # (N, nT, 2R, W, cin)
        halos = halos.reshape(N * nT, 2 * R, W, cin)
        halo_bytes = int(halos.size) * halos.dtype.itemsize
        inputs.append(halos)
        in_specs.append(pl.BlockSpec((None, 2 * R, W, cin),
                                     lambda n, j: (n * nT + j, 0, 0, 0)))

    for wgt in flat_weights:
        inputs.append(wgt)
        in_specs.append(_const_spec(wgt))

    scratch = ([pltpu.VMEM((TH_ext + 2, W + 2, c_half_p), bf16)]
               if R > 0 else [])

    # Rough per-step VMEM footprint -> limit (kept well under v7x's 64 MiB).
    rows_c, rows_e = TH * W, TH_ext * W
    w_bytes = sum(int(w.size) * w.dtype.itemsize for w in flat_weights)
    est = (2 * 2 * (rows_c * cin + 2 * R * W * cin)       # dbl-buffered x+halo
           + 2 * 2 * rows_c * out_cp                      # dbl-buffered out
           + 2 * w_bytes
           + (TH_ext + 2) * (W + 2) * c_half_p * 2        # pad scratch
           + rows_e * (4 * mid_p * 2 + 2 * mid_p + 3 * 2 * c_half_p)
           + rows_c * (2 * mid_p + 4 * out_cp))
    vmem_limit = int(min(max(2 * est, 32 * 1024 * 1024), 48 * 1024 * 1024))

    flops = 2 * N * H * W * (2 * cin * mid_p
                             + num_res * 10 * c_half_p * mid_p
                             + 2 * mid_p * out_cp)
    transc = N * H * W * (2 * mid_p + num_res * (c_half_p + mid_p) + out_cp)
    bytes_acc = (int(x_bf.size) * 2 + N * H * W * out_cp * 2
                 + w_bytes + halo_bytes)

    out = pl.pallas_call(
        _make_csp1x_kernel(num_res, TH, W, H),
        out_shape=jax.ShapeDtypeStruct((N, H, W, out_cp), bf16),
        grid=(N, nT),
        in_specs=in_specs,
        out_specs=pl.BlockSpec((None, TH, W, out_cp), lambda n, j: (n, j, 0, 0)),
        scratch_shapes=scratch,
        compiler_params=pltpu.CompilerParams(
            dimension_semantics=("parallel", "parallel"),
            vmem_limit_bytes=vmem_limit),
        cost_estimate=pl.CostEstimate(flops=int(flops),
                                      transcendentals=int(transc),
                                      bytes_accessed=int(bytes_acc)),
    )(*inputs)
    return out[..., :out_c]


def csp1x_pallas(x_nchw, params, *, row_tile=None):
    """NCHW shim (PyTorch convention). Prefer csp1x_pallas_nhwc in pipelines
    to avoid the two boundary transposes."""
    x = jnp.transpose(x_nchw, (0, 2, 3, 1))
    y = csp1x_pallas_nhwc(x, params, row_tile=row_tile)
    return jnp.transpose(y, (0, 3, 1, 2))


# ------------------------- parameter construction --------------------------

def _fold_bn(w, b, gamma, beta, mean, var, eps=1e-5):
    scale = gamma / jnp.sqrt(var + eps)
    return w * scale, (b - mean) * scale + beta


def _init_cbs(key, cin, cout, k):
    ks = jax.random.split(key, 6)
    w = 0.1 * jax.random.normal(ks[0], (k, k, cin, cout), jnp.float32)  # HWIO
    b = 0.1 * jax.random.normal(ks[1], (cout,), jnp.float32)
    gamma = 1.0 + 0.1 * jax.random.normal(ks[2], (cout,), jnp.float32)
    beta = 0.1 * jax.random.normal(ks[3], (cout,), jnp.float32)
    mean = 0.1 * jax.random.normal(ks[4], (cout,), jnp.float32)
    var = 0.5 + jnp.abs(jax.random.normal(ks[5], (cout,), jnp.float32))
    return _fold_bn(w, b, gamma, beta, mean, var)


def init_csp1x_params(key, in_channel, out_channel, num_res):
    mid = out_channel // 2
    keys = jax.random.split(key, 3 + 2 * num_res)
    params = {
        'one': _init_cbs(keys[0], in_channel, mid, 1),
        'two0': _init_cbs(keys[1], in_channel, mid, 1),
        'res': [],
        'out': _init_cbs(keys[2], out_channel, in_channel, 1),
    }
    for i in range(num_res):
        w1, b1 = _init_cbs(keys[3 + 2 * i], mid, mid // 2, 1)
        w3, b3 = _init_cbs(keys[4 + 2 * i], mid // 2, mid, 3)
        params['res'].append((w1, b1, w3, b3))
    return params


# ------------------------------ reference ----------------------------------

def _cbs_ref(x, w, b, pad):
    y = lax.conv_general_dilated(
        x, w, window_strides=(1, 1), padding=pad,
        dimension_numbers=('NHWC', 'HWIO', 'NHWC'),
        precision=lax.Precision.HIGHEST)
    y = y + b
    return y * jax.nn.sigmoid(y)


def csp1x_ref(x_nhwc, params):
    one = _cbs_ref(x_nhwc, params['one'][0], params['one'][1], 'VALID')
    t = _cbs_ref(x_nhwc, params['two0'][0], params['two0'][1], 'VALID')
    for (w1, b1, w3, b3) in params['res']:
        r1 = _cbs_ref(t, w1, b1, 'VALID')
        r2 = _cbs_ref(r1, w3, b3, ((1, 1), (1, 1)))
        t = t + r2
    cat = jnp.concatenate([one, t], axis=-1)
    return _cbs_ref(cat, params['out'][0], params['out'][1], 'VALID')


# --------------------------------- main -------------------------------------

if __name__ == "__main__":
    key = jax.random.PRNGKey(0)
    kx, kp = jax.random.split(key)

    in_channel, out_channel, num_res = 4, 8, 1
    N, H, W = 2, 16, 16

    x_nchw = jax.random.normal(kx, (N, in_channel, H, W), jnp.float32)
    params = init_csp1x_params(kp, in_channel, out_channel, num_res)

    x_nhwc = jnp.transpose(x_nchw, (0, 2, 3, 1))
    y_ref = np.asarray(jnp.transpose(csp1x_ref(x_nhwc, params), (0, 3, 1, 2)))

    # Exercise both the row-tiled path (2 tiles, 1-row halo) and the untiled
    # path; bf16 MXU operands + bf16 output vs f32 reference -> loose tol.
    for rt in (8, H):
        y = jax.block_until_ready(csp1x_pallas(x_nchw, params, row_tile=rt))
        np.testing.assert_allclose(np.asarray(y.astype(jnp.float32)), y_ref,
                                   atol=2e-2, rtol=2e-2)
    print("KERNEL_OK")
</pallas_src>

<mosaic_0001>
module attributes {stable_mosaic.version = 11 : i64} {
  func.func @kernel(%arg0: i32, %arg1: i32, %arg2: memref<1x8x16x4xbf16, #tpu.memory_space<vmem>>, %arg3: memref<1x2x16x4xbf16, #tpu.memory_space<vmem>>, %arg4: memref<4x128xbf16, #tpu.memory_space<vmem>>, %arg5: memref<1x128xf32, #tpu.memory_space<vmem>>, %arg6: memref<4x128xbf16, #tpu.memory_space<vmem>>, %arg7: memref<1x128xf32, #tpu.memory_space<vmem>>, %arg8: memref<128x128xbf16, #tpu.memory_space<vmem>>, %arg9: memref<1x128xf32, #tpu.memory_space<vmem>>, %arg10: memref<9x128x128xbf16, #tpu.memory_space<vmem>>, %arg11: memref<1x128xf32, #tpu.memory_space<vmem>>, %arg12: memref<128x128xbf16, #tpu.memory_space<vmem>>, %arg13: memref<128x128xbf16, #tpu.memory_space<vmem>>, %arg14: memref<1x128xf32, #tpu.memory_space<vmem>>, %arg15: memref<1x8x16x128xbf16, #tpu.memory_space<vmem>>, %arg16: memref<12x18x128xbf16, #tpu.memory_space<vmem>>) attributes {dimension_semantics = [#tpu.dimension_semantics<parallel>, #tpu.dimension_semantics<parallel>], iteration_bounds = array<i64: 2, 2>, scalar_prefetch = 0 : i64, scratch_operands = 1 : i64, tpu.core_type = #tpu.core_type<tc>, window_params = [{transform_indices = @transform_0, window_bounds = array<i64: 1, 8, 16, 4>}, {transform_indices = @transform_1, window_bounds = array<i64: 1, 2, 16, 4>}, {pipeline_mode = #tpu.pipeline_mode<synchronous>, transform_indices = @transform_2, window_bounds = array<i64: 4, 128>}, {pipeline_mode = #tpu.pipeline_mode<synchronous>, transform_indices = @transform_3, window_bounds = array<i64: 1, 128>}, {pipeline_mode = #tpu.pipeline_mode<synchronous>, transform_indices = @transform_4, window_bounds = array<i64: 4, 128>}, {pipeline_mode = #tpu.pipeline_mode<synchronous>, transform_indices = @transform_5, window_bounds = array<i64: 1, 128>}, {pipeline_mode = #tpu.pipeline_mode<synchronous>, transform_indices = @transform_6, window_bounds = array<i64: 128, 128>}, {pipeline_mode = #tpu.pipeline_mode<synchronous>, transform_indices = @transform_7, window_bounds = array<i64: 1, 128>}, {pipeline_mode = #tpu.pipeline_mode<synchronous>, transform_indices = @transform_8, window_bounds = array<i64: 9, 128, 128>}, {pipeline_mode = #tpu.pipeline_mode<synchronous>, transform_indices = @transform_9, window_bounds = array<i64: 1, 128>}, {pipeline_mode = #tpu.pipeline_mode<synchronous>, transform_indices = @transform_10, window_bounds = array<i64: 128, 128>}, {pipeline_mode = #tpu.pipeline_mode<synchronous>, transform_indices = @transform_11, window_bounds = array<i64: 128, 128>}, {pipeline_mode = #tpu.pipeline_mode<synchronous>, transform_indices = @transform_12, window_bounds = array<i64: 1, 128>}, {transform_indices = @transform_13, window_bounds = array<i64: 1, 8, 16, 128>}]} {
    %c0 = arith.constant 0 : index
    %c0_0 = arith.constant 0 : index
    %0 = vector.load %arg4[%c0, %c0_0] : memref<4x128xbf16, #tpu.memory_space<vmem>>, vector<4x128xbf16>
    %c0_1 = arith.constant 0 : index
    %c0_2 = arith.constant 0 : index
    %1 = vector.load %arg5[%c0_1, %c0_2] : memref<1x128xf32, #tpu.memory_space<vmem>>, vector<1x128xf32>
    %c0_3 = arith.constant 0 : index
    %c0_4 = arith.constant 0 : index
    %2 = vector.load %arg6[%c0_3, %c0_4] : memref<4x128xbf16, #tpu.memory_space<vmem>>, vector<4x128xbf16>
    %c0_5 = arith.constant 0 : index
    %c0_6 = arith.constant 0 : index
    %3 = vector.load %arg7[%c0_5, %c0_6] : memref<1x128xf32, #tpu.memory_space<vmem>>, vector<1x128xf32>
    %c0_7 = arith.constant 0 : index
    %c0_8 = arith.constant 0 : index
    %4 = vector.load %arg8[%c0_7, %c0_8] : memref<128x128xbf16, #tpu.memory_space<vmem>>, vector<128x128xbf16>
    %c0_9 = arith.constant 0 : index
    %c0_10 = arith.constant 0 : index
    %5 = vector.load %arg9[%c0_9, %c0_10] : memref<1x128xf32, #tpu.memory_space<vmem>>, vector<1x128xf32>
    %c0_11 = arith.constant 0 : index
    %c0_12 = arith.constant 0 : index
    %6 = vector.load %arg11[%c0_11, %c0_12] : memref<1x128xf32, #tpu.memory_space<vmem>>, vector<1x128xf32>
    %c0_13 = arith.constant 0 : index
    %c0_14 = arith.constant 0 : index
    %7 = vector.load %arg12[%c0_13, %c0_14] : memref<128x128xbf16, #tpu.memory_space<vmem>>, vector<128x128xbf16>
    %c0_15 = arith.constant 0 : index
    %c0_16 = arith.constant 0 : index
    %8 = vector.load %arg13[%c0_15, %c0_16] : memref<128x128xbf16, #tpu.memory_space<vmem>>, vector<128x128xbf16>
    %c0_17 = arith.constant 0 : index
    %c0_18 = arith.constant 0 : index
    %9 = vector.load %arg14[%c0_17, %c0_18] : memref<1x128xf32, #tpu.memory_space<vmem>>, vector<1x128xf32>
    %c0_19 = arith.constant 0 : index
    %c0_20 = arith.constant 0 : index
    %c0_21 = arith.constant 0 : index
    %c0_22 = arith.constant 0 : index
    %10 = vector.load %arg2[%c0_19, %c0_20, %c0_21, %c0_22] : memref<1x8x16x4xbf16, #tpu.memory_space<vmem>>, vector<1x8x16x4xbf16>
    %11 = vector.shape_cast %10 : vector<1x8x16x4xbf16> to vector<8x16x4xbf16>
    %12 = vector.shape_cast %11 : vector<8x16x4xbf16> to vector<128x4xbf16>
    %cst = arith.constant dense<0.000000e+00> : vector<128x128xf32>
    %13 = tpu.matmul %12, %0, %cst {dimension_numbers = #tpu.dot_dimension_numbers<[1], [0], [0], [1], [0, 0, 1, 1], [], []>} : vector<128x4xbf16>, vector<4x128xbf16>, vector<128x128xf32> -> vector<128x128xf32>
    %14 = vector.broadcast %1 : vector<1x128xf32> to vector<128x128xf32>
    %15 = arith.addf %13, %14 : vector<128x128xf32>
    %16 = arith.negf %15 : vector<128x128xf32>
    %17 = math.exp %16 : vector<128x128xf32>
    %cst_23 = arith.constant 1.000000e+00 : f32
    %18 = vector.broadcast %cst_23 : f32 to vector<128x128xf32>
    %19 = arith.addf %18, %17 : vector<128x128xf32>
    %20 = arith.divf %18, %19 : vector<128x128xf32>
    %21 = arith.mulf %15, %20 : vector<128x128xf32>
    %22 = arith.truncf %21 : vector<128x128xf32> to vector<128x128xbf16>
    %c0_24 = arith.constant 0 : index
    %c0_25 = arith.constant 0 : index
    %c0_26 = arith.constant 0 : index
    %c0_27 = arith.constant 0 : index
    %23 = vector.load %arg3[%c0_24, %c0_25, %c0_26, %c0_27] : memref<1x2x16x4xbf16, #tpu.memory_space<vmem>>, vector<1x1x16x4xbf16>
    %24 = vector.shape_cast %23 : vector<1x1x16x4xbf16> to vector<1x16x4xbf16>
    %c0_28 = arith.constant 0 : index
    %c0_29 = arith.constant 0 : index
    %c0_30 = arith.constant 0 : index
    %c0_31 = arith.constant 0 : index
    %25 = vector.load %arg2[%c0_28, %c0_29, %c0_30, %c0_31] : memref<1x8x16x4xbf16, #tpu.memory_space<vmem>>, vector<1x8x16x4xbf16>
    %26 = vector.shape_cast %25 : vector<1x8x16x4xbf16> to vector<8x16x4xbf16>
    %c0_32 = arith.constant 0 : index
    %c1 = arith.constant 1 : index
    %c0_33 = arith.constant 0 : index
    %c0_34 = arith.constant 0 : index
    %27 = vector.load %arg3[%c0_32, %c1, %c0_33, %c0_34] : memref<1x2x16x4xbf16, #tpu.memory_space<vmem>>, vector<1x1x16x4xbf16>
    %28 = vector.shape_cast %27 : vector<1x1x16x4xbf16> to vector<1x16x4xbf16>
    %29 = tpu.concatenate %24, %26, %28 in 0 : vector<1x16x4xbf16>, vector<8x16x4xbf16>, vector<1x16x4xbf16> -> vector<10x16x4xbf16>
    %30 = vector.shape_cast %29 : vector<10x16x4xbf16> to vector<160x4xbf16>
    %cst_35 = arith.constant dense<0.000000e+00> : vector<160x128xf32>
    %31 = tpu.matmul %30, %2, %cst_35 {dimension_numbers = #tpu.dot_dimension_numbers<[1], [0], [0], [1], [0, 0, 1, 1], [], []>} : vector<160x4xbf16>, vector<4x128xbf16>, vector<160x128xf32> -> vector<160x128xf32>
    %32 = vector.broadcast %3 : vector<1x128xf32> to vector<160x128xf32>
    %33 = arith.addf %31, %32 : vector<160x128xf32>
    %34 = arith.negf %33 : vector<160x128xf32>
    %35 = math.exp %34 : vector<160x128xf32>
    %cst_36 = arith.constant 1.000000e+00 : f32
    %36 = vector.broadcast %cst_36 : f32 to vector<160x128xf32>
    %37 = arith.addf %36, %35 : vector<160x128xf32>
    %38 = arith.divf %36, %37 : vector<160x128xf32>
    %39 = arith.mulf %33, %38 : vector<160x128xf32>
    %c8_i32 = arith.constant 8 : i32
    %40 = arith.muli %arg1, %c8_i32 : i32
    %c1_i32 = arith.constant 1 : i32
    %41 = arith.subi %40, %c1_i32 : i32
    %42 = tpu.iota {dimensions = array<i32: 0>} : vector<10x1x1xi32>
    %43 = vector.broadcast %41 : i32 to vector<10x1x1xi32>
    %44 = arith.addi %43, %42 : vector<10x1x1xi32>
    %c0_i32 = arith.constant 0 : i32
    %45 = vector.broadcast %c0_i32 : i32 to vector<10x1x1xi32>
    %46 = arith.cmpi sge, %44, %45 : vector<10x1x1xi32>
    %c16_i32 = arith.constant 16 : i32
    %47 = vector.broadcast %c16_i32 : i32 to vector<10x1x1xi32>
    %48 = arith.cmpi slt, %44, %47 : vector<10x1x1xi32>
    %49 = arith.andi %46, %48 : vector<10x1x1xi1>
    %cst_37 = arith.constant 0.000000e+00 : bf16
    %50 = vector.broadcast %cst_37 : bf16 to vector<12x18x128xbf16>
    %c0_38 = arith.constant 0 : index
    %c0_39 = arith.constant 0 : index
    %c0_40 = arith.constant 0 : index
    %51 = vector.load %arg16[%c0_38, %c0_39, %c0_40] : memref<12x18x128xbf16, #tpu.memory_space<vmem>>, vector<12x18x128xbf16>
    tpu.vector_store %arg16[%c0_38, %c0_39, %c0_40], %50 {strides = array<i32>} : memref<12x18x128xbf16, #tpu.memory_space<vmem>>, vector<12x18x128xbf16>,
    %52 = arith.truncf %39 : vector<160x128xf32> to vector<160x128xbf16>
    %cst_41 = arith.constant dense<0.000000e+00> : vector<160x128xf32>
    %53 = tpu.matmul %52, %4, %cst_41 {dimension_numbers = #tpu.dot_dimension_numbers<[1], [0], [0], [1], [0, 0, 1, 1], [], []>} : vector<160x128xbf16>, vector<128x128xbf16>, vector<160x128xf32> -> vector<160x128xf32>
    %54 = vector.broadcast %5 : vector<1x128xf32> to vector<160x128xf32>
    %55 = arith.addf %53, %54 : vector<160x128xf32>
    %56 = arith.negf %55 : vector<160x128xf32>
    %57 = math.exp %56 : vector<160x128xf32>
    %cst_42 = arith.constant 1.000000e+00 : f32
    %58 = vector.broadcast %cst_42 : f32 to vector<160x128xf32>
    %59 = arith.addf %58, %57 : vector<160x128xf32>
    %60 = arith.divf %58, %59 : vector<160x128xf32>
    %61 = arith.mulf %55, %60 : vector<160x128xf32>
    %62 = arith.truncf %61 : vector<160x128xf32> to vector<160x128xbf16>
    %63 = vector.shape_cast %62 : vector<160x128xbf16> to vector<10x16x128xbf16>
    %c0_i32_43 = arith.constant 0 : i32
    %64 = arith.sitofp %c0_i32_43 : i32 to bf16
    %65 = vector.shape_cast %49 : vector<10x1x1xi1> to vector<10x1x1xi1>
    %66 = vector.broadcast %65 : vector<10x1x1xi1> to vector<10x16x128xi1>
    %67 = vector.broadcast %64 : bf16 to vector<10x16x128xbf16>
    %68 = arith.select %66, %63, %67 : vector<10x16x128xi1>, vector<10x16x128xbf16>
    %c1_44 = arith.constant 1 : index
    %c1_45 = arith.constant 1 : index
    %c0_46 = arith.constant 0 : index
    %69 = vector.load %arg16[%c1_44, %c1_45, %c0_46] : memref<12x18x128xbf16, #tpu.memory_space<vmem>>, vector<10x16x128xbf16>
    tpu.vector_store %arg16[%c1_44, %c1_45, %c0_46], %68 {strides = array<i32>} : memref<12x18x128xbf16, #tpu.memory_space<vmem>>, vector<10x16x128xbf16>,
    %c0_47 = arith.constant 0 : index
    %c0_48 = arith.constant 0 : index
    %c0_49 = arith.constant 0 : index
    %70 = vector.load %arg16[%c0_47, %c0_48, %c0_49] : memref<12x18x128xbf16, #tpu.memory_space<vmem>>, vector<10x16x128xbf16>
    %71 = vector.shape_cast %70 : vector<10x16x128xbf16> to vector<160x128xbf16>
    %c0_50 = arith.constant 0 : index
    %c0_51 = arith.constant 0 : index
    %c0_52 = arith.constant 0 : index
    %72 = vector.load %arg10[%c0_50, %c0_51, %c0_52] : memref<9x128x128xbf16, #tpu.memory_space<vmem>>, vector<1x128x128xbf16>
    %73 = vector.shape_cast %72 : vector<1x128x128xbf16> to vector<128x128xbf16>
    %cst_53 = arith.constant dense<0.000000e+00> : vector<160x128xf32>
    %74 = tpu.matmul %71, %73, %cst_53 {dimension_numbers = #tpu.dot_dimension_numbers<[1], [0], [0], [1], [0, 0, 1, 1], [], []>} : vector<160x128xbf16>, vector<128x128xbf16>, vector<160x128xf32> -> vector<160x128xf32>
    %c0_54 = arith.constant 0 : index
    %c1_55 = arith.constant 1 : index
    %c0_56 = arith.constant 0 : index
    %75 = vector.load %arg16[%c0_54, %c1_55, %c0_56] : memref<12x18x128xbf16, #tpu.memory_space<vmem>>, vector<10x16x128xbf16>
    %76 = vector.shape_cast %75 : vector<10x16x128xbf16> to vector<160x128xbf16>
    %c1_57 = arith.constant 1 : index
    %c0_58 = arith.constant 0 : index
    %c0_59 = arith.constant 0 : index
    %77 = vector.load %arg10[%c1_57, %c0_58, %c0_59] : memref<9x128x128xbf16, #tpu.memory_space<vmem>>, vector<1x128x128xbf16>
    %78 = vector.shape_cast %77 : vector<1x128x128xbf16> to vector<128x128xbf16>
    %cst_60 = arith.constant dense<0.000000e+00> : vector<160x128xf32>
    %79 = tpu.matmul %76, %78, %cst_60 {dimension_numbers = #tpu.dot_dimension_numbers<[1], [0], [0], [1], [0, 0, 1, 1], [], []>} : vector<160x128xbf16>, vector<128x128xbf16>, vector<160x128xf32> -> vector<160x128xf32>
    %80 = arith.addf %74, %79 : vector<160x128xf32>
    %c0_61 = arith.constant 0 : index
    %c2 = arith.constant 2 : index
    %c0_62 = arith.constant 0 : index
    %81 = vector.load %arg16[%c0_61, %c2, %c0_62] : memref<12x18x128xbf16, #tpu.memory_space<vmem>>, vector<10x16x128xbf16>
    %82 = vector.shape_cast %81 : vector<10x16x128xbf16> to vector<160x128xbf16>
    %c2_63 = arith.constant 2 : index
    %c0_64 = arith.constant 0 : index
    %c0_65 = arith.constant 0 : index
    %83 = vector.load %arg10[%c2_63, %c0_64, %c0_65] : memref<9x128x128xbf16, #tpu.memory_space<vmem>>, vector<1x128x128xbf16>
    %84 = vector.shape_cast %83 : vector<1x128x128xbf16> to vector<128x128xbf16>
    %cst_66 = arith.constant dense<0.000000e+00> : vector<160x128xf32>
    %85 = tpu.matmul %82, %84, %cst_66 {dimension_numbers = #tpu.dot_dimension_numbers<[1], [0], [0], [1], [0, 0, 1, 1], [], []>} : vector<160x128xbf16>, vector<128x128xbf16>, vector<160x128xf32> -> vector<160x128xf32>
    %86 = arith.addf %80, %85 : vector<160x128xf32>
    %c1_67 = arith.constant 1 : index
    %c0_68 = arith.constant 0 : index
    %c0_69 = arith.constant 0 : index
    %87 = vector.load %arg16[%c1_67, %c0_68, %c0_69] : memref<12x18x128xbf16, #tpu.memory_space<vmem>>, vector<10x16x128xbf16>
    %88 = vector.shape_cast %87 : vector<10x16x128xbf16> to vector<160x128xbf16>
    %c3 = arith.constant 3 : index
    %c0_70 = arith.constant 0 : index
    %c0_71 = arith.constant 0 : index
    %89 = vector.load %arg10[%c3, %c0_70, %c0_71] : memref<9x128x128xbf16, #tpu.memory_space<vmem>>, vector<1x128x128xbf16>
    %90 = vector.shape_cast %89 : vector<1x128x128xbf16> to vector<128x128xbf16>
    %cst_72 = arith.constant dense<0.000000e+00> : vector<160x128xf32>
    %91 = tpu.matmul %88, %90, %cst_72 {dimension_numbers = #tpu.dot_dimension_numbers<[1], [0], [0], [1], [0, 0, 1, 1], [], []>} : vector<160x128xbf16>, vector<128x128xbf16>, vector<160x128xf32> -> vector<160x128xf32>
    %92 = arith.addf %86, %91 : vector<160x128xf32>
    %c1_73 = arith.constant 1 : index
    %c1_74 = arith.constant 1 : index
    %c0_75 = arith.constant 0 : index
    %93 = vector.load %arg16[%c1_73, %c1_74, %c0_75] : memref<12x18x128xbf16, #tpu.memory_space<vmem>>, vector<10x16x128xbf16>
    %94 = vector.shape_cast %93 : vector<10x16x128xbf16> to vector<160x128xbf16>
    %c4 = arith.constant 4 : index
    %c0_76 = arith.constant 0 : index
    %c0_77 = arith.constant 0 : index
    %95 = vector.load %arg10[%c4, %c0_76, %c0_77] : memref<9x128x128xbf16, #tpu.memory_space<vmem>>, vector<1x128x128xbf16>
    %96 = vector.shape_cast %95 : vector<1x128x128xbf16> to vector<128x128xbf16>
    %cst_78 = arith.constant dense<0.000000e+00> : vector<160x128xf32>
    %97 = tpu.matmul %94, %96, %cst_78 {dimension_numbers = #tpu.dot_dimension_numbers<[1], [0], [0], [1], [0, 0, 1, 1], [], []>} : vector<160x128xbf16>, vector<128x128xbf16>, vector<160x128xf32> -> vector<160x128xf32>
    %98 = arith.addf %92, %97 : vector<160x128xf32>
    %c1_79 = arith.constant 1 : index
    %c2_80 = arith.constant 2 : index
    %c0_81 = arith.constant 0 : index
    %99 = vector.load %arg16[%c1_79, %c2_80, %c0_81] : memref<12x18x128xbf16, #tpu.memory_space<vmem>>, vector<10x16x128xbf16>
    %100 = vector.shape_cast %99 : vector<10x16x128xbf16> to vector<160x128xbf16>
    %c5 = arith.constant 5 : index
    %c0_82 = arith.constant 0 : index
    %c0_83 = arith.constant 0 : index
    %101 = vector.load %arg10[%c5, %c0_82, %c0_83] : memref<9x128x128xbf16, #tpu.memory_space<vmem>>, vector<1x128x128xbf16>
    %102 = vector.shape_cast %101 : vector<1x128x128xbf16> to vector<128x128xbf16>
    %cst_84 = arith.constant dense<0.000000e+00> : vector<160x128xf32>
    %103 = tpu.matmul %100, %102, %cst_84 {dimension_numbers = #tpu.dot_dimension_numbers<[1], [0], [0], [1], [0, 0, 1, 1], [], []>} : vector<160x128xbf16>, vector<128x128xbf16>, vector<160x128xf32> -> vector<160x128xf32>
    %104 = arith.addf %98, %103 : vector<160x128xf32>
    %c2_85 = arith.constant 2 : index
    %c0_86 = arith.constant 0 : index
    %c0_87 = arith.constant 0 : index
    %105 = vector.load %arg16[%c2_85, %c0_86, %c0_87] : memref<12x18x128xbf16, #tpu.memory_space<vmem>>, vector<10x16x128xbf16>
    %106 = vector.shape_cast %105 : vector<10x16x128xbf16> to vector<160x128xbf16>
    %c6 = arith.constant 6 : index
    %c0_88 = arith.constant 0 : index
    %c0_89 = arith.constant 0 : index
    %107 = vector.load %arg10[%c6, %c0_88, %c0_89] : memref<9x128x128xbf16, #tpu.memory_space<vmem>>, vector<1x128x128xbf16>
    %108 = vector.shape_cast %107 : vector<1x128x128xbf16> to vector<128x128xbf16>
    %cst_90 = arith.constant dense<0.000000e+00> : vector<160x128xf32>
    %109 = tpu.matmul %106, %108, %cst_90 {dimension_numbers = #tpu.dot_dimension_numbers<[1], [0], [0], [1], [0, 0, 1, 1], [], []>} : vector<160x128xbf16>, vector<128x128xbf16>, vector<160x128xf32> -> vector<160x128xf32>
    %110 = arith.addf %104, %109 : vector<160x128xf32>
    %c2_91 = arith.constant 2 : index
    %c1_92 = arith.constant 1 : index
    %c0_93 = arith.constant 0 : index
    %111 = vector.load %arg16[%c2_91, %c1_92, %c0_93] : memref<12x18x128xbf16, #tpu.memory_space<vmem>>, vector<10x16x128xbf16>
    %112 = vector.shape_cast %111 : vector<10x16x128xbf16> to vector<160x128xbf16>
    %c7 = arith.constant 7 : index
    %c0_94 = arith.constant 0 : index
    %c0_95 = arith.constant 0 : index
    %113 = vector.load %arg10[%c7, %c0_94, %c0_95] : memref<9x128x128xbf16, #tpu.memory_space<vmem>>, vector<1x128x128xbf16>
    %114 = vector.shape_cast %113 : vector<1x128x128xbf16> to vector<128x128xbf16>
    %cst_96 = arith.constant dense<0.000000e+00> : vector<160x128xf32>
    %115 = tpu.matmul %112, %114, %cst_96 {dimension_numbers = #tpu.dot_dimension_numbers<[1], [0], [0], [1], [0, 0, 1, 1], [], []>} : vector<160x128xbf16>, vector<128x128xbf16>, vector<160x128xf32> -> vector<160x128xf32>
    %116 = arith.addf %110, %115 : vector<160x128xf32>
    %c2_97 = arith.constant 2 : index
    %c2_98 = arith.constant 2 : index
    %c0_99 = arith.constant 0 : index
    %117 = vector.load %arg16[%c2_97, %c2_98, %c0_99] : memref<12x18x128xbf16, #tpu.memory_space<vmem>>, vector<10x16x128xbf16>
    %118 = vector.shape_cast %117 : vector<10x16x128xbf16> to vector<160x128xbf16>
    %c8 = arith.constant 8 : index
    %c0_100 = arith.constant 0 : index
    %c0_101 = arith.constant 0 : index
    %119 = vector.load %arg10[%c8, %c0_100, %c0_101] : memref<9x128x128xbf16, #tpu.memory_space<vmem>>, vector<1x128x128xbf16>
    %120 = vector.shape_cast %119 : vector<1x128x128xbf16> to vector<128x128xbf16>
    %cst_102 = arith.constant dense<0.000000e+00> : vector<160x128xf32>
    %121 = tpu.matmul %118, %120, %cst_102 {dimension_numbers = #tpu.dot_dimension_numbers<[1], [0], [0], [1], [0, 0, 1, 1], [], []>} : vector<160x128xbf16>, vector<128x128xbf16>, vector<160x128xf32> -> vector<160x128xf32>
    %122 = arith.addf %116, %121 : vector<160x128xf32>
    %123 = vector.broadcast %6 : vector<1x128xf32> to vector<160x128xf32>
    %124 = arith.addf %122, %123 : vector<160x128xf32>
    %125 = arith.negf %124 : vector<160x128xf32>
    %126 = math.exp %125 : vector<160x128xf32>
    %cst_103 = arith.constant 1.000000e+00 : f32
    %127 = vector.broadcast %cst_103 : f32 to vector<160x128xf32>
    %128 = arith.addf %127, %126 : vector<160x128xf32>
    %129 = arith.divf %127, %128 : vector<160x128xf32>
    %130 = arith.mulf %124, %129 : vector<160x128xf32>
    %131 = arith.addf %39, %130 : vector<160x128xf32>
    %132 = vector.shape_cast %131 : vector<160x128xf32> to vector<10x16x128xf32>
    %133 = vector.extract_strided_slice %132 {offsets = [1, 0, 0], sizes = [8, 16, 128], strides = [1, 1, 1]} : vector<10x16x128xf32> to vector<8x16x128xf32>
    %134 = vector.shape_cast %133 : vector<8x16x128xf32> to vector<128x128xf32>
    %cst_104 = arith.constant dense<0.000000e+00> : vector<128x128xf32>
    %135 = tpu.matmul %22, %7, %cst_104 {dimension_numbers = #tpu.dot_dimension_numbers<[1], [0], [0], [1], [0, 0, 1, 1], [], []>} : vector<128x128xbf16>, vector<128x128xbf16>, vector<128x128xf32> -> vector<128x128xf32>
    %136 = arith.truncf %134 : vector<128x128xf32> to vector<128x128xbf16>
    %cst_105 = arith.constant dense<0.000000e+00> : vector<128x128xf32>
    %137 = tpu.matmul %136, %8, %cst_105 {dimension_numbers = #tpu.dot_dimension_numbers<[1], [0], [0], [1], [0, 0, 1, 1], [], []>} : vector<128x128xbf16>, vector<128x128xbf16>, vector<128x128xf32> -> vector<128x128xf32>
    %138 = arith.addf %135, %137 : vector<128x128xf32>
    %139 = vector.broadcast %9 : vector<1x128xf32> to vector<128x128xf32>
    %140 = arith.addf %138, %139 : vector<128x128xf32>
    %141 = arith.negf %140 : vector<128x128xf32>
    %142 = math.exp %141 : vector<128x128xf32>
    %cst_106 = arith.constant 1.000000e+00 : f32
    %143 = vector.broadcast %cst_106 : f32 to vector<128x128xf32>
    %144 = arith.addf %143, %142 : vector<128x128xf32>
    %145 = arith.divf %143, %144 : vector<128x128xf32>
    %146 = arith.mulf %140, %145 : vector<128x128xf32>
    %147 = vector.shape_cast %146 : vector<128x128xf32> to vector<8x16x128xf32>
    %148 = arith.truncf %147 : vector<8x16x128xf32> to vector<8x16x128xbf16>
    %c0_107 = arith.constant 0 : index
    %c0_108 = arith.constant 0 : index
    %c0_109 = arith.constant 0 : index
    %c0_110 = arith.constant 0 : index
    %149 = vector.load %arg15[%c0_107, %c0_108, %c0_109, %c0_110] : memref<1x8x16x128xbf16, #tpu.memory_space<vmem>>, vector<1x8x16x128xbf16>
    %150 = vector.shape_cast %149 : vector<1x8x16x128xbf16> to vector<8x16x128xbf16>
    %151 = vector.shape_cast %148 : vector<8x16x128xbf16> to vector<1x8x16x128xbf16>
    tpu.vector_store %arg15[%c0_107, %c0_108, %c0_109, %c0_110], %151 {strides = array<i32>} : memref<1x8x16x128xbf16, #tpu.memory_space<vmem>>, vector<1x8x16x128xbf16>,
    return
  }
  func.func @transform_0(%arg0: i32, %arg1: i32) -> (i32, i32, i32, i32) {
    %c0_i32 = arith.constant 0 : i32
    %c0_i32_0 = arith.constant 0 : i32
    %c0_i32_1 = arith.constant 0 : i32
    return %arg0, %arg1, %c0_i32, %c0_i32_0 : i32, i32, i32, i32
  }
  func.func @transform_1(%arg0: i32, %arg1: i32) -> (i32, i32, i32, i32) {
    %c2_i32 = arith.constant 2 : i32
    %0 = arith.muli %arg0, %c2_i32 : i32
    %1 = arith.addi %0, %arg1 : i32
    %c0_i32 = arith.constant 0 : i32
    %c0_i32_0 = arith.constant 0 : i32
    %c0_i32_1 = arith.constant 0 : i32
    %c0_i32_2 = arith.constant 0 : i32
    return %1, %c0_i32, %c0_i32_0, %c0_i32_1 : i32, i32, i32, i32
  }
  func.func @transform_2(%arg0: i32, %arg1: i32) -> (i32, i32) {
    %c0_i32 = arith.constant 0 : i32
    %c0_i32_0 = arith.constant 0 : i32
    %c0_i32_1 = arith.constant 0 : i32
    return %c0_i32, %c0_i32_0 : i32, i32
  }
  func.func @transform_3(%arg0: i32, %arg1: i32) -> (i32, i32) {
    %c0_i32 = arith.constant 0 : i32
    %c0_i32_0 = arith.constant 0 : i32
    %c0_i32_1 = arith.constant 0 : i32
    return %c0_i32, %c0_i32_0 : i32, i32
  }
  func.func @transform_4(%arg0: i32, %arg1: i32) -> (i32, i32) {
    %c0_i32 = arith.constant 0 : i32
    %c0_i32_0 = arith.constant 0 : i32
    %c0_i32_1 = arith.constant 0 : i32
    return %c0_i32, %c0_i32_0 : i32, i32
  }
  func.func @transform_5(%arg0: i32, %arg1: i32) -> (i32, i32) {
    %c0_i32 = arith.constant 0 : i32
    %c0_i32_0 = arith.constant 0 : i32
    %c0_i32_1 = arith.constant 0 : i32
    return %c0_i32, %c0_i32_0 : i32, i32
  }
  func.func @transform_6(%arg0: i32, %arg1: i32) -> (i32, i32) {
    %c0_i32 = arith.constant 0 : i32
    %c0_i32_0 = arith.constant 0 : i32
    %c0_i32_1 = arith.constant 0 : i32
    return %c0_i32, %c0_i32_0 : i32, i32
  }
  func.func @transform_7(%arg0: i32, %arg1: i32) -> (i32, i32) {
    %c0_i32 = arith.constant 0 : i32
    %c0_i32_0 = arith.constant 0 : i32
    %c0_i32_1 = arith.constant 0 : i32
    return %c0_i32, %c0_i32_0 : i32, i32
  }
  func.func @transform_8(%arg0: i32, %arg1: i32) -> (i32, i32, i32) {
    %c0_i32 = arith.constant 0 : i32
    %c0_i32_0 = arith.constant 0 : i32
    %c0_i32_1 = arith.constant 0 : i32
    %c0_i32_2 = arith.constant 0 : i32
    return %c0_i32, %c0_i32_0, %c0_i32_1 : i32, i32, i32
  }
  func.func @transform_9(%arg0: i32, %arg1: i32) -> (i32, i32) {
    %c0_i32 = arith.constant 0 : i32
    %c0_i32_0 = arith.constant 0 : i32
    %c0_i32_1 = arith.constant 0 : i32
    return %c0_i32, %c0_i32_0 : i32, i32
  }
  func.func @transform_10(%arg0: i32, %arg1: i32) -> (i32, i32) {
    %c0_i32 = arith.constant 0 : i32
    %c0_i32_0 = arith.constant 0 : i32
    %c0_i32_1 = arith.constant 0 : i32
    return %c0_i32, %c0_i32_0 : i32, i32
  }
  func.func @transform_11(%arg0: i32, %arg1: i32) -> (i32, i32) {
    %c0_i32 = arith.constant 0 : i32
    %c0_i32_0 = arith.constant 0 : i32
    %c0_i32_1 = arith.constant 0 : i32
    return %c0_i32, %c0_i32_0 : i32, i32
  }
  func.func @transform_12(%arg0: i32, %arg1: i32) -> (i32, i32) {
    %c0_i32 = arith.constant 0 : i32
    %c0_i32_0 = arith.constant 0 : i32
    %c0_i32_1 = arith.constant 0 : i32
    return %c0_i32, %c0_i32_0 : i32, i32
  }
  func.func @transform_13(%arg0: i32, %arg1: i32) -> (i32, i32, i32, i32) {
    %c0_i32 = arith.constant 0 : i32
    %c0_i32_0 = arith.constant 0 : i32
    %c0_i32_1 = arith.constant 0 : i32
    return %arg0, %arg1, %c0_i32, %c0_i32_0 : i32, i32, i32, i32
  }
}

</mosaic_0001>

<bundles_post_ra>
// kernel: tpu_custom_call.1
= control target key start
LH: loop header
LB: loop body
LE: loop exit
PB: predicated region body
PF: predicated region fallthrough
CT: control target
= control target key end

     0   :  { %s9985_s0 = inlined_call_operand.vmem [shape: bf16[2,16,16,4], index: 0, kind: input, shape index: {}]   ;;  %s9986_s1 = inlined_call_operand.vmem [shape: bf16[4,2,16,4], index: 1, kind: input, shape index: {}]   ;;  %s9987_s2 = inlined_call_operand.vmem [shape: bf16[4,128], index: 2, kind: input, shape index: {}]   ;;  %s9988_s3 = inlined_call_operand.vmem [shape: f32[1,128], index: 3, kind: input, shape index: {}]   ;;  %s9989_s4 = inlined_call_operand.vmem [shape: bf16[4,128], index: 4, kind: input, shape index: {}]   ;;  %s9990_s5 = inlined_call_operand.vmem [shape: f32[1,128], index: 5, kind: input, shape index: {}]   ;;  %s9991_s6 = inlined_call_operand.vmem [shape: bf16[128,128], index: 6, kind: input, shape index: {}]   ;;  %s9992_s7 = inlined_call_operand.vmem [shape: f32[1,128], index: 7, kind: input, shape index: {}]   ;;  %s9993_s8 = inlined_call_operand.hbm [shape: bf16[9,128,128], index: 8, kind: input, shape index: {}]   ;;  %s9994_s9 = inlined_call_operand.vmem [shape: f32[1,128], index: 9, kind: input, shape index: {}]   ;;  %s9995_s10 = inlined_call_operand.vmem [shape: bf16[128,128], index: 10, kind: input, shape index: {}]   ;;  %s9996_s11 = inlined_call_operand.vmem [shape: bf16[128,128], index: 11, kind: input, shape index: {}]   ;;  %s9997_s12 = inlined_call_operand.vmem [shape: f32[1,128], index: 12, kind: input, shape index: {}]   ;;  %s9998_s13 = inlined_call_operand.hbm [shape: bf16[2,16,16,128], index: 13, kind: output, shape index: {}]  }
   0x1   :  { %10037 = sst [smem:[#allocation45_spill]] %s9993_s8 }
   0x2   :  { %10038 = sst [smem:[#allocation46_spill]] %s9998_s13 }
   0x3   :  { %18 = vsyncpa [#allocation4], 0 }
   0x4   :  { %19 = vsyncpa [#allocation5], 0 }
   0x5   :  { %21 = vsyncpa [#allocation5 + $0x1], 0  ;;  %s8072_s25 = smov 0   ;;  %s8074_s26 = smov 0  }
   0x6   :  { %s8076_s27 = smov 0   ;;  %s8078_s28 = smov 0  }
   0x7   :  { %s8080_s29 = smov 0   ;;  %s8082_s30 = smov 0  }
   0x8   :  { %s8084_s14 = smov 0   ;;  %s8086_s15 = smov 0  }
   0x9 LB: > { %10039 = sst [smem:[#allocation9_spill]] %s7965_s25  ;;  %s5995_s16 = sadd.s32 4294967295, %s7993_s15   ;;  %s7993_s15 = sphi %s8086_s15, %s27_s15   ;;  %s7989_s14 = sphi %s8084_s14, %s10171_s14   ;;  %s7985_s30 = sphi %s8082_s30, %s10170_s30   ;;  %s7981_s29 = sphi %s8080_s29, %s10169_s29   ;;  %s7977_s28 = sphi %s8078_s28, %s10168_s28   ;;  %s7973_s27 = sphi %s8076_s27, %s10167_s27   ;;  %s7969_s26 = sphi %s8074_s26, %s10173_s26   ;;  %s7965_s25 = sphi %s8072_s25, %s10172_s25  }
   0xa   : > { %10040 = sst [smem:[#allocation10_spill]] %s7973_s27  ;;  %s5996_s17 = sadd.s32 4294967294, %s7993_s15  }
   0xb   : > { %10041 = sst [smem:[#allocation11_spill]] %s7985_s30  ;;  %s36_s18 = sadd.s32 1, %s7985_s30 }
   0xc   : > { %10042 = sst [smem:[#allocation12_spill]] %s7989_s14  ;;  %s39_s19 = sadd.s32 1, %s7989_s14 }
   0xd   : > { %p37_p0 = scmp.ge.s32.totalorder %s36_s18, 2  ;;  %s337_s20 = sadd.s32 1, %s7973_s27 }
   0xe   : > { %p347_p1 = scmp.ne.s32.totalorder %s7973_s27, %s7969_s26  ;;  %p348_p2 = scmp.eq.s32.totalorder %s5995_s16, 3 }
   0xf   : > { %s10175_s18 = smov (%p37_p0, %s36_s18), 0  ;;  %s10177_s19 = smov (!%p37_p0, %s39_s19), %s7989_s14 }
  0x10   : > { %10043 = sst [smem:[#allocation13_spill]] %s10175_s18  ;;  %s333_s21 = ssub.s32 %s7985_s30, %s10175_s18 }
  0x11   : > { %p8124_p3 = por %p348_p2, %p347_p1  ;;  %p41_p4 = scmp.ge.s32.totalorder %s10177_s19, 2 }
  0x12   : > { %p353_p5 = scmp.ne.s32.totalorder %s7969_s26, %s7965_s25  ;;  %p354_p6 = scmp.eq.s32.totalorder %s5996_s17, 3 }
  0x13   : > { %s10044_s22 = scalar_select %p8124_p3, 1, 0 }
  0x14   : > { %p5999_p7 = scmp.ge.s32.totalorder %s7993_s15, 1  ;;  %s10179_s19 = smov (%p41_p4, %s10177_s19), 0 }
  0x15   : > { %10045 = sst [smem:[#allocation14_spill]] %s10179_s19  ;;  %p8133_p8 = por %p354_p6, %p353_p5 }
  0x16   : > { %p361_p9 = scmp.lt.s32.totalorder %s7993_s15, 5  ;;  %s332_s24 = ssub.s32 %s7989_s14, %s10179_s19 }
  0x17   : > { %s10046_s23 = scalar_select %p8133_p8, 1, 0 }
  0x18   : > { %s334_s13 = sor.u32 %s333_s21, %s332_s24  ;;  %p8140_p10 = pnand %p5999_p7, %p361_p9 }
  0x19   : > { %10047 = sst [smem:[#allocation15_spill]] %s10046_s23  ;;  %p335_p11 = scmp.eq.s32.totalorder %s334_s13, 0 }
  0x1a   : > { %s10048_s18 = scalar_select %p8140_p10, 1, 0 }
  0x1b   : > { %p8144_p12 = scmp.eq.s32.totalorder %s5995_s16, 0  ;;  %p7277_p13 = pneg %p8140_p10 }
  0x1c   : > { %s8151_s17 = scalar_select %p335_p11, %s7973_s27, %s337_s20  }
  0x1d   : > { %s10049_s30 = scalar_select %p8144_p12, 1, 0 }
  0x1e   : > { %10050 = sst [smem:[#allocation16_spill]] %s8151_s17  ;;  %s7995_s25 = smov [#allocation3]  }
  0x1f   : > { %s391_s23 = sshll.u32 %s7995_s25, 4  ;;  %p8155_p0 = pnand %p8144_p12, %p7277_p13  ;;  %s392_s23 = int_to_ptr.vmem [resolvable:$true] %s391_s23 }
  0x20   : > { %s10052_s8 = sld [smem:[#allocation45_spill]] }
  0x21   : > { %p7869_p2 = pneg %p8155_p0 }
  0x26   : > { %s7867_s16 = scalar_lea.hbm %s10052_s8, 9216 }
  0x27   : > { %p7868_p1 = scmp.ne.s32.totalorder %s10052_s8, %s7867_s16  ;;  %p7874_p6 = scmp.lt.u32.totalorder %s7867_s16, %s10052_s8 }
  0x29   : > { %p7870_p4 = pnand %p7869_p2, %p7868_p1 }
  0x2b   : > { %p7871_p5 = pneg %p7870_p4 }
  0x2d   : > { %p7876_p7 = pnand %p7874_p6, %p7871_p5 }
  0x2f   : > { %7879 = shalt.err (!%p7876_p7)
}
  0x30   : > { %s7880_s17 = scalar_lea.vmem %s392_s23, 9216  ;;  %p7888_p8 = scmp.lt.s32.totalorder %s392_s23, %s392_s23 }
  0x31   : > { %p7881_p9 = scmp.ne.s32.totalorder %s392_s23, %s7880_s17  ;;  %p7889_p3 = scmp.lt.s32.totalorder %s7880_s17, %s7880_s17 }
  0x33   : > { %p7883_p11 = pnand %p7881_p9, %p7869_p2  ;;  %p7890_p12 = por %p7889_p3, %p7888_p8 }
  0x35   : > { %p7884_p13 = pneg %p7883_p11 }
  0x37   : > { %p7891_p10 = pnand %p7890_p12, %p7884_p13 }
  0x39   : > { %7894 = shalt.err (!%p7891_p10)
}
  0x3a   : > { %s7996_s14 = smov 64   ;;  %s7997_s19 = smov 4  }
  0x3b   : > { %7280 = dma.hbm_to_vmem [thread:$0]  (!%p8155_p0), %s10052_s8, 9216, %s392_s23, [#allocation4], %s7996_s14, %s7996_s14, %s7997_s19  }
  0x3c   : > { %p10053_p1 = scmp.ne.s32.totalorder %s10048_s18, 0 }
  0x3e   : > { %445 = sbr.rel (%p10053_p1) target bundleno = 1432 (0x598), region = 72 }
  0x45   : > { %p10054_p4 = scmp.ne.s32.totalorder %s10049_s30, 0 }
  0x47   : > { %7956 = dma.done.wait (%p10054_p4), [#allocation4], 9216  }
  0x48   : > { %7958 = vsyncadd (%p10054_p4), [#allocation4], 4294958080  ;;  %s6009_s17 = sshll.u32 %s7981_s29, 1  ;;  %s8183_s21 = sshll.u32 %s7977_s28, 3  ;;  %vm665_vm0 = vcmask 1041408   ;;  %vm640_vm1 = vcmask 31744  }
  0x49   : > { %s513_s23 = sadd.s32 %s7977_s28, %s6009_s17  ;;  %p502_p3 = scmp.lt.s32.totalorder %s7981_s29, 1  ;;  %v525_v0 = vld [vmem:[%s9989_s4] sm:$0x3]  ;;  %v7369_v15 = vld [vmem:[%s9991_s6 + $0x8] sm:$0xff]   ;;  %v7370_v16 = vld [vmem:[%s9991_s6 + $0x10] sm:$0xff]   ;;  %vm1858_vm11 = vcmask 1043456  }
  0x4a   : > { %p514_p8 = scmp.lt.s32.totalorder %s513_s23, 3  ;;  %p504_p10 = scmp.lt.s32.totalorder %s8183_s21, 15  ;;  %v523_v1 = vld [vmem:[%s9987_s2] sm:$0x3]  ;;  %7270 = vmatprep.subr.msk.bf16.mxu1 %vm665_vm0, %v525_v0  ;;  %v914_v2 = vsel %vm665_vm0, %v525_v0, 0  ;;  %v7371_v17 = vld [vmem:[%s9991_s6 + $0x18] sm:$0xff]  }
  0x4b   : > { %s503_s18 = scalar_select %p502_p3, %s7981_s29, 1  ;;  %7269 = vmatprep.subr.msk.bf16.mxu0 %vm665_vm0, %v523_v1  ;;  %6712 = vmatpush3.bf16.msra.mxu1 %v914_v2  ;;  %v667_v4 = vsel %vm665_vm0, %v523_v1, 0  ;;  %v7368_v14 = vld [vmem:[%s9991_s6] sm:$0xff]   ;;  %v7373_v19 = vld [vmem:[%s9991_s6 + $0x28] sm:$0xff]   ;;  %v7374_v20 = vld [vmem:[%s9991_s6 + $0x30] sm:$0xff]   ;;  %vm1865_vm13 = vcmask 1040384  }
  0x4c   : > { %s10181_s23 = smov (!%p514_p8, %s513_s23), 3  ;;  %6694 = vmatpush3.bf16.msra.mxu0 %v667_v4  ;;  %v7372_v18 = vld [vmem:[%s9991_s6 + $0x20] sm:$0xff]   ;;  %v7375_v21 = vld [vmem:[%s9991_s6 + $0x38] sm:$0xff]   ;;  %vm1979_vm2 = vsmask.f32 3328  ;;  %s10161_s8 = sld [smem:[#allocation46_spill]] }
  0x4d   : > { %s505_s16 = scalar_select %p504_p10, %s8183_s21, 15  ;;  %6733 = vmatprep.subr.bf16.mxu0 %v7368_v14  ;;  %v8255_v22 = vld [vmem:[%s9990_s5] ss:$0 sm:$0xff]  ;;  %vm1980_vm3 = vsmask.f32 7440 }
  0x4e   : > { %s6396_s30 = sshll.u32 %s10181_s23, 4  ;;  %s6007_s25 = sshll.u32 %s503_s18, 5  ;;  %v8263_v27 = vld [vmem:[%s9988_s3] ss:$0 sm:$0xff]  ;;  %vm8457_vm4 = vmor %vm1979_vm2, %vm1980_vm3  ;;  %vm1654_vm9 = vsmask.f32 256 }
  0x4f   : > { %s8196_s13 = scalar_lea.vmem %s9986_s1, %s6396_s30  ;;  %s6006_s17 = sshll.u32 %s505_s16, 1  ;;  %vm1655_vm10 = vsmask.f32 4368  ;;  %vm1859_vm12 = vsmask.f32 7938 }
  0x50   : > { %v7358_v3 = vld [vmem:[%s8196_s13] sm:$0xff]   ;;  %s508_s23 = sadd.s32 %s6007_s25, %s6006_s17  ;;  %v7367_v13 = vld [vmem:[%s8196_s13 + $0x8] sm:$0xff]   ;;  %s498_s13 = sand.u32 1, %s7969_s26  }
  0x51   : > { %s6008_s18 = sshll.u32 %s508_s23, 2  ;;  %6713 = vmatprep.mubr.msk.bf16.mxu1 %vm640_vm1, %v7358_v3  ;;  %s6004_s17 = sshll.u32 %s498_s13, 6 }
  0x52   : > { %s510_s16 = scalar_lea.vmem %s9985_s0, %s6008_s18  ;;  %s6081_s18 = sadd.s32 4294967295, %s8183_s21 }
  0x53   : > { %v7359_v5 = vld [vmem:[%s510_s16] sm:$0xff]   ;;  %v7360_v6 = vld [vmem:[%s510_s16 + $0x8] sm:$0xff]   ;;  %v7361_v7 = vld [vmem:[%s510_s16 + $0x10] sm:$0xff]   ;;  %s9899_s23 = scalar_lea.vmem [#allocation6], %s6004_s17  ;;  %s6392_s21 = sshll.u32 %s7981_s29, 5 }
  0x54   : > { %6714 = vmatmul.mubr.msk.bf16.vlgmr.msra.gmra.mrb[0].mxu1 %vm640_vm1, %v7359_v5  ;;  %6695 = vmatprep.mubr.msk.bf16.mxu0 %vm640_vm1, %v7359_v5  ;;  %v7362_v8 = vld [vmem:[%s510_s16 + $0x18] sm:$0xff]   ;;  %v7363_v9 = vld [vmem:[%s510_s16 + $0x20] sm:$0xff]   ;;  %v7364_v10 = vld [vmem:[%s510_s16 + $0x28] sm:$0xff]   ;;  %s9933_s25 = scalar_lea.sflag [#allocation5], %s498_s13  ;;  %p10162_p0 = scmp.ne.s32.totalorder %s10044_s22, 0 }
  0x55   : > { %6717 = vmatprep.mubr.msk.bf16.mxu1 %vm640_vm1, %v7360_v6  ;;  %6696 = vmatmul.mubr.msk.bf16.vlgmr.msra.gmra.mrb[0].mxu0 %vm640_vm1, %v7360_v6  ;;  %v7365_v11 = vld [vmem:[%s510_s16 + $0x30] sm:$0xff]   ;;  %v7366_v12 = vld [vmem:[%s510_s16 + $0x38] sm:$0xff]   ;;  %s5886_s16 = sshll.u32 %s9899_s23, 4  ;;  %s7999_s19 = smov [#allocation6]   ;;  %s9927_s16 = int_to_ptr.vmem [resolvable:$true] %s5886_s16 }
  0x56   : > { %6699 = vmatprep.mubr.msk.bf16.mxu0 %vm640_vm1, %v7361_v7  ;;  %6734 = vmatpush3.bf16.msra.mxu0 %v7368_v14  ;;  %s7895_s14 = scalar_lea.vmem %s9927_s16, 1024  ;;  %s7899_s24 = sshll.u32 %s7999_s19, 4  ;;  %s7900_s24 = int_to_ptr.vmem [resolvable:$false] %s7899_s24 }
  0x57   : > { %6735 = vmatprep.subr.bf16.mxu0 %v7369_v15  ;;  %p7896_p12 = scmp.ne.s32.totalorder %s9927_s16, %s7895_s14  ;;  %s7901_s17 = scalar_lea.vmem %s7900_s24, 2048 }
  0x58   : > { %p7902_p6 = scmp.lt.s32.totalorder %s9927_s16, %s7900_s24  ;;  %p7903_p7 = scmp.lt.s32.totalorder %s7901_s17, %s7895_s14 }
  0x59   : > { %p7897_p2 = pnand %p7896_p12, %p10162_p0 }
  0x5a   : > { %6736 = vmatpush3.bf16.msra.mxu0 %v7369_v15  ;;  %p7904_p9 = por %p7903_p7, %p7902_p6 }
  0x5b   : > { %6737 = vmatprep.subr.bf16.mxu0 %v7370_v16  ;;  %p7898_p5 = pneg %p7897_p2 }
  0x5c   : > { %6718 = vmatmul.mubr.msk.bf16.gmra.mrb[4].mxu1 %vm640_vm1, %v7361_v7 }
  0x5d   : > { %6721 = vmatprep.mubr.msk.bf16.mxu1 %vm640_vm1, %v7362_v8  ;;  %6700 = vmatmul.mubr.msk.bf16.gmra.mrb[4].mxu0 %vm640_vm1, %v7362_v8  ;;  %p7905_p11 = pnand %p7904_p9, %p7898_p5 }
  0x5e   : > { %6703 = vmatprep.mubr.msk.bf16.mxu0 %vm640_vm1, %v7363_v9  ;;  %6738 = vmatpush3.bf16.msra.mxu0 %v7370_v16 }
  0x5f   : > { %6739 = vmatprep.subr.bf16.mxu0 %v7371_v17 }
  0x62   : > { %6740 = vmatpush3.bf16.msra.mxu0 %v7371_v17 }
  0x63   : > { %6741 = vmatprep.subr.bf16.mxu0 %v7372_v18 }
  0x64   : > { %6722 = vmatmul.mubr.msk.bf16.gmra.mrb[8].mxu1 %vm640_vm1, %v7363_v9 }
  0x65   : > { %6725 = vmatprep.mubr.msk.bf16.mxu1 %vm640_vm1, %v7364_v10  ;;  %6704 = vmatmul.mubr.msk.bf16.gmra.mrb[8].mxu0 %vm640_vm1, %v7364_v10 }
  0x66   : > { %6707 = vmatprep.mubr.msk.bf16.mxu0 %vm640_vm1, %v7365_v11  ;;  %6742 = vmatpush3.bf16.msra.mxu0 %v7372_v18 }
  0x67   : > { %6743 = vmatprep.subr.bf16.mxu0 %v7373_v19 }
  0x6a   : > { %6744 = vmatpush3.bf16.msra.mxu0 %v7373_v19 }
  0x6b   : > { %6745 = vmatprep.subr.bf16.mxu0 %v7374_v20 }
  0x6c   : > { %6726 = vmatmul.mubr.msk.bf16.gmra.mrb[12].mxu1 %vm640_vm1, %v7365_v11 }
  0x6d   : > { %6729 = vmatprep.mubr.msk.bf16.mxu1 %vm640_vm1, %v7366_v12  ;;  %6708 = vmatmul.mubr.msk.bf16.gmra.mrb[12].mxu0 %vm640_vm1, %v7366_v12 }
  0x6e   : > { %6746 = vmatpush3.bf16.msra.mxu0 %v7374_v20 }
  0x6f   : > { %6747 = vmatprep.subr.bf16.mxu0 %v7375_v21 }
  0x72   : > { %6748 = vmatpush3.bf16.msra.mxu0 %v7375_v21 }
  0x74   : > { %6730 = vmatmul.mubr.msk.bf16.gmra.mrb[16].mxu1 %vm640_vm1, %v7367_v13 }
 0x127   : > { %v6715_v23 = vpop.f32.mrb[0].mxu1 }
 0x128   : > { %v8258_v24 = vadd.f32 %v6715_v23, %v8255_v22  ;;  %v950_v25 = vpop.f32.mrb[1].mxu1  ;;  %v6697_v26 = vpop.f32.mrb[0].mxu0 }
 0x129   : > { %v8266_v28 = vadd.f32 %v8255_v22, %v950_v25  ;;  %v6716_v29 = vpop.f32.mrb[2].mxu1  ;;  %v8268_v30 = vpop.f32.mrb[1].mxu0  ;;  %v8279_v37 = vadd.f32 %v6697_v26, %v8263_v27 }
 0x12a   : > { %v6062_v31 = vmul.f32 -1.442695, %v8258_v24  ;;  %v8272_v32 = vadd.f32 %v6716_v29, %v8255_v22  ;;  %v953_v33 = vpop.f32.mrb[3].mxu1  ;;  %v6698_v34 = vpop.f32.mrb[2].mxu0 }
 0x12b   : > { %v6060_v35 = vmul.f32 -1.442695, %v8266_v28  ;;  %v8276_v36 = vadd.f32 %v8255_v22, %v953_v33  ;;  %v8281_v38 = vpop.f32.mrb[3].mxu0  ;;  %v6031_v42 = vmul.f32 -1.442695, %v8279_v37  ;;  %v8290_v45 = vadd.f32 %v6698_v34, %v8263_v27 }
 0x12c   : > { %7494 = vpow2.f32 %v6062_v31  ;;  %v6063_v39 = vmul.f32 -1.442695, %v8272_v32 }
 0x12d   : > { %7496 = vpow2.f32 %v6060_v35  ;;  %v6061_v40 = vmul.f32 -1.442695, %v8276_v36  ;;  %v6032_v58 = vmul.f32 -1.442695, %v8290_v45 }
 0x12e   : > { %7498 = vpow2.f32 %v6063_v39 }
 0x12f   : > { %7500 = vpow2.f32 %v6061_v40  ;;  %v6719_v41 = vpop.f32.mrb[4].mxu1 }
 0x130   : > { %v8287_v43 = vadd.f32 %v6719_v41, %v8255_v22  ;;  %v966_v44 = vpop.f32.mrb[5].mxu1  ;;  %v8292_v46 = vpop.f32.mrb[4].mxu0  ;;  %7502 = vpow2.f32 %v6031_v42 }
 0x131   : > { %v8295_v47 = vadd.f32 %v8255_v22, %v966_v44  ;;  %v6720_v48 = vpop.f32.mrb[6].mxu1  ;;  %v8297_v49 = vpop.f32.mrb[5].mxu0 }
 0x132   : > { %v6066_v50 = vmul.f32 -1.442695, %v8287_v43  ;;  %v8301_v51 = vadd.f32 %v6720_v48, %v8255_v22  ;;  %v969_v52 = vpop.f32.mrb[7].mxu1  ;;  %v8303_v53 = vpop.f32.mrb[6].mxu0 }
 0x133   : > { %v6064_v54 = vmul.f32 -1.442695, %v8295_v47  ;;  %v8307_v55 = vadd.f32 %v8255_v22, %v969_v52  ;;  %v8309_v56 = vpop.f32.mrb[7].mxu0 }
 0x134   : > { %10055 = vst [vmem:[#allocation17_spill] sm:$0xff] %v8309_v56  ;;  %7504 = vpow2.f32 %v6066_v50  ;;  %v6067_v57 = vmul.f32 -1.442695, %v8301_v51 }
 0x135   : > { %7506 = vpow2.f32 %v6064_v54  ;;  %v6065_v59 = vmul.f32 -1.442695, %v8307_v55 }
 0x136   : > { %v7495_v60 = vpop.eup %7494  ;;  %7508 = vpow2.f32 %v6067_v57 }
 0x137   : > { %v7497_v61 = vpop.eup %7496  ;;  %v1091_v62 = vadd.f32 1.0, %v7495_v60  ;;  %7510 = vpow2.f32 %v6065_v59  ;;  %v6723_v63 = vpop.f32.mrb[8].mxu1 }
 0x138   : > { %v7499_v0 = vpop.eup %7498  ;;  %v1089_v1 = vadd.f32 1.0, %v7497_v61  ;;  %v8315_v2 = vadd.f32 %v6723_v63, %v8255_v22  ;;  %v982_v3 = vpop.f32.mrb[9].mxu1  ;;  %7512 = vpow2.f32 %v6032_v58 }
 0x139   : > { %v8317_v4 = vpop.f32.mrb[8].mxu0  ;;  %v7501_v5 = vpop.eup %7500  ;;  %7514 = vrcp.f32 %v1091_v62  ;;  %v1092_v6 = vadd.f32 1.0, %v7499_v0  ;;  %v8320_v7 = vadd.f32 %v8255_v22, %v982_v3 }
 0x13a   : > { %10056 = vst [vmem:[#allocation18_spill] sm:$0xff] %v8317_v4  ;;  %v6724_v8 = vpop.f32.mrb[10].mxu1  ;;  %v8322_v9 = vpop.f32.mrb[9].mxu0  ;;  %7516 = vrcp.f32 %v1089_v1  ;;  %v1090_v10 = vadd.f32 1.0, %v7501_v5  ;;  %v6070_v11 = vmul.f32 -1.442695, %v8315_v2 }
 0x13b   : > { %10057 = vst [vmem:[#allocation19_spill] sm:$0xff] %v8322_v9  ;;  %v8326_v12 = vadd.f32 %v6724_v8, %v8255_v22  ;;  %v985_v13 = vpop.f32.mrb[11].mxu1  ;;  %v8328_v14 = vpop.f32.mrb[10].mxu0  ;;  %7518 = vrcp.f32 %v1092_v6  ;;  %v6068_v15 = vmul.f32 -1.442695, %v8320_v7 }
 0x13c   : > { %10058 = vst [vmem:[#allocation20_spill] sm:$0xff] %v8328_v14  ;;  %v8332_v16 = vadd.f32 %v8255_v22, %v985_v13  ;;  %v8334_v17 = vpop.f32.mrb[11].mxu0  ;;  %7520 = vrcp.f32 %v1090_v10  ;;  %v7503_v19 = vpop.eup %7502 }
 0x13d   : > { %10059 = vst [vmem:[#allocation21_spill] sm:$0xff] %v8334_v17  ;;  %v6071_v18 = vmul.f32 -1.442695, %v8326_v12  ;;  %7522 = vpow2.f32 %v6070_v11  ;;  %v816_v5 = vadd.f32 1.0, %v7503_v19 }
 0x13e   : > { %v6069_v20 = vmul.f32 -1.442695, %v8332_v16  ;;  %v7505_v21 = vpop.eup %7504  ;;  %7524 = vpow2.f32 %v6068_v15 }
 0x13f   : > { %v7507_v23 = vpop.eup %7506  ;;  %v1095_v25 = vadd.f32 1.0, %v7505_v21  ;;  %7526 = vpow2.f32 %v6071_v18  ;;  %v6727_v26 = vpop.f32.mrb[12].mxu1 }
 0x140   : > { %v7509_v29 = vpop.eup %7508  ;;  %v1093_v31 = vadd.f32 1.0, %v7507_v23  ;;  %7528 = vpow2.f32 %v6069_v20  ;;  %v8339_v33 = vadd.f32 %v6727_v26, %v8255_v22  ;;  %v998_v34 = vpop.f32.mrb[13].mxu1 }
 0x141   : > { %v8341_v35 = vpop.f32.mrb[12].mxu0  ;;  %v7511_v39 = vpop.eup %7510  ;;  %7530 = vrcp.f32 %v1095_v25  ;;  %v1096_v40 = vadd.f32 1.0, %v7509_v29  ;;  %v8344_v41 = vadd.f32 %v8255_v22, %v998_v34 }
 0x142   : > { %10060 = vst [vmem:[#allocation22_spill] sm:$0xff] %v8341_v35  ;;  %v6728_v42 = vpop.f32.mrb[14].mxu1  ;;  %v8346_v44 = vpop.f32.mrb[13].mxu0  ;;  %7532 = vrcp.f32 %v1093_v31  ;;  %v1094_v50 = vadd.f32 1.0, %v7511_v39  ;;  %v6074_v52 = vmul.f32 -1.442695, %v8339_v33 }
 0x143   : > { %10061 = vst [vmem:[#allocation23_spill] sm:$0xff] %v8346_v44  ;;  %v8348_v48 = vpop.eup %7512  ;;  %v8352_v54 = vadd.f32 %v6728_v42, %v8255_v22  ;;  %v1001_v57 = vpop.f32.mrb[15].mxu1  ;;  %7534 = vrcp.f32 %v1096_v40  ;;  %v6072_v60 = vmul.f32 -1.442695, %v8344_v41 }
 0x144   : > { %v8354_v58 = vpop.f32.mrb[14].mxu0  ;;  %v7515_v59 = vpop.eup %7514  ;;  %v8358_v61 = vadd.f32 %v8255_v22, %v1001_v57  ;;  %7536 = vrcp.f32 %v1094_v50 }
 0x145   : > { %10062 = vst [vmem:[#allocation24_spill] sm:$0xff] %v8354_v58  ;;  %v8360_v62 = vpop.f32.mrb[15].mxu0  ;;  %v7517_v63 = vpop.eup %7516  ;;  %v6075_v0 = vmul.f32 -1.442695, %v8352_v54  ;;  %7538 = vpow2.f32 %v6074_v52  ;;  %v8365_v8 = vmul.f32 %v7515_v59, %v8258_v24 }
 0x146   : > { %10063 = vst [vmem:[#allocation25_spill] sm:$0xff] %v8360_v62  ;;  %v7519_v1 = vpop.eup %7518  ;;  %v6073_v3 = vmul.f32 -1.442695, %v8358_v61  ;;  %7540 = vpow2.f32 %v6072_v60  ;;  %v1149_v13 = vmul.f32 %v7517_v63, %v8266_v28 }
 0x147   : > { %v7521_v6 = vpop.eup %7520  ;;  %10064 = vst [vmem:[#allocation26_spill] sm:$0xff] %v8365_v8  ;;  %v8368_v10 = vmul.f32 %v7519_v1, %v8272_v32  ;;  %7542 = vpow2.f32 %v6075_v0  ;;  %v6731_v18 = vpop.f32.mrb[16].mxu1 }
 0x148   : > { %v7523_v11 = vpop.eup %7522  ;;  %v1150_v15 = vmul.f32 %v7521_v6, %v8276_v36  ;;  %7544 = vpow2.f32 %v6073_v3  ;;  %v8375_v24 = vadd.f32 %v6731_v18, %v8255_v22  ;;  %v1014_v23 = vpop.f32.mrb[17].mxu1 }
 0x149   : > { %10065 = vst [vmem:[#allocation27_spill] sm:$0xff] %v8368_v10  ;;  %v7525_v20 = vpop.eup %7524  ;;  %v1248_v21 = vpack.c.bf16 %v8368_v10, %v8365_v8  ;;  %v1099_v19 = vadd.f32 1.0, %v7523_v11  ;;  %v8378_v26 = vadd.f32 %v8255_v22, %v1014_v23  ;;  %v6732_v28 = vpop.f32.mrb[18].mxu1  ;;  %7546 = vrcp.f32 %v816_v5 }
 0x14a   : > { %v7527_v32 = vpop.eup %7526  ;;  %v1097_v25 = vadd.f32 1.0, %v7525_v20  ;;  %v1247_v29 = vpack.c.bf16 %v1150_v15, %v1149_v13  ;;  %v6078_v34 = vmul.f32 -1.442695, %v8375_v24  ;;  %v8382_v39 = vadd.f32 %v6732_v28, %v8255_v22  ;;  %v1017_v40 = vpop.f32.mrb[19].mxu1 }
 0x14b   : > { %v7529_v36 = vpop.eup %7528  ;;  %7548 = vrcp.f32 %v1099_v19  ;;  %v1100_v31 = vadd.f32 1.0, %v7527_v32  ;;  %v6076_v52 = vmul.f32 -1.442695, %v8378_v26  ;;  %v8386_v57 = vadd.f32 %v8255_v22, %v1017_v40 }
 0x14c   : > { %v7531_v42 = vpop.eup %7530  ;;  %7550 = vrcp.f32 %v1097_v25  ;;  %v1098_v50 = vadd.f32 1.0, %v7529_v36  ;;  %6749 = vmatprep.mubr.bf16.mxu0 %v1247_v29  ;;  %v6079_v60 = vmul.f32 -1.442695, %v8382_v39 }
 0x14d   : > { %v7533_v59 = vpop.eup %7532  ;;  %7552 = vrcp.f32 %v1100_v31  ;;  %6750 = vmatmul.mubr.bf16.vlgmr.msra.gmra.mrb[16].mxu0 %v1248_v21  ;;  %v6077_v0 = vmul.f32 -1.442695, %v8386_v57  ;;  %v8400_v13 = vmul.f32 %v7531_v42, %v8287_v43  ;;  %v817_v43 = vadd.f32 1.0, %v8348_v48 }
 0x14e   : > { %v7535_v63 = vpop.eup %7534  ;;  %7554 = vrcp.f32 %v1098_v50  ;;  %v8394_v6 = vmul.f32 %v7533_v59, %v8295_v47 }
 0x14f   : > { %v7537_v1 = vpop.eup %7536  ;;  %v8391_v3 = vmul.f32 %v7535_v63, %v8301_v51  ;;  %7556 = vpow2.f32 %v6078_v34  ;;  %10069 = vst [vmem:[#allocation31_spill] sm:$0xff] %v8400_v13 }
 0x150   : > { %v7539_v5 = vpop.eup %7538  ;;  %10067 = vst [vmem:[#allocation29_spill] sm:$0xff] %v8394_v6  ;;  %v8397_v22 = vmul.f32 %v7537_v1, %v8307_v55  ;;  %7558 = vpow2.f32 %v6076_v52 }
 0x151   : > { %10066 = vst [vmem:[#allocation28_spill] sm:$0xff] %v8391_v3  ;;  %v7541_v11 = vpop.eup %7540  ;;  %v1103_v15 = vadd.f32 1.0, %v7539_v5  ;;  %7560 = vpow2.f32 %v6079_v60  ;;  %v1250_v55 = vpack.c.bf16 %v8391_v3, %v8400_v13 }
 0x152   : > { %10068 = vst [vmem:[#allocation30_spill] sm:$0xff] %v8397_v22  ;;  %v7543_v18 = vpop.eup %7542  ;;  %v1101_v20 = vadd.f32 1.0, %v7541_v11  ;;  %7562 = vpow2.f32 %v6077_v0  ;;  %v1249_v51 = vpack.c.bf16 %v8397_v22, %v8394_v6 }
 0x153   : > { %v7545_v21 = vpop.eup %7544  ;;  %7564 = vrcp.f32 %v1103_v15  ;;  %v1104_v47 = vadd.f32 1.0, %v7543_v18 }
 0x154   : > { %v7547_v19 = vpop.eup %7546  ;;  %7566 = vrcp.f32 %v1101_v20  ;;  %v1102_v23 = vadd.f32 1.0, %v7545_v21  ;;  %6753 = vmatprep.mubr.bf16.mxu0 %v1249_v51 }
 0x155   : > { %v7549_v32 = vpop.eup %7548  ;;  %7568 = vrcp.f32 %v1104_v47  ;;  %6754 = vmatmul.mubr.bf16.gmra.mrb[20].mxu0 %v1250_v55  ;;  %v8433_v20 = vmul.f32 %v7547_v19, %v8279_v37 }
 0x156   : > { %v7551_v25 = vpop.eup %7550  ;;  %7570 = vrcp.f32 %v1102_v23  ;;  %v8417_v48 = vmul.f32 %v7549_v32, %v8315_v2 }
 0x157   : > { %v7553_v28 = vpop.eup %7552  ;;  %7572 = vrcp.f32 %v817_v43  ;;  %v8411_v34 = vmul.f32 %v7551_v25, %v8320_v7  ;;  %10077 = vst [vmem:[#allocation39_spill] sm:$0xff] %v8433_v20 }
 0x158   : > { %v7555_v29 = vpop.eup %7554  ;;  %v8408_v36 = vmul.f32 %v7553_v28, %v8326_v12  ;;  %10073 = vst [vmem:[#allocation35_spill] sm:$0xff] %v8417_v48 }
 0x159   : > { %v7557_v31 = vpop.eup %7556  ;;  %10071 = vst [vmem:[#allocation33_spill] sm:$0xff] %v8411_v34  ;;  %v8414_v40 = vmul.f32 %v7555_v29, %v8332_v16  ;;  %v7376_v29 = vld [vmem:[#allocation3 + $0xc0] sm:$0xff]  }
 0x15a   : > { %10070 = vst [vmem:[#allocation32_spill] sm:$0xff] %v8408_v36  ;;  %v7559_v42 = vpop.eup %7558  ;;  %v1107_v50 = vadd.f32 1.0, %v7557_v31  ;;  %v1252_v7 = vpack.c.bf16 %v8408_v36, %v8417_v48  ;;  %6877 = vmatprep.subr.bf16.mxu1 %v7376_v29  ;;  %v7998_v31 = vmov 0  }
 0x15b   : > { %10072 = vst [vmem:[#allocation34_spill] sm:$0xff] %v8414_v40  ;;  %v7561_v52 = vpop.eup %7560  ;;  %v1105_v59 = vadd.f32 1.0, %v7559_v42  ;;  %v1251_v60 = vpack.c.bf16 %v8414_v40, %v8411_v34  ;;  %6878 = vmatpush3.bf16.msra.mxu1 %v7376_v29  ;;  %1217 = vst [vmem:[#allocation2 + $0x18] sm:$0xf] %v7998_v31  ;;  %v7382_v42 = vld [vmem:[#allocation3 + $0x48] sm:$0xff]   ;;  %v7394_v29 = vld [vmem:[#allocation3 + $0x78] sm:$0xff]  }
 0x15c   : > { %v7563_v12 = vpop.eup %7562  ;;  %7574 = vrcp.f32 %v1107_v50  ;;  %v1108_v63 = vadd.f32 1.0, %v7561_v52  ;;  %1218 = vst [vmem:[#allocation2 + $0x1c] sm:$0xf] %v7998_v31  ;;  %1219 = vst [vmem:[#allocation2 + $0x20] sm:$0x1] %v7998_v31  ;;  %v7381_v50 = vld [vmem:[#allocation3 + $0xe0] sm:$0xff]  }
 0x15d   : > { %v7565_v0 = vpop.eup %7564  ;;  %7576 = vrcp.f32 %v1105_v59  ;;  %v1106_v16 = vadd.f32 1.0, %v7563_v12  ;;  %6757 = vmatprep.mubr.bf16.mxu0 %v1251_v60  ;;  %1211 = vst [vmem:[#allocation2] sm:$0xf] %v7998_v31  ;;  %1212 = vst [vmem:[#allocation2 + $0x4] sm:$0xf] %v7998_v31  ;;  %v7383_v52 = vld [vmem:[#allocation3 + $0x50] sm:$0xff]  }
 0x15e   : > { %v7567_v1 = vpop.eup %7566  ;;  %7578 = vrcp.f32 %v1108_v63  ;;  %6758 = vmatmul.mubr.bf16.gmra.mrb[24].mxu0 %v1252_v7  ;;  %v8436_v21 = vmul.f32 %v7565_v0, %v8339_v33  ;;  %1213 = vst [vmem:[#allocation2 + $0x8] sm:$0x1] %v7998_v31  ;;  %1214 = vst [vmem:[#allocation2 + $0xc] sm:$0xf] %v7998_v31  ;;  %v7384_v59 = vld [vmem:[#allocation3 + $0xe8] sm:$0xff]   ;;  %v7385_v60 = vld [vmem:[#allocation3 + $0x58] sm:$0xff]  }
 0x15f   : > { %v7569_v2 = vpop.eup %7568  ;;  %7580 = vrcp.f32 %v1106_v16  ;;  %v8427_v15 = vmul.f32 %v7567_v1, %v8344_v41  ;;  %1215 = vst [vmem:[#allocation2 + $0x10] sm:$0xf] %v7998_v31  ;;  %1216 = vst [vmem:[#allocation2 + $0x14] sm:$0x1] %v7998_v31  ;;  %v7386_v12 = vld [vmem:[#allocation3 + $0xf0] sm:$0xff]   ;;  %v7387_v63 = vld [vmem:[#allocation3 + $0x60] sm:$0xff]  }
 0x160   : > { %v7571_v5 = vpop.eup %7570  ;;  %v8424_v11 = vmul.f32 %v7569_v2, %v8352_v54  ;;  %10078 = vst [vmem:[#allocation40_spill] sm:$0xff] %v8436_v21  ;;  %1220 = vst [vmem:[#allocation2 + $0x24] sm:$0xf] %v7998_v31  ;;  %v7388_v7 = vld [vmem:[#allocation3 + $0xf8] sm:$0xff]   ;;  %v7389_v0 = vld [vmem:[#allocation3 + $0x68] sm:$0xff]  }
 0x161   : > { %10075 = vst [vmem:[#allocation37_spill] sm:$0xff] %v8427_v15  ;;  %v8430_v18 = vmul.f32 %v7571_v5, %v8358_v61  ;;  %v7573_v51 = vpop.eup %7572  ;;  %1221 = vst [vmem:[#allocation2 + $0x28] sm:$0xf] %v7998_v31 }
 0x162   : > { %10074 = vst [vmem:[#allocation36_spill] sm:$0xff] %v8424_v11  ;;  %v8441_v55 = vmul.f32 %v7573_v51, %v8290_v45  ;;  %v1254_v41 = vpack.c.bf16 %v8424_v11, %v8436_v21  ;;  %1222 = vst [vmem:[#allocation2 + $0x2c] sm:$0x1] %v7998_v31 }
 0x163   : > { %10076 = vst [vmem:[#allocation38_spill] sm:$0xff] %v8430_v18  ;;  %v1253_v47 = vpack.c.bf16 %v8430_v18, %v8427_v15  ;;  %1223 = vst [vmem:[#allocation2 + $0x30] sm:$0xf] %v7998_v31 }
 0x164   : > { %10079 = vst [vmem:[#allocation41_spill] sm:$0xff] %v8441_v55  ;;  %1224 = vst [vmem:[#allocation2 + $0x34] sm:$0xf] %v7998_v31  ;;  %v1933_v16 = vld [vmem:[#allocation2] sm:$0xf] }
 0x165   : > { %6761 = vmatprep.mubr.bf16.mxu0 %v1253_v47  ;;  %1225 = vst [vmem:[#allocation2 + $0x38] sm:$0x1] %v7998_v31  ;;  %1226 = vst [vmem:[#allocation2 + $0x3c] sm:$0xf] %v7998_v31  ;;  %v1934_v1 = vld [vmem:[#allocation2 + $0x4] sm:$0xf] }
 0x166   : > { %v7575_v61 = vpop.eup %7574  ;;  %6762 = vmatmul.mubr.bf16.gmra.mrb[28].mxu0 %v1254_v41  ;;  %1227 = vst [vmem:[#allocation2 + $0x40] sm:$0xf] %v7998_v31  ;;  %1228 = vst [vmem:[#allocation2 + $0x44] sm:$0x1] %v7998_v31  ;;  %v1983_v2 = vshrl.u32 %v1933_v16, 16  ;;  %v1986_v5 = vshll.u32 %v1933_v16, 16 }
 0x167   : > { %v7577_v37 = vpop.eup %7576  ;;  %v1167_v33 = vmul.f32 %v7575_v61, %v8375_v24  ;;  %1229 = vst [vmem:[#allocation2 + $0x48] sm:$0xf] %v7998_v31  ;;  %1230 = vst [vmem:[#allocation2 + $0x4c] sm:$0xf] %v7998_v31  ;;  %v7377_v24 = vld [vmem:[#allocation3 + $0xc8] sm:$0xff]   ;;  %v1992_v51 = vshll.u32 %v1934_v1, 16 }
 0x168   : > { %v7579_v19 = vpop.eup %7578  ;;  %v8450_v32 = vmul.f32 %v7577_v37, %v8378_v26  ;;  %1231 = vst [vmem:[#allocation2 + $0x50] sm:$0x1] %v7998_v31  ;;  %1232 = vst [vmem:[#allocation2 + $0x54] sm:$0xf] %v7998_v31  ;;  %6879 = vmatprep.subr.bf16.mxu1 %v7377_v24  ;;  %v7378_v26 = vld [vmem:[#allocation3 + $0xd0] sm:$0xff]   ;;  %v1996_v47 = vshrl.u32 %v1934_v1, 16 }
 0x169   : > { %v7581_v23 = vpop.eup %7580  ;;  %v1168_v43 = vmul.f32 %v7579_v19, %v8382_v39  ;;  %1233 = vst [vmem:[#allocation2 + $0x58] sm:$0xf] %v7998_v31  ;;  %1234 = vst [vmem:[#allocation2 + $0x5c] sm:$0x1] %v7998_v31  ;;  %6880 = vmatpush3.bf16.msra.mxu1 %v7377_v24  ;;  %v7379_v39 = vld [vmem:[#allocation3 + $0xd8] sm:$0xff]   ;;  %v7392_v41 = vld [vmem:[#allocation3 + $0x70] sm:$0xff]  }
 0x16a   : > { %10080 = vst [vmem:[#allocation42_spill] sm:$0xff] %v8450_v32  ;;  %v8453_v45 = vmul.f32 %v7581_v23, %v8386_v57  ;;  %1235 = vst [vmem:[#allocation2 + $0x60] sm:$0xf] %v7998_v31  ;;  %6881 = vmatprep.subr.bf16.mxu1 %v7378_v26  ;;  %v7380_v57 = vld [vmem:[#allocation3 + $0x40] sm:$0xff]   ;;  %v1985_v61 = vrot.slane %v1983_v2, 4  ;;  %v1988_v37 = vrot.slane %v1986_v5, 5 }
 0x16b   : > { %v1256_v25 = vpack.c.bf16 %v1168_v43, %v1167_v33  ;;  %1236 = vst [vmem:[#allocation2 + $0x64] sm:$0xf] %v7998_v31  ;;  %1237 = vst [vmem:[#allocation2 + $0x68] sm:$0x1] %v7998_v31  ;;  %6769 = vmatprep.subr.bf16.mxu0 %v7380_v57  ;;  %v1994_v19 = vrot.slane %v1992_v51, 5  ;;  %v1998_v33 = vrot.slane %v1996_v47, 4 }
 0x16c   : > { %10081 = vst [vmem:[#allocation43_spill] sm:$0xff] %v8453_v45  ;;  %v1255_v28 = vpack.c.bf16 %v8453_v45, %v8450_v32  ;;  %1238 = vst [vmem:[#allocation2 + $0x6c] sm:$0xf] %v7998_v31  ;;  %6770 = vmatpush3.bf16.msra.mxu0 %v7380_v57  ;;  %v1969_v23 = vld [vmem:[#allocation2 + $0x8] sm:$0x1]  ;;  %v1989_v43 = vor.u32 %v1988_v37, %v1985_v61 }
 0x16d   : > { %1239 = vst [vmem:[#allocation2 + $0x70] sm:$0xf] %v7998_v31  ;;  %1240 = vst [vmem:[#allocation2 + $0x74] sm:$0x1] %v7998_v31  ;;  %6882 = vmatpush3.bf16.msra.mxu1 %v7378_v26  ;;  %6771 = vmatprep.subr.bf16.mxu0 %v7382_v42  ;;  %v1861_v35 = vld [vmem:[#allocation2 + $0xc] sm:$0xf] }
 0x16e   : > { %6765 = vmatprep.mubr.bf16.mxu0 %v1255_v28  ;;  %1241 = vst [vmem:[#allocation2 + $0x78] sm:$0xf] %v7998_v31  ;;  %1242 = vst [vmem:[#allocation2 + $0x7c] sm:$0xf] %v7998_v31  ;;  %6883 = vmatprep.subr.bf16.mxu1 %v7379_v39  ;;  %v1999_v28 = vor.u32 %v1998_v33, %v1994_v19  ;;  %v1867_v17 = vld [vmem:[#allocation2 + $0x14] sm:$0x1] }
 0x16f   : > { %6766 = vmatmul.mubr.bf16.gmra.mrb[32].mxu0 %v1256_v25  ;;  %1243 = vst [vmem:[#allocation2 + $0x80] sm:$0x1] %v7998_v31  ;;  %1244 = vst [vmem:[#allocation2 + $0x84] sm:$0xf] %v7998_v31  ;;  %v2002_v25 = vshll.u32 %v1969_v23, 16 }
 0x170   : > { %1245 = vst [vmem:[#allocation2 + $0x88] sm:$0xf] %v7998_v31  ;;  %1246 = vst [vmem:[#allocation2 + $0x8c] sm:$0x1] %v7998_v31  ;;  %6772 = vmatpush3.bf16.msra.mxu0 %v7382_v42  ;;  %v1990_v31 = vrot.slane %v1989_v43, 4  ;;  %v2000_v26 = vrot.slane %v1999_v28, 4 }
 0x171   : > { %6884 = vmatpush3.bf16.msra.mxu1 %v7379_v39  ;;  %6773 = vmatprep.subr.bf16.mxu0 %v7383_v52  ;;  %v2004_v39 = vrot.slane %v2002_v25, 5  ;;  %v8463_v42 = vld [vmem:[#allocation3 + $0x100] sm:$0xff]  }
 0x172   : > { %6885 = vmatprep.subr.bf16.mxu1 %v7381_v50  ;;  %v1995_v57 = vsel %vm8457_vm4, %v1990_v31, %v1994_v19 }
 0x174   : > { %6774 = vmatpush3.bf16.msra.mxu0 %v7383_v52 }
 0x175   : > { %6886 = vmatpush3.bf16.msra.mxu1 %v7381_v50  ;;  %6775 = vmatprep.subr.bf16.mxu0 %v7385_v60  ;;  %v2005_v50 = vsel %vm8457_vm4, %v2000_v26, %v2004_v39 }
 0x176   : > { %6887 = vmatprep.subr.bf16.mxu1 %v7384_v59  ;;  %v6131_v52 = vcombine.low %v1995_v57, %v2005_v50 }
 0x178   : > { %6776 = vmatpush3.bf16.msra.mxu0 %v7385_v60  ;;  %6785 = vmatprep.mubr.bf16.mxu0 %v6131_v52  ;;  %v8474_v60 = vld [vmem:[%s9992_s7] ss:$0 sm:$0xff] }
 0x179   : > { %6888 = vmatpush3.bf16.msra.mxu1 %v7384_v59  ;;  %6777 = vmatprep.subr.bf16.mxu0 %v7387_v63  ;;  %v8468_v59 = vld [vmem:[#allocation3] sm:$0xff]  }
 0x17a   : > { %6889 = vmatprep.subr.bf16.mxu1 %v7386_v12 }
 0x17c   : > { %6778 = vmatpush3.bf16.msra.mxu0 %v7387_v63 }
 0x17d   : > { %6890 = vmatpush3.bf16.msra.mxu1 %v7386_v12  ;;  %6779 = vmatprep.subr.bf16.mxu0 %v7389_v0 }
 0x17e   : > { %6891 = vmatprep.subr.bf16.mxu1 %v7388_v7 }
 0x180   : > { %6780 = vmatpush3.bf16.msra.mxu0 %v7389_v0 }
 0x181   : > { %6892 = vmatpush3.bf16.msra.mxu1 %v7388_v7  ;;  %6781 = vmatprep.subr.bf16.mxu0 %v7392_v41 }
 0x182   : > { %6913 = vmatprep.subr.bf16.mxu1 %v8463_v42 }
 0x184   : > { %6782 = vmatpush3.bf16.msra.mxu0 %v7392_v41 }
 0x185   : > { %6783 = vmatprep.subr.bf16.mxu0 %v7394_v29 }
 0x188   : > { %6784 = vmatpush3.bf16.msra.mxu0 %v7394_v29 }
 0x189   : > { %6805 = vmatprep.subr.bf16.mxu0 %v8468_v59 }
 0x220   : > { %v6751_v12 = vpop.f32.mrb[16].mxu0 }
 0x221   : > { %v8477_v63 = vadd.f32 %v6751_v12, %v8474_v60  ;;  %v1345_v7 = vpop.f32.mrb[17].mxu0 }
 0x222   : > { %v8480_v0 = vadd.f32 %v8474_v60, %v1345_v7  ;;  %v6752_v16 = vpop.f32.mrb[18].mxu0 }
 0x223   : > { %v6093_v1 = vmul.f32 -1.442695, %v8477_v63  ;;  %v8484_v2 = vadd.f32 %v6752_v16, %v8474_v60  ;;  %v1348_v5 = vpop.f32.mrb[19].mxu0 }
 0x224   : > { %v6091_v51 = vmul.f32 -1.442695, %v8480_v0  ;;  %v8488_v47 = vadd.f32 %v8474_v60, %v1348_v5 }
 0x225   : > { %7582 = vpow2.f32 %v6093_v1  ;;  %v6094_v41 = vmul.f32 -1.442695, %v8484_v2  ;;  %v8509_v1 = vstv %s6081_s18  ;;  %s6413_s18 = sshll.u32 %s7977_s28, 4 }
 0x226   : > { %7584 = vpow2.f32 %v6091_v51  ;;  %v6092_v61 = vmul.f32 -1.442695, %v8488_v47  ;;  %vm1181_vm7 = vcmp.ge.s32.totalorder %v8509_v1, 0  ;;  %vm1191_vm8 = vcmp.lt.s32.totalorder %v8509_v1, 16  ;;  %s5883_s30 = sadd.s32 %s6413_s18, %s6392_s21 }
 0x227   : > { %7586 = vpow2.f32 %v6094_v41  ;;  %v8569_v45 = vadd.s32 4, %v8509_v1  ;;  %vm8597_vm1 = vmand %vm1181_vm7, %vm1191_vm8  ;;  %s6393_s20 = sshll.u32 %s5883_s30, 6 }
 0x228   : > { %7588 = vpow2.f32 %v6092_v61  ;;  %v6755_v37 = vpop.f32.mrb[20].mxu0  ;;  %vm8639_vm7 = vmand %vm1865_vm13, %vm1654_vm9  ;;  %s9925_s27 = scalar_lea.hbm %s10161_s8, %s6393_s20 }
 0x229   : > { %v8493_v19 = vadd.f32 %v6755_v37, %v8474_v60  ;;  %v1361_v23 = vpop.f32.mrb[21].mxu0  ;;  %vm1195_vm13 = vcmp.lt.s32.totalorder %v8569_v45, 16 }
 0x22a   : > { %v8496_v33 = vadd.f32 %v8474_v60, %v1361_v23  ;;  %v6756_v43 = vpop.f32.mrb[22].mxu0  ;;  %v8516_v23 = vadd.f32 %v8263_v27, %v8268_v30 }
 0x22b   : > { %v6097_v25 = vmul.f32 -1.442695, %v8493_v19  ;;  %v8500_v28 = vadd.f32 %v6756_v43, %v8474_v60  ;;  %v1364_v29 = vpop.f32.mrb[23].mxu0 }
 0x22c   : > { %v6095_v31 = vmul.f32 -1.442695, %v8496_v33  ;;  %v8504_v26 = vadd.f32 %v8474_v60, %v1364_v29  ;;  %10084 = vst [vmem:[#allocation44_spill] sm:$0xff] %v8516_v23 }
 0x22d   : > { %7590 = vpow2.f32 %v6097_v25  ;;  %v6098_v39 = vmul.f32 -1.442695, %v8500_v28 }
 0x22e   : > { %7592 = vpow2.f32 %v6095_v31  ;;  %v6096_v57 = vmul.f32 -1.442695, %v8504_v26  ;;  %v8522_v31 = vadd.s32 1, %v8509_v1 }
 0x22f   : > { %v7583_v50 = vpop.eup %7582  ;;  %7594 = vpow2.f32 %v6098_v39 }
 0x230   : > { %v7585_v52 = vpop.eup %7584  ;;  %v1486_v12 = vadd.f32 1.0, %v7583_v50  ;;  %7596 = vpow2.f32 %v6096_v57  ;;  %vm1182_vm5 = vcmp.ge.s32.totalorder %v8522_v31, 0  ;;  %vm1192_vm6 = vcmp.lt.s32.totalorder %v8522_v31, 16 }
 0x231   : > { %v7587_v7 = vpop.eup %7586  ;;  %v1484_v16 = vadd.f32 1.0, %v7585_v52  ;;  %v6759_v5 = vpop.f32.mrb[24].mxu0  ;;  %vm8583_vm14 = vmand %vm1182_vm5, %vm1192_vm6 }
 0x232   : > { %v7589_v51 = vpop.eup %7588  ;;  %7598 = vrcp.f32 %v1486_v12  ;;  %v1487_v41 = vadd.f32 1.0, %v7587_v7  ;;  %v8512_v61 = vadd.f32 %v6759_v5, %v8474_v60  ;;  %v1377_v37 = vpop.f32.mrb[25].mxu0  ;;  %vm8625_vm5 = vmor %vm1654_vm9, %vm1655_vm10 }
 0x233   : > { %7600 = vrcp.f32 %v1484_v16  ;;  %v1485_v43 = vadd.f32 1.0, %v7589_v51  ;;  %v8519_v25 = vadd.f32 %v8474_v60, %v1377_v37  ;;  %v6760_v29 = vpop.f32.mrb[26].mxu0  ;;  %v8534_v16 = vmul.f32 -1.442695, %v8516_v23  ;;  %vm8631_vm6 = vmand %vm1858_vm11, %vm1859_vm12 }
 0x234   : > { %7602 = vrcp.f32 %v1487_v41  ;;  %v6101_v39 = vmul.f32 -1.442695, %v8512_v61  ;;  %v8526_v57 = vadd.f32 %v6760_v29, %v8474_v60  ;;  %v1380_v50 = vpop.f32.mrb[27].mxu0  ;;  %v8539_v41 = vadd.f32 %v8263_v27, %v8281_v38 }
 0x235   : > { %7604 = vrcp.f32 %v1485_v43  ;;  %v6099_v30 = vmul.f32 -1.442695, %v8519_v25  ;;  %v8530_v52 = vadd.f32 %v8474_v60, %v1380_v50  ;;  %vm1185_vm12 = vcmp.ge.s32.totalorder %v8569_v45, 0  ;;  %v7398_v45 = vld [vmem:[#allocation3 + $0x110] sm:$0xff]  }
 0x236   : > { %7606 = vpow2.f32 %v6101_v39  ;;  %v6102_v12 = vmul.f32 -1.442695, %v8526_v57 }
 0x237   : > { %v7591_v7 = vpop.eup %7590  ;;  %7608 = vpow2.f32 %v6099_v30  ;;  %v6100_v5 = vmul.f32 -1.442695, %v8530_v52 }
 0x238   : > { %v7593_v51 = vpop.eup %7592  ;;  %v1490_v37 = vadd.f32 1.0, %v7591_v7  ;;  %7610 = vpow2.f32 %v6102_v12  ;;  %v8549_v12 = vadd.s32 3, %v8509_v1 }
 0x239   : > { %v7595_v43 = vpop.eup %7594  ;;  %v1488_v29 = vadd.f32 1.0, %v7593_v51  ;;  %7612 = vpow2.f32 %v6100_v5  ;;  %v6763_v39 = vpop.f32.mrb[28].mxu0 }
 0x23a   : > { %v7597_v50 = vpop.eup %7596  ;;  %7614 = vrcp.f32 %v1490_v37  ;;  %v1491_v30 = vadd.f32 1.0, %v7595_v43  ;;  %v8546_v27 = vadd.f32 %v6763_v39, %v8474_v60  ;;  %v1393_v38 = vpop.f32.mrb[29].mxu0  ;;  %v8555_v37 = vadd.s32 2, %v8509_v1 }
 0x23b   : > { %7616 = vrcp.f32 %v1488_v29  ;;  %v1489_v7 = vadd.f32 1.0, %v7597_v50  ;;  %v8552_v54 = vadd.f32 %v8474_v60, %v1393_v38  ;;  %v6764_v51 = vpop.f32.mrb[30].mxu0  ;;  %vm1184_vm15 = vcmp.ge.s32.totalorder %v8549_v12, 0 }
 0x23c   : > { %v7599_v5 = vpop.eup %7598  ;;  %7618 = vrcp.f32 %v1491_v30  ;;  %v6105_v43 = vmul.f32 -1.442695, %v8546_v27  ;;  %v8559_v39 = vadd.f32 %v6764_v51, %v8474_v60  ;;  %v1396_v29 = vpop.f32.mrb[31].mxu0  ;;  %v8566_v30 = vadd.s32 5, %v8509_v1 }
 0x23d   : > { %v7601_v20 = vpop.eup %7600  ;;  %7620 = vrcp.f32 %v1489_v7  ;;  %v6103_v50 = vmul.f32 -1.442695, %v8552_v54  ;;  %v8563_v38 = vadd.f32 %v8474_v60, %v1396_v29  ;;  %v8572_v51 = vadd.s32 7, %v8509_v1 }
 0x23e   : > { %v7603_v55 = vpop.eup %7602  ;;  %v6106_v32 = vmul.f32 -1.442695, %v8559_v39  ;;  %v1546_v7 = vmul.f32 %v7599_v5, %v8477_v63  ;;  %7622 = vpow2.f32 %v6105_v43  ;;  %v1544_v21 = vmul.f32 %v7601_v20, %v8480_v0 }
 0x23f   : > { %v7605_v18 = vpop.eup %7604  ;;  %v1547_v15 = vmul.f32 %v7603_v55, %v8484_v2  ;;  %v6104_v29 = vmul.f32 -1.442695, %v8563_v38  ;;  %vm1194_vm0 = vcmp.lt.s32.totalorder %v8549_v12, 16  ;;  %7624 = vpow2.f32 %v6103_v50 }
 0x240   : > { %v7607_v11 = vpop.eup %7606  ;;  %v1545_v34 = vmul.f32 %v7605_v18, %v8488_v47  ;;  %v8591_v55 = vadd.s32 6, %v8509_v1  ;;  %vm1183_vm2 = vcmp.ge.s32.totalorder %v8555_v37, 0  ;;  %vm1193_vm3 = vcmp.lt.s32.totalorder %v8555_v37, 16  ;;  %vm8650_vm9 = vmand %vm1184_vm15, %vm1194_vm0 }
 0x241   : > { %v7609_v63 = vpop.eup %7608  ;;  %v1565_v20 = vpack.c.bf16 %v1547_v15, %v1546_v7  ;;  %v1494_v18 = vadd.f32 1.0, %v7607_v11  ;;  %7626 = vpow2.f32 %v6106_v32  ;;  %v8604_v2 = vadd.s32 9, %v8509_v1  ;;  %vm8664_vm11 = vmand %vm1183_vm2, %vm1193_vm3 }
 0x242   : > { %v7611_v47 = vpop.eup %7610  ;;  %v1564_v31 = vpack.c.bf16 %v1545_v34, %v1544_v21  ;;  %v1492_v15 = vadd.f32 1.0, %v7609_v63  ;;  %7628 = vpow2.f32 %v6104_v29  ;;  %v6767_v5 = vpop.f32.mrb[32].mxu0  ;;  %v8607_v43 = vadd.s32 8, %v8509_v1  ;;  %vm8707_vm15 = vmand %vm1185_vm12, %vm1195_vm13 }
 0x243   : > { %v7613_v50 = vpop.eup %7612  ;;  %v1595_v7 = vsel %vm8583_vm14, %v1565_v20, 0  ;;  %7630 = vrcp.f32 %v1494_v18  ;;  %v1495_v36 = vadd.f32 1.0, %v7611_v47  ;;  %v8612_v11 = vadd.f32 %v6767_v5, %v8474_v60  ;;  %v8614_v32 = vpop.f32.mrb[33].mxu0 }
 0x244   : > { %v7615_v48 = vpop.eup %7614  ;;  %v6113_v22 = vcombine.low %v1595_v7, %v1595_v7  ;;  %v6114_v34 = vcombine.high %v1595_v7, %v1595_v7  ;;  %v1594_v21 = vsel %vm8597_vm1, %v1564_v31, 0  ;;  %7632 = vrcp.f32 %v1492_v15  ;;  %v8618_v1 = vpop.f32.mrb[34].mxu0 }
 0x245   : > { %v7617_v29 = vpop.eup %7616  ;;  %v6111_v63 = vcombine.low %v1594_v21, %v1594_v21  ;;  %v6112_v40 = vcombine.high %v1594_v21, %v1594_v21  ;;  %v1550_v20 = vmul.f32 %v7615_v48, %v8493_v19  ;;  %7634 = vrcp.f32 %v1495_v36  ;;  %v8621_v18 = vpop.f32.mrb[35].mxu0 }
 0x246   : > { %v7619_v47 = vpop.eup %7618  ;;  %v1675_v5 = vshrl.u32 %v6113_v22, 16  ;;  %v1678_v6 = vshll.u32 %v6113_v22, 16  ;;  %v1683_v3 = vshrl.u32 %v6114_v34, 16  ;;  %v1686_v13 = vshll.u32 %v6114_v34, 16  ;;  %v1870_v22 = vld [vmem:[#allocation2 + $0x18] sm:$0xf] }
 0x247   : > { %v7621_v7 = vpop.eup %7620  ;;  %v1658_v31 = vshrl.u32 %v6111_v63, 16  ;;  %v1661_v15 = vshll.u32 %v6111_v63, 16  ;;  %v1666_v21 = vshrl.u32 %v6112_v40, 16  ;;  %v1669_v10 = vshll.u32 %v6112_v40, 16  ;;  %v1874_v40 = vld [vmem:[#allocation2 + $0x20] sm:$0x1] }
 0x248   : > { %v1677_v48 = vrot.slane %v1675_v5, 7  ;;  %v1685_v36 = vrot.slane %v1683_v3, 7  ;;  %v1548_v34 = vmul.f32 %v7617_v29, %v8496_v33  ;;  %v1551_v8 = vmul.f32 %v7619_v47, %v8500_v28  ;;  %v7623_v23 = vpop.eup %7622 }
 0x249   : > { %v1660_v3 = vrot.slane %v1658_v31, 7  ;;  %v1668_v5 = vrot.slane %v1666_v21, 7  ;;  %v1549_v62 = vmul.f32 %v7621_v7, %v8504_v26  ;;  %vm1186_vm8 = vcmp.ge.s32.totalorder %v8566_v30, 0  ;;  %v7625_v33 = vpop.eup %7624 }
 0x24a   : > { %vm1196_vm10 = vcmp.lt.s32.totalorder %v8566_v30, 16  ;;  %v1493_v58 = vadd.f32 1.0, %v7613_v50  ;;  %v1680_v29 = vor.u32 %v1678_v6, %v1677_v48  ;;  %v1681_v28 = vrot.slane %v1677_v48, 4 }
 0x24b   : > { %v1688_v47 = vor.u32 %v1686_v13, %v1685_v36  ;;  %v1690_v44 = vrot.slane %v1685_v36, 4  ;;  %v7627_v14 = vpop.eup %7626  ;;  %v1663_v9 = vor.u32 %v1661_v15, %v1660_v3  ;;  %v1664_v4 = vrot.slane %v1660_v3, 4  ;;  %vm1206_vm14 = vmand %vm1186_vm8, %vm1196_vm10 }
 0x24c   : > { %v1671_v56 = vor.u32 %v1669_v10, %v1668_v5  ;;  %v1673_v31 = vrot.slane %v1668_v5, 4  ;;  %v7629_v50 = vpop.eup %7628  ;;  %v1871_v13 = vsel %vm8631_vm6, %v1680_v29, %v1870_v22  ;;  %v1567_v10 = vpack.c.bf16 %v1551_v8, %v1550_v20  ;;  %v1884_v5 = vld [vmem:[#allocation2 + $0x30] sm:$0xf]  ;;  %v1888_v29 = vld [vmem:[#allocation2 + $0x38] sm:$0x1] }
 0x24d   : > { %v1689_v6 = vsel %vm8625_vm5, %v1681_v28, %v1688_v47  ;;  %v1875_v7 = vsel %vm8639_vm7, %v1690_v44, %v1874_v40  ;;  %v7631_v15 = vpop.eup %7630  ;;  %1872 = vst [vmem:[#allocation2 + $0x18] sm:$0xf] %v1871_v13  ;;  %v1862_v48 = vsel %vm8631_vm6, %v1663_v9, %v1861_v35  ;;  %v1566_v8 = vpack.c.bf16 %v1549_v62, %v1548_v34  ;;  %v1877_v13 = vld [vmem:[#allocation2 + $0x24] sm:$0xf] }
 0x24e   : > { %1873 = vst [vmem:[#allocation2 + $0x1c] sm:$0xf] %v1689_v6  ;;  %1876 = vst [vmem:[#allocation2 + $0x20] sm:$0x1] %v1875_v7  ;;  %v1672_v21 = vsel %vm8625_vm5, %v1664_v4, %v1671_v56  ;;  %v1868_v44 = vsel %vm8639_vm7, %v1673_v31, %v1867_v17  ;;  %v7633_v20 = vpop.eup %7632  ;;  %v1597_v37 = vsel %vm8650_vm9, %v1567_v10, 0  ;;  %v1554_v36 = vmul.f32 %v7631_v15, %v8512_v61 }
 0x24f   : > { %1863 = vst [vmem:[#allocation2 + $0xc] sm:$0xf] %v1862_v48  ;;  %1864 = vst [vmem:[#allocation2 + $0x10] sm:$0xf] %v1672_v21  ;;  %7636 = vrcp.f32 %v1493_v58  ;;  %v1498_v22 = vadd.f32 1.0, %v7623_v23  ;;  %v7635_v40 = vpop.eup %7634  ;;  %v6117_v56 = vcombine.low %v1597_v37, %v1597_v37  ;;  %v6118_v4 = vcombine.high %v1597_v37, %v1597_v37 }
 0x250   : > { %1869 = vst [vmem:[#allocation2 + $0x14] sm:$0x1] %v1868_v44  ;;  %v1596_v9 = vsel %vm8664_vm11, %v1566_v8, 0  ;;  %v8680_v17 = vmul.f32 %v7633_v20, %v8519_v25  ;;  %v1555_v34 = vmul.f32 %v7635_v40, %v8526_v57  ;;  %v1881_v7 = vld [vmem:[#allocation2 + $0x2c] sm:$0x1]  ;;  %v1496_v12 = vadd.f32 1.0, %v7625_v33 }
 0x251   : > { %v6115_v35 = vcombine.low %v1596_v9, %v1596_v9  ;;  %v6116_v62 = vcombine.high %v1596_v9, %v1596_v9  ;;  %7638 = vrcp.f32 %v1498_v22  ;;  %v1709_v58 = vshrl.u32 %v6117_v56, 16 }
 0x252   : > { %v1712_v61 = vshll.u32 %v6117_v56, 16  ;;  %v1717_v23 = vshrl.u32 %v6118_v4, 16  ;;  %v1720_v3 = vshll.u32 %v6118_v4, 16  ;;  %v1569_v10 = vpack.c.bf16 %v1555_v34, %v1554_v36 }
 0x253   : > { %v1692_v28 = vshrl.u32 %v6115_v35, 16  ;;  %v1695_v47 = vshll.u32 %v6115_v35, 16  ;;  %v1700_v31 = vshrl.u32 %v6116_v62, 16  ;;  %v1703_v25 = vshll.u32 %v6116_v62, 16  ;;  %v7395_v35 = vld [vmem:[#allocation3 + $0x108] sm:$0xff]  }
 0x254   : > { %v1711_v26 = vrot.slane %v1709_v58, 7  ;;  %v1719_v6 = vrot.slane %v1717_v23, 7  ;;  %v1499_v57 = vadd.f32 1.0, %v7627_v14  ;;  %v1497_v48 = vadd.f32 1.0, %v7629_v50 }
 0x255   : > { %v1694_v15 = vrot.slane %v1692_v28, 7  ;;  %v1702_v21 = vrot.slane %v1700_v31, 7  ;;  %v1599_v14 = vsel %vm1206_vm14, %v1569_v10, 0  ;;  %v7393_v50 = vld [vmem:[#allocation2 + $0x18] sm:$0xff]   ;;  %7640 = vrcp.f32 %v1496_v12  ;;  %v1898_v12 = vld [vmem:[#allocation2 + $0x48] sm:$0xf] }
 0x256   : > { %v1714_v44 = vor.u32 %v1712_v61, %v1711_v26  ;;  %v1715_v8 = vrot.slane %v1711_v26, 4  ;;  %v1722_v20 = vor.u32 %v1720_v3, %v1719_v6  ;;  %v1724_v37 = vrot.slane %v1719_v6, 4  ;;  %v7390_v9 = vld [vmem:[#allocation2 + $0xc] sm:$0xff]  }
 0x257   : > { %v1697_v22 = vor.u32 %v1695_v47, %v1694_v15  ;;  %v1698_v40 = vrot.slane %v1694_v15, 4  ;;  %v1705_v56 = vor.u32 %v1703_v25, %v1702_v21  ;;  %v1707_v4 = vrot.slane %v1702_v21, 4  ;;  %6893 = vmatprep.mubr.bf16.mxu1 %v7390_v9  ;;  %v7403_v25 = vld [vmem:[#allocation3 + $0x120] sm:$0xff]  }
 0x258   : > { %v1723_v33 = vsel %vm8625_vm5, %v1715_v8, %v1722_v20  ;;  %v1885_v36 = vsel %vm8631_vm6, %v1714_v44, %v1884_v5  ;;  %v1889_v30 = vsel %vm8639_vm7, %v1724_v37, %v1888_v29  ;;  %v6121_v23 = vcombine.low %v1599_v14, %v1599_v14  ;;  %6894 = vmatmul.mubr.bf16.vlgmr.msra.gmra.mrb[20].mxu1 %v7393_v50  ;;  %v8737_v20 = vld [vmem:[#allocation2 + $0x10] sm:$0xf]  ;;  %v8739_v37 = vld [vmem:[#allocation2 + $0x14] sm:$0x1] }
 0x259   : > { %v7637_v62 = vpop.eup %7636  ;;  %1886 = vst [vmem:[#allocation2 + $0x30] sm:$0xf] %v1885_v36  ;;  %1887 = vst [vmem:[#allocation2 + $0x34] sm:$0xf] %v1723_v33  ;;  %v1706_v34 = vsel %vm8625_vm5, %v1698_v40, %v1705_v56  ;;  %v1878_v58 = vsel %vm8631_vm6, %v1697_v22, %v1877_v13  ;;  %v1882_v61 = vsel %vm8639_vm7, %v1707_v4, %v1881_v7  ;;  %v6109_v29 = vmul.f32 -1.442695, %v8612_v11 }
 0x25a   : > { %1890 = vst [vmem:[#allocation2 + $0x38] sm:$0x1] %v1889_v30  ;;  %1879 = vst [vmem:[#allocation2 + $0x24] sm:$0xf] %v1878_v58  ;;  %v6122_v3 = vcombine.high %v1599_v14, %v1599_v14  ;;  %v1553_v5 = vmul.f32 %v7637_v62, %v8530_v52  ;;  %v1743_v47 = vshrl.u32 %v6121_v23, 16  ;;  %v1746_v31 = vshll.u32 %v6121_v23, 16  ;;  %6914 = vmatpush3.bf16.msra.mxu1 %v8463_v42 }
 0x25b   : > { %1880 = vst [vmem:[#allocation2 + $0x28] sm:$0xf] %v1706_v34  ;;  %1883 = vst [vmem:[#allocation2 + $0x2c] sm:$0x1] %v1882_v61  ;;  %v7639_v28 = vpop.eup %7638  ;;  %7642 = vrcp.f32 %v1499_v57  ;;  %v8713_v26 = vadd.f32 %v8474_v60, %v8614_v32  ;;  %vm1188_vm0 = vcmp.ge.s32.totalorder %v8572_v51, 0  ;;  %vm1198_vm1 = vcmp.lt.s32.totalorder %v8572_v51, 16  ;;  %6915 = vmatprep.subr.bf16.mxu1 %v7395_v35 }
 0x25c   : > { %v1751_v52 = vshrl.u32 %v6122_v3, 16  ;;  %v1754_v6 = vshll.u32 %v6122_v3, 16  ;;  %v1568_v13 = vpack.c.bf16 %v1553_v5, %v8680_v17  ;;  %v8718_v7 = vmul.f32 %v7639_v28, %v8546_v27  ;;  %v1902_v17 = vld [vmem:[#allocation2 + $0x50] sm:$0x1]  ;;  %v8735_v57 = vld [vmem:[#allocation2 + $0xc] sm:$0xf]  ;;  %vm8768_vm8 = vmand %vm1188_vm0, %vm1198_vm1 }
 0x25d   : > { %v1745_v10 = vrot.slane %v1743_v47, 7  ;;  %7644 = vrcp.f32 %v1497_v48  ;;  %v6107_v32 = vmul.f32 -1.442695, %v8713_v26  ;;  %v8725_v42 = vadd.f32 %v8618_v1, %v8474_v60  ;;  %v7399_v4 = vld [vmem:[#allocation3 + $0x118] sm:$0xff]   ;;  %v1895_v62 = vld [vmem:[#allocation2 + $0x44] sm:$0x1] }
 0x25e   : > { %v1753_v15 = vrot.slane %v1751_v52, 7  ;;  %v1598_v27 = vsel %vm8707_vm15, %v1568_v13, 0  ;;  %vm1187_vm2 = vcmp.ge.s32.totalorder %v8591_v55, 0  ;;  %vm1197_vm3 = vcmp.lt.s32.totalorder %v8591_v55, 16  ;;  %6916 = vmatpush3.bf16.msra.mxu1 %v7395_v35  ;;  %v1891_v35 = vld [vmem:[#allocation2 + $0x3c] sm:$0xf] }
 0x25f   : > { %7646 = vpow2.f32 %v6109_v29  ;;  %v8733_v21 = vadd.f32 %v8474_v60, %v8621_v18  ;;  %v1748_v48 = vor.u32 %v1746_v31, %v1745_v10  ;;  %v1749_v44 = vrot.slane %v1745_v10, 4  ;;  %6917 = vmatprep.subr.bf16.mxu1 %v7398_v45  ;;  %v7641_v5 = vpop.eup %7640  ;;  %vm8780_vm10 = vmand %vm1187_vm2, %vm1197_vm3  ;;  %v7414_v51 = vld [vmem:[#allocation3 + $0x138] sm:$0xff]  }
 0x260   : > { %v6119_v1 = vcombine.low %v1598_v27, %v1598_v27  ;;  %v6120_v8 = vcombine.high %v1598_v27, %v1598_v27  ;;  %v1756_v22 = vor.u32 %v1754_v6, %v1753_v15  ;;  %v1758_v40 = vrot.slane %v1753_v15, 4  ;;  %v7397_v34 = vld [vmem:[#allocation2 + $0x30] sm:$0xff]  }
 0x261   : > { %7648 = vpow2.f32 %v6107_v32  ;;  %v6110_v56 = vmul.f32 -1.442695, %v8725_v42  ;;  %v1899_v60 = vsel %vm8631_vm6, %v1748_v48, %v1898_v12  ;;  %v6108_v23 = vmul.f32 -1.442695, %v8733_v21  ;;  %v4868_v24 = vld [vmem:[#allocation2 + $0x24] sm:$0xe] }
 0x262   : > { %v1726_v18 = vshrl.u32 %v6119_v1, 16  ;;  %v1729_v9 = vshll.u32 %v6119_v1, 16  ;;  %v1734_v33 = vshrl.u32 %v6120_v8, 16  ;;  %v7396_v36 = vld [vmem:[#allocation2 + $0x24] sm:$0xff]   ;;  %v1757_v30 = vsel %vm8625_vm5, %v1749_v44, %v1756_v22  ;;  %1900 = vst [vmem:[#allocation2 + $0x48] sm:$0xf] %v1899_v60  ;;  %6918 = vmatpush3.bf16.msra.mxu1 %v7398_v45 }
 0x263   : > { %v1903_v14 = vsel %vm8639_vm7, %v1758_v40, %v1902_v17  ;;  %v1737_v50 = vshll.u32 %v6120_v8, 16  ;;  %7650 = vpow2.f32 %v6110_v56  ;;  %1901 = vst [vmem:[#allocation2 + $0x4c] sm:$0xf] %v1757_v30  ;;  %6897 = vmatprep.mubr.bf16.mxu1 %v7396_v36  ;;  %v2007_v3 = vshrl.u32 %v8735_v57, 16  ;;  %6919 = vmatprep.subr.bf16.mxu1 %v7399_v4  ;;  %v8756_v17 = vld [vmem:[#allocation2 + $0x18] sm:$0xf] }
 0x264   : > { %1904 = vst [vmem:[#allocation2 + $0x50] sm:$0x1] %v1903_v14  ;;  %v1728_v58 = vrot.slane %v1726_v18, 7  ;;  %v1736_v61 = vrot.slane %v1734_v33, 7  ;;  %v2010_v29 = vshll.u32 %v8735_v57, 16  ;;  %v2016_v28 = vshll.u32 %v8737_v20, 16  ;;  %6898 = vmatmul.mubr.bf16.gmra.mrb[24].mxu1 %v7397_v34 }
 0x265   : > { %v2020_v47 = vshrl.u32 %v8737_v20, 16  ;;  %v2026_v31 = vshll.u32 %v8739_v37, 16  ;;  %v7643_v52 = vpop.eup %7642  ;;  %v1556_v32 = vmul.f32 %v7641_v5, %v8552_v54  ;;  %7652 = vpow2.f32 %v6108_v23  ;;  %v7408_v60 = vld [vmem:[#allocation3 + $0x128] sm:$0xff]  }
 0x266   : > { %v1731_v6 = vor.u32 %v1729_v9, %v1728_v58  ;;  %v1732_v13 = vrot.slane %v1728_v58, 4  ;;  %v1739_v10 = vor.u32 %v1737_v50, %v1736_v61  ;;  %v1741_v12 = vrot.slane %v1736_v61, 4  ;;  %6920 = vmatpush3.bf16.msra.mxu1 %v7399_v4 }
 0x267   : > { %v1559_v45 = vmul.f32 %v7643_v52, %v8559_v39  ;;  %v2009_v15 = vrot.slane %v2007_v3, 4  ;;  %v7645_v27 = vpop.eup %7644  ;;  %v2012_v39 = vrot.slane %v2010_v29, 5  ;;  %v8774_v40 = vrot.slane %v2016_v28, 5  ;;  %6921 = vmatprep.subr.bf16.mxu1 %v7403_v25  ;;  %v7410_v3 = vld [vmem:[#allocation3 + $0x130] sm:$0xff]   ;;  %v1916_v52 = vld [vmem:[#allocation2 + $0x68] sm:$0x1] }
 0x268   : > { %v1740_v48 = vsel %vm8625_vm5, %v1732_v13, %v1739_v10  ;;  %v1892_v44 = vsel %vm8631_vm6, %v1731_v6, %v1891_v35  ;;  %v1896_v1 = vsel %vm8639_vm7, %v1741_v12, %v1895_v62  ;;  %v1557_v22 = vmul.f32 %v7645_v27, %v8563_v38 }
 0x269   : > { %v7647_v8 = vpop.eup %7646  ;;  %1893 = vst [vmem:[#allocation2 + $0x3c] sm:$0xf] %v1892_v44  ;;  %1894 = vst [vmem:[#allocation2 + $0x40] sm:$0xf] %v1740_v48  ;;  %v1571_v37 = vpack.c.bf16 %v1559_v45, %v8718_v7  ;;  %v2022_v56 = vrot.slane %v2020_v47, 4  ;;  %v2013_v18 = vor.u32 %v2012_v39, %v2009_v15  ;;  %v2028_v9 = vrot.slane %v2026_v31, 5 }
 0x26a   : > { %1897 = vst [vmem:[#allocation2 + $0x44] sm:$0x1] %v1896_v1  ;;  %v1502_v4 = vadd.f32 1.0, %v7647_v8  ;;  %v2031_v7 = vshrl.u32 %v8756_v17, 16  ;;  %v1570_v36 = vpack.c.bf16 %v1557_v22, %v1556_v32  ;;  %v2034_v14 = vshll.u32 %v8756_v17, 16  ;;  %6922 = vmatpush3.bf16.msra.mxu1 %v7403_v25 }
 0x26b   : > { %v7649_v33 = vpop.eup %7648  ;;  %v1601_v38 = vsel %vm8768_vm8, %v1571_v37, 0  ;;  %v2023_v30 = vor.u32 %v2022_v56, %v8774_v40  ;;  %v2014_v58 = vrot.slane %v2013_v18, 4  ;;  %6923 = vmatprep.subr.bf16.mxu1 %v7408_v60  ;;  %v1912_v31 = vld [vmem:[#allocation2 + $0x60] sm:$0xf]  ;;  %v7402_v56 = vld [vmem:[#allocation2 + $0x48] sm:$0xff]   ;;  %vm1190_vm9 = vcmp.ge.s32.totalorder %v8604_v2, 0 }
 0x26c   : > { %v6125_v50 = vcombine.low %v1601_v38, %v1601_v38  ;;  %v6126_v55 = vcombine.high %v1601_v38, %v1601_v38  ;;  %7654 = vrcp.f32 %v1502_v4  ;;  %v1500_v35 = vadd.f32 1.0, %v7649_v33  ;;  %v1905_v38 = vld [vmem:[#allocation2 + $0x54] sm:$0xf] }
 0x26d   : > { %v7651_v62 = vpop.eup %7650  ;;  %v1600_v34 = vsel %vm8780_vm10, %v1570_v36, 0  ;;  %v2024_v61 = vrot.slane %v2023_v30, 4  ;;  %v8791_v23 = vrot.slane %v2031_v7, 4  ;;  %v2019_v32 = vsel %vm8457_vm4, %v2014_v58, %v8774_v40  ;;  %v8798_v7 = vld [vmem:[#allocation2 + $0x1c] sm:$0xf] }
 0x26e   : > { %v1777_v5 = vshrl.u32 %v6125_v50, 16  ;;  %v1780_v29 = vshll.u32 %v6125_v50, 16  ;;  %v1785_v28 = vshrl.u32 %v6126_v55, 16  ;;  %v1788_v47 = vshll.u32 %v6126_v55, 16  ;;  %6924 = vmatpush3.bf16.msra.mxu1 %v7408_v60  ;;  %v1909_v36 = vld [vmem:[#allocation2 + $0x5c] sm:$0x1] }
 0x26f   : > { %v6123_v6 = vcombine.low %v1600_v34, %v1600_v34  ;;  %v6124_v13 = vcombine.high %v1600_v34, %v1600_v34  ;;  %7656 = vrcp.f32 %v1500_v35  ;;  %v1503_v25 = vadd.f32 1.0, %v7651_v62  ;;  %v7653_v15 = vpop.eup %7652  ;;  %6925 = vmatprep.subr.bf16.mxu1 %v7410_v3  ;;  %v7404_v50 = vld [vmem:[#allocation3 + $0x8] sm:$0xff]   ;;  %v1971_v58 = vld [vmem:[#allocation2 + $0x20] sm:$0x1] }
 0x270   : > { %v1779_v10 = vrot.slane %v1777_v5, 7  ;;  %v1787_v12 = vrot.slane %v1785_v28, 7  ;;  %v2029_v45 = vsel %vm8457_vm4, %v2024_v61, %v2028_v9  ;;  %v7400_v54 = vld [vmem:[#allocation2 + $0x3c] sm:$0xff]   ;;  %v1501_v40 = vadd.f32 1.0, %v7653_v15  ;;  %v8808_v61 = vld [vmem:[#allocation2 + $0x24] sm:$0xf] }
 0x271   : > { %v1760_v27 = vshrl.u32 %v6123_v6, 16  ;;  %v1763_v48 = vshll.u32 %v6123_v6, 16  ;;  %v1768_v44 = vshrl.u32 %v6124_v13, 16  ;;  %v1771_v1 = vshll.u32 %v6124_v13, 16  ;;  %6901 = vmatprep.mubr.bf16.mxu1 %v7400_v54  ;;  %v7406_v15 = vld [vmem:[#allocation3 + $0x10] sm:$0xff]  }
 0x272   : > { %v1782_v39 = vor.u32 %v1780_v29, %v1779_v10  ;;  %v1783_v8 = vrot.slane %v1779_v10, 4  ;;  %v1790_v37 = vor.u32 %v1788_v47, %v1787_v12  ;;  %v1792_v22 = vrot.slane %v1787_v12, 4  ;;  %6902 = vmatmul.mubr.bf16.gmra.mrb[28].mxu1 %v7402_v56 }
 0x273   : > { %v1762_v4 = vrot.slane %v1760_v27, 7  ;;  %v1770_v18 = vrot.slane %v1768_v44, 7  ;;  %7658 = vrcp.f32 %v1503_v25  ;;  %vm1200_vm11 = vcmp.lt.s32.totalorder %v8604_v2, 16  ;;  %6926 = vmatpush3.bf16.msra.mxu1 %v7410_v3  ;;  %v7412_v2 = vld [vmem:[#allocation3 + $0x20] sm:$0xff]  }
 0x274   : > { %v1791_v60 = vsel %vm8625_vm5, %v1783_v8, %v1790_v37  ;;  %v1913_v9 = vsel %vm8631_vm6, %v1782_v39, %v1912_v31  ;;  %v1917_v33 = vsel %vm8639_vm7, %v1792_v22, %v1916_v52  ;;  %v6132_v30 = vcombine.low %v2019_v32, %v2029_v45  ;;  %v8814_v31 = vld [vmem:[#allocation2 + $0x28] sm:$0xf]  ;;  %6927 = vmatprep.subr.bf16.mxu1 %v7414_v51  ;;  %v8816_v52 = vld [vmem:[#allocation3 + $0x140] sm:$0xff]   ;;  %v1972_v45 = vld [vmem:[#allocation2 + $0x2c] sm:$0x1] }
 0x275   : > { %1914 = vst [vmem:[#allocation2 + $0x60] sm:$0xf] %v1913_v9  ;;  %1915 = vst [vmem:[#allocation2 + $0x64] sm:$0xf] %v1791_v60  ;;  %v1765_v55 = vor.u32 %v1763_v48, %v1762_v4  ;;  %v1766_v35 = vrot.slane %v1762_v4, 4  ;;  %v1773_v62 = vor.u32 %v1771_v1, %v1770_v18  ;;  %v1775_v34 = vrot.slane %v1770_v18, 4 }
 0x276   : > { %1918 = vst [vmem:[#allocation2 + $0x68] sm:$0x1] %v1917_v33  ;;  %v7655_v5 = vpop.eup %7654  ;;  %7660 = vrcp.f32 %v1501_v40  ;;  %6786 = vmatmul.mubr.bf16.vlgmr.msra.gmra.mrb[36].mxu0 %v6132_v30  ;;  %v2036_v29 = vrot.slane %v2034_v14, 5  ;;  %v2040_v28 = vshll.u32 %v8798_v7, 16  ;;  %v2044_v47 = vshrl.u32 %v8798_v7, 16  ;;  %v7409_v9 = vld [vmem:[#allocation3 + $0x18] sm:$0xff]   ;;  %vm8855_vm14 = vmand %vm1190_vm9, %vm1200_vm11 }
 0x277   : > { %v1774_v6 = vsel %vm8625_vm5, %v1766_v35, %v1773_v62  ;;  %v1906_v3 = vsel %vm8631_vm6, %v1765_v55, %v1905_v38  ;;  %v1910_v13 = vsel %vm8639_vm7, %v1775_v34, %v1909_v36  ;;  %v8825_v14 = vmul.f32 %v7655_v5, %v8612_v11  ;;  %6806 = vmatpush3.bf16.msra.mxu0 %v8468_v59  ;;  %v8835_v1 = vld [vmem:[#allocation2 + $0x30] sm:$0xf]  ;;  %v8840_v37 = vld [vmem:[#allocation2 + $0x34] sm:$0xf]  ;;  %v1973_v30 = vld [vmem:[#allocation2 + $0x38] sm:$0x1] }
 0x278   : > { %1907 = vst [vmem:[#allocation2 + $0x54] sm:$0xf] %v1906_v3  ;;  %1908 = vst [vmem:[#allocation2 + $0x58] sm:$0xf] %v1774_v6  ;;  %vm1189_vm12 = vcmp.ge.s32.totalorder %v8607_v43, 0  ;;  %vm1199_vm13 = vcmp.lt.s32.totalorder %v8607_v43, 16  ;;  %v2037_v25 = vor.u32 %v2036_v29, %v8791_v23  ;;  %6807 = vmatprep.subr.bf16.mxu0 %v7404_v50  ;;  %6928 = vmatpush3.bf16.msra.mxu1 %v7414_v51  ;;  %7662 = vpow2.f32 %v8534_v16 }
 0x279   : > { %1911 = vst [vmem:[#allocation2 + $0x5c] sm:$0x1] %v1910_v13  ;;  %v2042_v10 = vrot.slane %v2040_v28, 5  ;;  %v2046_v12 = vrot.slane %v2044_v47, 4  ;;  %v2050_v32 = vshll.u32 %v1971_v58, 16  ;;  %v7657_v27 = vpop.eup %7656  ;;  %v2055_v11 = vshrl.u32 %v8808_v61, 16  ;;  %6949 = vmatprep.subr.bf16.mxu1 %v8816_v52  ;;  %vm8878_vm15 = vmand %vm1189_vm12, %vm1199_vm13 }
 0x27a   : > { %v2058_v59 = vshll.u32 %v8808_v61, 16  ;;  %v2064_v48 = vshll.u32 %v8814_v31, 16  ;;  %v2068_v44 = vshrl.u32 %v8814_v31, 16  ;;  %v8838_v23 = vmul.f32 %v7657_v27, %v8713_v26  ;;  %v7415_v43 = vld [vmem:[#allocation3 + $0x28] sm:$0xff]  }
 0x27b   : > { %v2038_v54 = vrot.slane %v2037_v25, 4  ;;  %v2047_v39 = vor.u32 %v2046_v12, %v2042_v10  ;;  %v2052_v8 = vrot.slane %v2050_v32, 5  ;;  %v2057_v22 = vrot.slane %v2055_v11, 4  ;;  %6808 = vmatpush3.bf16.msra.mxu0 %v7404_v50  ;;  %v8868_v11 = vld [vmem:[#allocation2 + $0x3c] sm:$0xf] }
 0x27c   : > { %v2060_v56 = vrot.slane %v2058_v59, 5  ;;  %v2066_v4 = vrot.slane %v2064_v48, 5  ;;  %v2070_v18 = vrot.slane %v2068_v44, 4  ;;  %v2074_v51 = vshll.u32 %v1972_v45, 16  ;;  %6809 = vmatprep.subr.bf16.mxu0 %v7406_v15  ;;  %v7407_v59 = vld [vmem:[#allocation2 + $0x60] sm:$0xff]  }
 0x27d   : > { %v2043_v40 = vsel %vm8457_vm4, %v2038_v54, %v2042_v10  ;;  %v2048_v60 = vrot.slane %v2047_v39, 4  ;;  %v2079_v26 = vshrl.u32 %v8835_v1, 16  ;;  %v7659_v33 = vpop.eup %7658  ;;  %v2082_v55 = vshll.u32 %v8835_v1, 16 }
 0x27e   : > { %v2061_v38 = vor.u32 %v2060_v56, %v2057_v22  ;;  %v2071_v36 = vor.u32 %v2070_v18, %v2066_v4  ;;  %v2088_v35 = vshll.u32 %v8840_v37, 16  ;;  %v1563_v62 = vmul.f32 %v7659_v33, %v8725_v42 }
 0x27f   : > { %v2053_v50 = vsel %vm8457_vm4, %v2048_v60, %v2052_v8  ;;  %v2076_v34 = vrot.slane %v2074_v51, 5  ;;  %v2081_v58 = vrot.slane %v2079_v26, 4  ;;  %v2084_v6 = vrot.slane %v2082_v55, 5  ;;  %v7405_v3 = vld [vmem:[#allocation2 + $0x54] sm:$0xff]   ;;  %6810 = vmatpush3.bf16.msra.mxu0 %v7406_v15 }
 0x280   : > { %v6133_v29 = vcombine.low %v2043_v40, %v2053_v50  ;;  %v2062_v28 = vrot.slane %v2061_v38, 4  ;;  %v2072_v47 = vrot.slane %v2071_v36, 4  ;;  %v7661_v42 = vpop.eup %7660  ;;  %v1573_v13 = vpack.c.bf16 %v1563_v62, %v8825_v14  ;;  %6811 = vmatprep.subr.bf16.mxu0 %v7409_v9  ;;  %v8870_v14 = vld [vmem:[#allocation2 + $0x40] sm:$0xf]  ;;  %6905 = vmatprep.mubr.bf16.mxu1 %v7405_v3  ;;  %v1926_v50 = vld [vmem:[#allocation2 + $0x78] sm:$0xf] }
 0x281   : > { %v8860_v25 = vrot.slane %v2088_v35, 5  ;;  %v2092_v10 = vshrl.u32 %v8840_v37, 16  ;;  %v2098_v12 = vshll.u32 %v1973_v30, 16  ;;  %v1561_v32 = vmul.f32 %v7661_v42, %v8733_v21  ;;  %6906 = vmatmul.mubr.bf16.gmra.mrb[32].mxu1 %v7407_v59  ;;  %v8897_v3 = vld [vmem:[#allocation2 + $0x48] sm:$0xf]  ;;  %v7417_v42 = vld [vmem:[#allocation3 + $0x30] sm:$0xff]  }
 0x282   : > { %6789 = vmatprep.mubr.bf16.mxu0 %v6133_v29  ;;  %v2067_v45 = vsel %vm8457_vm4, %v2062_v28, %v2066_v4  ;;  %v2077_v27 = vsel %vm8457_vm4, %v2072_v47, %v2076_v34  ;;  %v2085_v15 = vor.u32 %v2084_v6, %v2081_v58  ;;  %v1603_v48 = vsel %vm8855_vm14, %v1573_v13, 0  ;;  %v1930_v34 = vld [vmem:[#allocation2 + $0x80] sm:$0x1]  ;;  %v1976_v19 = vld [vmem:[#allocation2 + $0x5c] sm:$0x1] }
 0x283   : > { %v6134_v44 = vcombine.low %v2067_v45, %v2077_v27  ;;  %v2094_v54 = vrot.slane %v2092_v10, 4  ;;  %v2100_v39 = vrot.slane %v2098_v12, 5  ;;  %v6129_v21 = vcombine.low %v1603_v48, %v1603_v48  ;;  %6812 = vmatpush3.bf16.msra.mxu0 %v7409_v9  ;;  %v8899_v45 = vld [vmem:[#allocation2 + $0x4c] sm:$0xf] }
 0x284   : > { %v6130_v8 = vcombine.high %v1603_v48, %v1603_v48  ;;  %v1572_v56 = vpack.c.bf16 %v1561_v32, %v8838_v23  ;;  %v2086_v4 = vrot.slane %v2085_v15, 4  ;;  %v2103_v40 = vshrl.u32 %v8868_v11, 16  ;;  %6813 = vmatprep.subr.bf16.mxu0 %v7412_v2  ;;  %v1974_v32 = vld [vmem:[#allocation2 + $0x44] sm:$0x1] }
 0x285   : > { %6790 = vmatmul.mubr.bf16.gmra.mrb[40].mxu0 %v6134_v44  ;;  %v2095_v18 = vor.u32 %v2094_v54, %v8860_v25  ;;  %v2106_v60 = vshll.u32 %v8868_v11, 16  ;;  %v2112_v51 = vshll.u32 %v8870_v14, 16  ;;  %v1811_v26 = vshrl.u32 %v6129_v21, 16 }
 0x286   : > { %v1814_v33 = vshll.u32 %v6129_v21, 16  ;;  %v1819_v38 = vshrl.u32 %v6130_v8, 16  ;;  %v1822_v36 = vshll.u32 %v6130_v8, 16  ;;  %v1602_v23 = vsel %vm8878_vm15, %v1572_v56, 0  ;;  %v1923_v21 = vld [vmem:[#allocation2 + $0x74] sm:$0x1] }
 0x287   : > { %v2091_v9 = vsel %vm8457_vm4, %v2086_v4, %v8860_v25  ;;  %v2096_v30 = vrot.slane %v2095_v18, 4  ;;  %v2105_v55 = vrot.slane %v2103_v40, 4  ;;  %v1813_v35 = vrot.slane %v1811_v26, 7  ;;  %6814 = vmatpush3.bf16.msra.mxu0 %v7412_v2  ;;  %v7418_v40 = vld [vmem:[#allocation3 + $0x38] sm:$0xff]  }
 0x288   : > { %v1821_v62 = vrot.slane %v1819_v38, 7  ;;  %v6127_v58 = vcombine.low %v1602_v23, %v1602_v23  ;;  %v6128_v5 = vcombine.high %v1602_v23, %v1602_v23  ;;  %v2108_v28 = vrot.slane %v2106_v60, 5  ;;  %6815 = vmatprep.subr.bf16.mxu0 %v7415_v43 }
 0x289   : > { %v2101_v29 = vsel %vm8457_vm4, %v2096_v30, %v2100_v39  ;;  %v8894_v47 = vrot.slane %v2112_v51, 5  ;;  %v2116_v6 = vshrl.u32 %v8870_v14, 16  ;;  %v1816_v13 = vor.u32 %v1814_v33, %v1813_v35  ;;  %v1919_v39 = vld [vmem:[#allocation2 + $0x6c] sm:$0xf]  ;;  %v1975_v51 = vld [vmem:[#allocation2 + $0x50] sm:$0x1] }
 0x28a   : > { %v1817_v25 = vrot.slane %v1813_v35, 4  ;;  %v1824_v10 = vor.u32 %v1822_v36, %v1821_v62  ;;  %v1826_v12 = vrot.slane %v1821_v62, 4  ;;  %v1794_v2 = vshrl.u32 %v6127_v58, 16  ;;  %v8910_v36 = vld [vmem:[#allocation2 + $0x54] sm:$0xf] }
 0x28b   : > { %v1797_v27 = vshll.u32 %v6127_v58, 16  ;;  %v1802_v15 = vshrl.u32 %v6128_v5, 16  ;;  %v1805_v59 = vshll.u32 %v6128_v5, 16  ;;  %v1927_v44 = vsel %vm8631_vm6, %v1816_v13, %v1926_v50  ;;  %6816 = vmatpush3.bf16.msra.mxu0 %v7415_v43  ;;  %v8912_v35 = vld [vmem:[#allocation2 + $0x58] sm:$0xf] }
 0x28c   : > { %v1825_v48 = vsel %vm8625_vm5, %v1817_v25, %v1824_v10  ;;  %v1931_v54 = vsel %vm8639_vm7, %v1826_v12, %v1930_v34  ;;  %v6135_v8 = vcombine.low %v2091_v9, %v2101_v29  ;;  %1928 = vst [vmem:[#allocation2 + $0x78] sm:$0xf] %v1927_v44  ;;  %v1796_v22 = vrot.slane %v1794_v2, 7  ;;  %6817 = vmatprep.subr.bf16.mxu0 %v7417_v42  ;;  %v8927_v10 = vld [vmem:[#allocation2 + $0x60] sm:$0xf] }
 0x28d   : > { %1929 = vst [vmem:[#allocation2 + $0x7c] sm:$0xf] %v1825_v48  ;;  %1932 = vst [vmem:[#allocation2 + $0x80] sm:$0x1] %v1931_v54  ;;  %v1804_v56 = vrot.slane %v1802_v15, 7  ;;  %v2109_v4 = vor.u32 %v2108_v28, %v2105_v55  ;;  %v2118_v18 = vrot.slane %v2116_v6, 4 }
 0x28e   : > { %6793 = vmatprep.mubr.bf16.mxu0 %v6135_v8  ;;  %v2122_v60 = vshll.u32 %v1974_v32, 16  ;;  %v2127_v26 = vshrl.u32 %v8897_v3, 16  ;;  %v2130_v33 = vshll.u32 %v8897_v3, 16  ;;  %v2136_v38 = vshll.u32 %v8899_v45, 16  ;;  %v8921_v6 = vld [vmem:[#allocation3 + $0x80] sm:$0xff]  }
 0x28f   : > { %v1799_v43 = vor.u32 %v1797_v27, %v1796_v22  ;;  %v1800_v23 = vrot.slane %v1796_v22, 4  ;;  %v1807_v9 = vor.u32 %v1805_v59, %v1804_v56  ;;  %v1809_v30 = vrot.slane %v1804_v56, 4  ;;  %6818 = vmatpush3.bf16.msra.mxu0 %v7417_v42  ;;  %v8931_v27 = vld [vmem:[#allocation2 + $0x64] sm:$0xf] }
 0x290   : > { %v2110_v55 = vrot.slane %v2109_v4, 4  ;;  %v2119_v62 = vor.u32 %v2118_v18, %v8894_v47  ;;  %v2124_v50 = vrot.slane %v2122_v60, 5  ;;  %v2129_v34 = vrot.slane %v2127_v26, 4  ;;  %6819 = vmatprep.subr.bf16.mxu0 %v7418_v40 }
 0x291   : > { %v1808_v58 = vsel %vm8625_vm5, %v1800_v23, %v1807_v9  ;;  %v1920_v5 = vsel %vm8631_vm6, %v1799_v43, %v1919_v39  ;;  %v1924_v29 = vsel %vm8639_vm7, %v1809_v30, %v1923_v21  ;;  %v2132_v28 = vrot.slane %v2130_v33, 5  ;;  %v1977_v43 = vld [vmem:[#allocation2 + $0x68] sm:$0x1]  ;;  %v3256_v9 = vld [vmem:[#allocation2 + $0xc] sm:$0xf] }
 0x292   : > { %1921 = vst [vmem:[#allocation2 + $0x6c] sm:$0xf] %v1920_v5  ;;  %1922 = vst [vmem:[#allocation2 + $0x70] sm:$0xf] %v1808_v58  ;;  %v2115_v42 = vsel %vm8457_vm4, %v2110_v55, %v8894_v47  ;;  %v2120_v13 = vrot.slane %v2119_v62, 4  ;;  %v2138_v0 = vrot.slane %v2136_v38, 5  ;;  %v6150_v58 = vcombine.low %v8735_v57, %v8737_v20 }
 0x293   : > { %1925 = vst [vmem:[#allocation2 + $0x74] sm:$0x1] %v1924_v29  ;;  %v2140_v25 = vshrl.u32 %v8899_v45, 16  ;;  %v2133_v63 = vor.u32 %v2132_v28, %v2129_v34  ;;  %v2146_v12 = vshll.u32 %v1975_v51, 16  ;;  %v2151_v32 = vshrl.u32 %v8910_v36, 16  ;;  %6820 = vmatpush3.bf16.msra.mxu0 %v7418_v40 }
 0x294   : > { %v2154_v2 = vshll.u32 %v8910_v36, 16  ;;  %v2125_v15 = vsel %vm8457_vm4, %v2120_v13, %v2124_v50  ;;  %v2160_v47 = vshll.u32 %v8912_v35, 16  ;;  %v2164_v48 = vshrl.u32 %v8912_v35, 16  ;;  %6841 = vmatprep.subr.bf16.mxu0 %v8921_v6  ;;  %v8943_v62 = vld [vmem:[#allocation2] sm:$0xf]  ;;  %v7413_v13 = vld [vmem:[#allocation2 + $0x78] sm:$0xff]  }
 0x295   : > { %v2142_v59 = vrot.slane %v2140_v25, 4  ;;  %v6136_v44 = vcombine.low %v2115_v42, %v2125_v15  ;;  %v2134_v54 = vrot.slane %v2133_v63, 4  ;;  %v2148_v39 = vrot.slane %v2146_v12, 5  ;;  %v8945_v50 = vld [vmem:[#allocation2 + $0x4] sm:$0xf] }
 0x296   : > { %v2153_v21 = vrot.slane %v2151_v32, 4  ;;  %v2156_v22 = vrot.slane %v2154_v2, 5  ;;  %v2162_v56 = vrot.slane %v2160_v47, 5  ;;  %v2166_v4 = vrot.slane %v2164_v48, 4  ;;  %v8956_v32 = vld [vmem:[#allocation2 + $0x10] sm:$0xf] }
 0x297   : > { %v2143_v8 = vor.u32 %v2142_v59, %v2138_v0  ;;  %6794 = vmatmul.mubr.bf16.gmra.mrb[44].mxu0 %v6136_v44  ;;  %v2139_v18 = vsel %vm8457_vm4, %v2134_v54, %v2138_v0  ;;  %v2170_v60 = vshll.u32 %v1976_v19, 16  ;;  %v2175_v51 = vshrl.u32 %v8927_v10, 16  ;;  %v8962_v47 = vld [vmem:[#allocation2 + $0x14] sm:$0x1] }
 0x298   : > { %v2178_v26 = vshll.u32 %v8927_v10, 16  ;;  %v2157_v33 = vor.u32 %v2156_v22, %v2153_v21  ;;  %v2167_v38 = vor.u32 %v2166_v4, %v2162_v56  ;;  %v2184_v23 = vshll.u32 %v8931_v27, 16 }
 0x299   : > { %v2144_v40 = vrot.slane %v2143_v8, 4  ;;  %v7411_v30 = vld [vmem:[#allocation2 + $0x6c] sm:$0xff]   ;;  %v2172_v55 = vrot.slane %v2170_v60, 5  ;;  %v6149_v34 = vcombine.low %v8943_v62, %v8945_v50  ;;  %v6151_v5 = vcombine.low %v8756_v17, %v8798_v7  ;;  %v9049_v7 = vld [vmem:[#allocation2 + $0x58] sm:$0xf] }
 0x29a   : > { %v2158_v28 = vrot.slane %v2157_v33, 4  ;;  %v2168_v42 = vrot.slane %v2167_v38, 4  ;;  %v2177_v0 = vrot.slane %v2175_v51, 4  ;;  %6909 = vmatprep.mubr.bf16.mxu1 %v7411_v30  ;;  %v2180_v19 = vrot.slane %v2178_v26, 5  ;;  %v8964_v8 = vld [vmem:[#allocation2 + $0x6c] sm:$0xf] }
 0x29b   : > { %v2149_v29 = vsel %vm8457_vm4, %v2144_v40, %v2148_v39  ;;  %v2186_v63 = vrot.slane %v2184_v23, 5  ;;  %v2188_v12 = vshrl.u32 %v8931_v27, 16  ;;  %6910 = vmatmul.mubr.bf16.gmra.mrb[36].mxu1 %v7413_v13  ;;  %v2194_v59 = vshll.u32 %v1977_v43, 16  ;;  %v8968_v60 = vld [vmem:[#allocation2 + $0x70] sm:$0xf] }
 0x29c   : > { %v6137_v25 = vcombine.low %v2139_v18, %v2149_v29  ;;  %v2163_v2 = vsel %vm8457_vm4, %v2158_v28, %v2162_v56  ;;  %v2173_v15 = vsel %vm8457_vm4, %v2168_v42, %v2172_v55  ;;  %v3287_v48 = vshrl.u32 %v3256_v9, 16  ;;  %v1978_v38 = vld [vmem:[#allocation2 + $0x74] sm:$0x1]  ;;  %v3259_v55 = vld [vmem:[#allocation2 + $0x18] sm:$0xf] }
 0x29d   : > { %v6138_v44 = vcombine.low %v2163_v2, %v2173_v15  ;;  %v2181_v54 = vor.u32 %v2180_v19, %v2177_v0  ;;  %v2190_v39 = vrot.slane %v2188_v12, 4  ;;  %v3290_v21 = vshll.u32 %v3256_v9, 16  ;;  %v8975_v0 = vld [vmem:[#allocation2 + $0x1c] sm:$0xf] }
 0x29e   : > { %6797 = vmatprep.mubr.bf16.mxu0 %v6137_v25  ;;  %v2196_v22 = vrot.slane %v2194_v59, 5  ;;  %v3289_v4 = vrot.slane %v3287_v48, 4  ;;  %v3296_v18 = vshll.u32 %v8956_v32, 16  ;;  %v3300_v56 = vshrl.u32 %v8956_v32, 16 }
 0x29f   : > { %6798 = vmatmul.mubr.bf16.gmra.mrb[48].mxu0 %v6138_v44  ;;  %v2182_v51 = vrot.slane %v2181_v54, 4  ;;  %v2191_v26 = vor.u32 %v2190_v39, %v2186_v63  ;;  %v3292_v40 = vrot.slane %v3290_v21, 5  ;;  %v3306_v33 = vshll.u32 %v8962_v47, 16 }
 0x2a0   : > { %v3298_v43 = vrot.slane %v3296_v18, 5  ;;  %v3302_v23 = vrot.slane %v3300_v56, 4  ;;  %v2199_v9 = vshrl.u32 %v8964_v8, 16  ;;  %v2202_v30 = vshll.u32 %v8964_v8, 16 }
 0x2a1   : > { %v2187_v29 = vsel %vm8457_vm4, %v2182_v51, %v2186_v63  ;;  %v2192_v28 = vrot.slane %v2191_v26, 4  ;;  %v3293_v42 = vor.u32 %v3292_v40, %v3289_v4  ;;  %v3308_v13 = vrot.slane %v3306_v33, 5  ;;  %v8983_v51 = vld [vmem:[#allocation2 + $0x20] sm:$0x1] }
 0x2a2   : > { %v3303_v25 = vor.u32 %v3302_v23, %v3298_v43  ;;  %v2201_v19 = vrot.slane %v2199_v9, 4  ;;  %v2204_v12 = vrot.slane %v2202_v30, 5  ;;  %v2208_v2 = vshll.u32 %v8968_v60, 16  ;;  %v3262_v23 = vld [vmem:[#allocation2 + $0x24] sm:$0xf] }
 0x2a3   : > { %v2197_v15 = vsel %vm8457_vm4, %v2192_v28, %v2196_v22  ;;  %v3294_v59 = vrot.slane %v3293_v42, 4  ;;  %v2212_v48 = vshrl.u32 %v8968_v60, 16  ;;  %v2218_v44 = vshll.u32 %v1978_v38, 16 }
 0x2a4   : > { %v6139_v54 = vcombine.low %v2187_v29, %v2197_v15  ;;  %v3304_v39 = vrot.slane %v3303_v25, 4  ;;  %v2205_v63 = vor.u32 %v2204_v12, %v2201_v19  ;;  %v2210_v21 = vrot.slane %v2208_v2, 5  ;;  %v8994_v2 = vld [vmem:[#allocation2 + $0x2c] sm:$0x1] }
 0x2a5   : > { %v3299_v4 = vsel %vm8457_vm4, %v3294_v59, %v3298_v43  ;;  %v2214_v18 = vrot.slane %v2212_v48, 4  ;;  %v2220_v56 = vrot.slane %v2218_v44, 5  ;;  %v3311_v26 = vshrl.u32 %v3259_v55, 16  ;;  %v8989_v43 = vld [vmem:[#allocation2 + $0x28] sm:$0xf] }
 0x2a6   : > { %6801 = vmatprep.mubr.bf16.mxu0 %v6139_v54  ;;  %v3309_v22 = vsel %vm8457_vm4, %v3304_v39, %v3308_v13  ;;  %v2206_v40 = vrot.slane %v2205_v63, 4  ;;  %v3314_v33 = vshll.u32 %v3259_v55, 16  ;;  %v3320_v38 = vshll.u32 %v8975_v0, 16  ;;  %v3265_v63 = vld [vmem:[#allocation2 + $0x30] sm:$0xf] }
 0x2a7   : > { %v6213_v9 = vcombine.low %v3299_v4, %v3309_v22  ;;  %v2215_v30 = vor.u32 %v2214_v18, %v2210_v21  ;;  %v3313_v29 = vrot.slane %v3311_v26, 4  ;;  %v3324_v28 = vshrl.u32 %v8975_v0, 16  ;;  %v9000_v22 = vld [vmem:[#allocation2 + $0x34] sm:$0xf] }
 0x2a8   : > { %v2211_v42 = vsel %vm8457_vm4, %v2206_v40, %v2210_v21  ;;  %v3316_v25 = vrot.slane %v3314_v33, 5  ;;  %v3322_v19 = vrot.slane %v3320_v38, 5  ;;  %v3330_v12 = vshll.u32 %v8983_v51, 16 }
 0x2a9   : > { %6929 = vmatprep.mubr.bf16.mxu1 %v6213_v9  ;;  %v2216_v13 = vrot.slane %v2215_v30, 4  ;;  %v3326_v55 = vrot.slane %v3324_v28, 4  ;;  %v3335_v15 = vshrl.u32 %v3262_v23, 16  ;;  %v3338_v59 = vshll.u32 %v3262_v23, 16 }
 0x2aa   : > { %v3317_v48 = vor.u32 %v3316_v25, %v3313_v29  ;;  %v3332_v44 = vrot.slane %v3330_v12, 5  ;;  %v3344_v54 = vshll.u32 %v8989_v43, 16  ;;  %v3348_v39 = vshrl.u32 %v8989_v43, 16 }
 0x2ab   : > { %v2221_v21 = vsel %vm8457_vm4, %v2216_v13, %v2220_v56  ;;  %v3327_v4 = vor.u32 %v3326_v55, %v3322_v19  ;;  %v3337_v18 = vrot.slane %v3335_v15, 4  ;;  %v3340_v26 = vrot.slane %v3338_v59, 5  ;;  %v9005_v56 = vld [vmem:[#allocation2 + $0x38] sm:$0x1]  ;;  %v3268_v15 = vld [vmem:[#allocation2 + $0x3c] sm:$0xf] }
 0x2ac   : > { %v6140_v40 = vcombine.low %v2211_v42, %v2221_v21  ;;  %v3318_v33 = vrot.slane %v3317_v48, 4  ;;  %v3346_v38 = vrot.slane %v3344_v54, 5  ;;  %v3350_v9 = vrot.slane %v3348_v39, 4  ;;  %v9013_v39 = vld [vmem:[#allocation2 + $0x40] sm:$0xf] }
 0x2ad   : > { %v3328_v23 = vrot.slane %v3327_v4, 4  ;;  %v3341_v30 = vor.u32 %v3340_v26, %v3337_v18  ;;  %v3354_v29 = vshll.u32 %v8994_v2, 16  ;;  %v3359_v28 = vshrl.u32 %v3265_v63, 16  ;;  %v7419_v4 = vld [vmem:[#allocation3 + $0x148] sm:$0xff]  }
 0x2ae   : > { %6802 = vmatmul.mubr.bf16.gmra.mrb[52].mxu0 %v6140_v40  ;;  %v3323_v25 = vsel %vm8457_vm4, %v3318_v33, %v3322_v19  ;;  %v3351_v12 = vor.u32 %v3350_v9, %v3346_v38  ;;  %v3362_v13 = vshll.u32 %v3265_v63, 16  ;;  %v3368_v55 = vshll.u32 %v9000_v22, 16  ;;  %v9021_v9 = vld [vmem:[#allocation2 + $0x44] sm:$0x1] }
 0x2af   : > { %v3333_v42 = vsel %vm8457_vm4, %v3328_v23, %v3332_v44  ;;  %v3342_v59 = vrot.slane %v3341_v30, 4  ;;  %v3356_v48 = vrot.slane %v3354_v29, 5  ;;  %6821 = vmatprep.mubr.bf16.mxu0 %v6149_v34  ;;  %v3361_v54 = vrot.slane %v3359_v28, 4  ;;  %v3271_v29 = vld [vmem:[#allocation2 + $0x48] sm:$0xf] }
 0x2b0   : > { %v6214_v19 = vcombine.low %v3323_v25, %v3333_v42  ;;  %v3352_v21 = vrot.slane %v3351_v12, 4  ;;  %v3364_v18 = vrot.slane %v3362_v13, 5  ;;  %v3370_v63 = vrot.slane %v3368_v55, 5  ;;  %v9027_v13 = vld [vmem:[#allocation2 + $0x4c] sm:$0xf] }
 0x2b1   : > { %v3347_v26 = vsel %vm8457_vm4, %v3342_v59, %v3346_v38  ;;  %v3372_v40 = vshrl.u32 %v9000_v22, 16  ;;  %v3378_v44 = vshll.u32 %v9005_v56, 16  ;;  %v3383_v33 = vshrl.u32 %v3268_v15, 16 }
 0x2b2   : > { %6930 = vmatmul.mubr.bf16.vlgmr.msra.gmra.mrb[40].mxu1 %v6214_v19  ;;  %v3357_v62 = vsel %vm8457_vm4, %v3352_v21, %v3356_v48  ;;  %v3365_v34 = vor.u32 %v3364_v18, %v3361_v54  ;;  %v3386_v23 = vshll.u32 %v3268_v15, 16  ;;  %v3392_v30 = vshll.u32 %v9013_v39, 16  ;;  %v7423_v15 = vld [vmem:[#allocation3 + $0x150] sm:$0xff]   ;;  %v7429_v18 = vld [vmem:[#allocation3 + $0x88] sm:$0xff]  }
 0x2b3   : > { %6950 = vmatpush3.bf16.msra.mxu1 %v8816_v52  ;;  %v6215_v28 = vcombine.low %v3347_v26, %v3357_v62  ;;  %v3374_v38 = vrot.slane %v3372_v40, 4  ;;  %v3385_v25 = vrot.slane %v3383_v33, 4  ;;  %v6152_v12 = vcombine.low %v8808_v61, %v8814_v31  ;;  %v9034_v62 = vld [vmem:[#allocation2 + $0x50] sm:$0x1] }
 0x2b4   : > { %6951 = vmatprep.subr.bf16.mxu1 %v7419_v4  ;;  %v3366_v55 = vrot.slane %v3365_v34, 4  ;;  %v3388_v42 = vrot.slane %v3386_v23, 5  ;;  %v3394_v59 = vrot.slane %v3392_v30, 5  ;;  %v3396_v48 = vshrl.u32 %v9013_v39, 16 }
 0x2b5   : > { %6933 = vmatprep.mubr.bf16.mxu1 %v6215_v28  ;;  %v3375_v54 = vor.u32 %v3374_v38, %v3370_v63  ;;  %v3402_v19 = vshll.u32 %v9021_v9, 16  ;;  %v3407_v52 = vshrl.u32 %v3271_v29, 16  ;;  %v3410_v21 = vshll.u32 %v3271_v29, 16 }
 0x2b6   : > { %6822 = vmatmul.mubr.bf16.vlgmr.msra.gmra.mrb[56].mxu0 %v6150_v58  ;;  %v3380_v26 = vrot.slane %v3378_v44, 5  ;;  %v3389_v40 = vor.u32 %v3388_v42, %v3385_v25  ;;  %v3398_v33 = vrot.slane %v3396_v48, 4  ;;  %v3416_v34 = vshll.u32 %v9027_v13, 16  ;;  %v7424_v58 = vld [vmem:[#allocation3 + $0x158] sm:$0xff]  }
 0x2b7   : > { %6952 = vmatpush3.bf16.msra.mxu1 %v7419_v4  ;;  %v3371_v23 = vsel %vm8457_vm4, %v3366_v55, %v3370_v63  ;;  %v3376_v30 = vrot.slane %v3375_v54, 4  ;;  %6825 = vmatprep.mubr.bf16.mxu0 %v6151_v5  ;;  %v3409_v29 = vrot.slane %v3407_v52, 4  ;;  %v3412_v28 = vrot.slane %v3410_v21, 5  ;;  %v3274_v4 = vld [vmem:[#allocation2 + $0x54] sm:$0xf]  ;;  %v7431_v52 = vld [vmem:[#allocation3 + $0x90] sm:$0xff]  }
 0x2b8   : > { %v3390_v57 = vrot.slane %v3389_v40, 4  ;;  %v3399_v20 = vor.u32 %v3398_v33, %v3394_v59  ;;  %6953 = vmatprep.subr.bf16.mxu1 %v7423_v15  ;;  %v9042_v44 = vrot.slane %v3416_v34, 5  ;;  %v3420_v38 = vshrl.u32 %v9027_v13, 16  ;;  %6842 = vmatpush3.bf16.msra.mxu0 %v8921_v6 }
 0x2b9   : > { %v3381_v63 = vsel %vm8457_vm4, %v3376_v30, %v3380_v26  ;;  %v3404_v25 = vrot.slane %v3402_v19, 5  ;;  %v3413_v55 = vor.u32 %v3412_v28, %v3409_v29  ;;  %v3426_v17 = vshll.u32 %v9034_v62, 16  ;;  %6843 = vmatprep.subr.bf16.mxu0 %v7429_v18  ;;  %v9055_v26 = vld [vmem:[#allocation2 + $0x5c] sm:$0x1]  ;;  %v3277_v30 = vld [vmem:[#allocation2 + $0x60] sm:$0xf] }
 0x2ba   : > { %v6216_v5 = vcombine.low %v3371_v23, %v3381_v63  ;;  %v3395_v42 = vsel %vm8457_vm4, %v3390_v57, %v3394_v59  ;;  %v3400_v48 = vrot.slane %v3399_v20, 4  ;;  %v3422_v54 = vrot.slane %v3420_v38, 4  ;;  %v9062_v57 = vld [vmem:[#allocation2 + $0x64] sm:$0xf] }
 0x2bb   : > { %6954 = vmatpush3.bf16.msra.mxu1 %v7423_v15  ;;  %v3414_v6 = vrot.slane %v3413_v55, 4  ;;  %v6153_v21 = vcombine.low %v8835_v1, %v8840_v37  ;;  %v3431_v19 = vshrl.u32 %v3274_v4, 16  ;;  %v3434_v40 = vshll.u32 %v3274_v4, 16  ;;  %v7428_v15 = vld [vmem:[#allocation3 + $0x160] sm:$0xff]  }
 0x2bc   : > { %6934 = vmatmul.mubr.bf16.gmra.mrb[24].mxu1 %v6216_v5  ;;  %v3405_v33 = vsel %vm8457_vm4, %v3400_v48, %v3404_v25  ;;  %6955 = vmatprep.subr.bf16.mxu1 %v7424_v58  ;;  %v3423_v34 = vor.u32 %v3422_v54, %v9042_v44  ;;  %v3440_v59 = vshll.u32 %v9049_v7, 16  ;;  %v3444_v23 = vshrl.u32 %v9049_v7, 16  ;;  %v7434_v25 = vld [vmem:[#allocation3 + $0x98] sm:$0xff]   ;;  %v7432_v48 = vld [vmem:[#allocation3 + $0x168] sm:$0xff]  }
 0x2bd   : > { %v6217_v29 = vcombine.low %v3395_v42, %v3405_v33  ;;  %v3428_v28 = vrot.slane %v3426_v17, 5  ;;  %v3433_v1 = vrot.slane %v3431_v19, 4  ;;  %v3436_v37 = vrot.slane %v3434_v40, 5  ;;  %6844 = vmatpush3.bf16.msra.mxu0 %v7429_v18  ;;  %v9075_v42 = vld [vmem:[#allocation2 + $0x68] sm:$0x1] }
 0x2be   : > { %6826 = vmatmul.mubr.bf16.gmra.mrb[40].mxu0 %v6152_v12  ;;  %v3424_v20 = vrot.slane %v3423_v34, 4  ;;  %v3442_v38 = vrot.slane %v3440_v59, 5  ;;  %v3446_v4 = vrot.slane %v3444_v23, 4  ;;  %v3450_v63 = vshll.u32 %v9055_v26, 16  ;;  %6845 = vmatprep.subr.bf16.mxu0 %v7431_v52  ;;  %v3280_v54 = vld [vmem:[#allocation2 + $0x6c] sm:$0xf] }
 0x2bf   : > { %6937 = vmatprep.mubr.bf16.mxu1 %v6217_v29  ;;  %6956 = vmatpush3.bf16.msra.mxu1 %v7424_v58  ;;  %v3419_v55 = vsel %vm8457_vm4, %v3414_v6, %v9042_v44  ;;  %v3437_v18 = vor.u32 %v3436_v37, %v3433_v1  ;;  %v3455_v17 = vshrl.u32 %v3277_v30, 16  ;;  %v3458_v5 = vshll.u32 %v3277_v30, 16  ;;  %v9079_v23 = vld [vmem:[#allocation2 + $0x70] sm:$0xf] }
 0x2c0   : > { %v3429_v61 = vsel %vm8457_vm4, %v3424_v20, %v3428_v28  ;;  %6829 = vmatprep.mubr.bf16.mxu0 %v6153_v21  ;;  %v3447_v31 = vor.u32 %v3446_v4, %v3442_v38  ;;  %6957 = vmatprep.subr.bf16.mxu1 %v7428_v15  ;;  %v6154_v12 = vcombine.low %v8868_v11, %v8870_v14  ;;  %v3464_v58 = vshll.u32 %v9062_v57, 16  ;;  %v7437_v11 = vld [vmem:[#allocation3 + $0xa0] sm:$0xff]  }
 0x2c1   : > { %v3438_v19 = vrot.slane %v3437_v18, 4  ;;  %v3452_v44 = vrot.slane %v3450_v63, 5  ;;  %v3457_v6 = vrot.slane %v3455_v17, 4  ;;  %v3460_v40 = vrot.slane %v3458_v5, 5  ;;  %6846 = vmatpush3.bf16.msra.mxu0 %v7431_v52  ;;  %v9088_v20 = vld [vmem:[#allocation2 + $0x74] sm:$0x1] }
 0x2c2   : > { %v6218_v33 = vcombine.low %v3419_v55, %v3429_v61  ;;  %v3448_v34 = vrot.slane %v3447_v31, 4  ;;  %v3466_v59 = vrot.slane %v3464_v58, 5  ;;  %v3468_v21 = vshrl.u32 %v9062_v57, 16  ;;  %6847 = vmatprep.subr.bf16.mxu0 %v7434_v25  ;;  %v3283_v63 = vld [vmem:[#allocation2 + $0x78] sm:$0xf]  ;;  %v7435_v17 = vld [vmem:[#allocation3 + $0x170] sm:$0xff]  }
 0x2c3   : > { %v3443_v14 = vsel %vm8457_vm4, %v3438_v19, %v3442_v38  ;;  %6958 = vmatpush3.bf16.msra.mxu1 %v7428_v15  ;;  %v3461_v30 = vor.u32 %v3460_v40, %v3457_v6  ;;  %v3474_v29 = vshll.u32 %v9075_v42, 16  ;;  %v3479_v28 = vshrl.u32 %v3280_v54, 16  ;;  %v9092_v58 = vld [vmem:[#allocation2 + $0x7c] sm:$0xf] }
 0x2c4   : > { %6938 = vmatmul.mubr.bf16.gmra.mrb[28].mxu1 %v6218_v33  ;;  %v3453_v52 = vsel %vm8457_vm4, %v3448_v34, %v3452_v44  ;;  %v3470_v1 = vrot.slane %v3468_v21, 4  ;;  %6959 = vmatprep.subr.bf16.mxu1 %v7432_v48  ;;  %v6155_v37 = vcombine.low %v8897_v3, %v8899_v45  ;;  %v3482_v4 = vshll.u32 %v3280_v54, 16  ;;  %v7440_v3 = vld [vmem:[#allocation3 + $0xa8] sm:$0xff]   ;;  %v9095_v44 = vld [vmem:[#allocation2 + $0x80] sm:$0x1] }
 0x2c5   : > { %v6219_v55 = vcombine.low %v3443_v14, %v3453_v52  ;;  %v3462_v38 = vrot.slane %v3461_v30, 4  ;;  %v3481_v15 = vrot.slane %v3479_v28, 4  ;;  %v3488_v18 = vshll.u32 %v9079_v23, 16  ;;  %6848 = vmatpush3.bf16.msra.mxu0 %v7434_v25 }
 0x2c6   : > { %vm2683_vm5 = vcmask 1042432   ;;  %6830 = vmatmul.mubr.bf16.gmra.mrb[44].mxu0 %v6154_v12  ;;  %v3471_v5 = vor.u32 %v3470_v1, %v3466_v59  ;;  %v3484_v61 = vrot.slane %v3482_v4, 5  ;;  %v3492_v31 = vshrl.u32 %v9079_v23, 16  ;;  %6849 = vmatprep.subr.bf16.mxu0 %v7437_v11 }
 0x2c7   : > { %vm2684_vm6 = vcmask 1046532   ;;  %6941 = vmatprep.mubr.bf16.mxu1 %v6219_v55  ;;  %v3476_v45 = vrot.slane %v3474_v29, 5  ;;  %6833 = vmatprep.mubr.bf16.mxu0 %v6155_v37  ;;  %v3490_v54 = vrot.slane %v3488_v18, 5  ;;  %v3498_v19 = vshll.u32 %v9088_v20, 16  ;;  %v7439_v29 = vld [vmem:[#allocation3 + $0x178] sm:$0xff]  }
 0x2c8   : > { %v3503_v25 = vshrl.u32 %v3283_v63, 16  ;;  %v3467_v12 = vsel %vm8457_vm4, %v3462_v38, %v3466_v59  ;;  %v3472_v6 = vrot.slane %v3471_v5, 4  ;;  %v3485_v40 = vor.u32 %v3484_v61, %v3481_v15  ;;  %6960 = vmatpush3.bf16.msra.mxu1 %v7432_v48  ;;  %v3756_v18 = vld [vmem:[#allocation2 + $0xc] sm:$0xe]  ;;  %v7443_v5 = vld [vmem:[#allocation3 + $0xb0] sm:$0xff]   ;;  %vm9119_vm7 = vmor %vm2683_vm5, %vm2684_vm6 }
 0x2c9   : > { %v3494_v33 = vrot.slane %v3492_v31, 4  ;;  %6961 = vmatprep.subr.bf16.mxu1 %v7435_v17  ;;  %v3506_v21 = vshll.u32 %v3283_v63, 16  ;;  %v3512_v14 = vshll.u32 %v9092_v58, 16  ;;  %v3516_v30 = vshrl.u32 %v9092_v58, 16  ;;  %6850 = vmatpush3.bf16.msra.mxu0 %v7437_v11 }
 0x2ca   : > { %v3505_v34 = vrot.slane %v3503_v25, 4  ;;  %v3477_v28 = vsel %vm8457_vm4, %v3472_v6, %v3476_v45  ;;  %v3486_v52 = vrot.slane %v3485_v40, 4  ;;  %v3522_v59 = vshll.u32 %v9095_v44, 16  ;;  %6851 = vmatprep.subr.bf16.mxu0 %v7440_v3 }
 0x2cb   : > { %v3495_v1 = vor.u32 %v3494_v33, %v3490_v54  ;;  %v6220_v37 = vcombine.low %v3467_v12, %v3477_v28  ;;  %v3508_v4 = vrot.slane %v3506_v21, 5  ;;  %v3514_v48 = vrot.slane %v3512_v14, 5  ;;  %v9111_v12 = vld [vmem:[#allocation3 + $0x180] sm:$0xff]   ;;  %v2653_v21 = vld [vmem:[#allocation2] sm:$0xe] }
 0x2cc   : > { %v3518_v55 = vrot.slane %v3516_v30, 4  ;;  %v3491_v63 = vsel %vm8457_vm4, %v3486_v52, %v3490_v54  ;;  %v3500_v15 = vrot.slane %v3498_v19, 5  ;;  %6962 = vmatpush3.bf16.msra.mxu1 %v7435_v17  ;;  %v6156_v11 = vcombine.low %v8910_v36, %v8912_v35  ;;  %v3757_v28 = vld [vmem:[#allocation2 + $0x18] sm:$0xe] }
 0x2cd   : > { %v3496_v38 = vrot.slane %v3495_v1, 4  ;;  %6942 = vmatmul.mubr.bf16.gmra.mrb[32].mxu1 %v6220_v37  ;;  %v3509_v61 = vor.u32 %v3508_v4, %v3505_v34  ;;  %v6157_v45 = vcombine.low %v8927_v10, %v8931_v27  ;;  %v3798_v25 = vrot.slane %v8956_v32, 5  ;;  %6963 = vmatprep.subr.bf16.mxu1 %v7439_v29  ;;  %v7444_v34 = vld [vmem:[#allocation3 + $0xb8] sm:$0xff]   ;;  %v3758_v37 = vld [vmem:[#allocation2 + $0x24] sm:$0xe] }
 0x2ce   : > { %v3519_v31 = vor.u32 %v3518_v55, %v3514_v48  ;;  %v6030_v54 = vmul.f32 -1.442695, %v8539_v41  ;;  %6834 = vmatmul.mubr.bf16.gmra.mrb[48].mxu0 %v6156_v11  ;;  %v3524_v36 = vrot.slane %v3522_v59, 5  ;;  %v6231_v40 = vrot.slane %v3756_v18, 9  ;;  %v7849_v55 = vld [vmem:[#allocation2 + $0x8] sm:$0x1] }
 0x2cf   : > { %v3501_v17 = vsel %vm8457_vm4, %v3496_v38, %v3500_v15  ;;  %v3510_v19 = vrot.slane %v3509_v61, 4  ;;  %6837 = vmatprep.mubr.bf16.mxu0 %v6157_v45  ;;  %6852 = vmatpush3.bf16.msra.mxu0 %v7440_v3  ;;  %v3800_v27 = vrot.slane %v3798_v25, 4  ;;  %v3801_v32 = vrot.slane %v8962_v47, 5  ;;  %v9128_v3 = vld [vmem:[%s9988_s3] ss:$0 sm:$0xff] }
 0x2d0   : > { %v6221_v35 = vcombine.low %v3491_v63, %v3501_v17  ;;  %v3520_v6 = vrot.slane %v3519_v31, 4  ;;  %6964 = vmatpush3.bf16.msra.mxu1 %v7439_v29  ;;  %6853 = vmatprep.subr.bf16.mxu0 %v7443_v5  ;;  %v3805_v33 = vrot.slane %v8975_v0, 5  ;;  %v9132_v16 = vadd.f32 %v9128_v3, %v8292_v46  ;;  %v2654_v38 = vld [vmem:[#allocation2 + $0xc] sm:$0xe]  ;;  %v7850_v18 = vld [vmem:[#allocation2 + $0x10] sm:$0xf] }
 0x2d1   : > { %v3515_v14 = vsel %vm8457_vm4, %v3510_v19, %v3514_v48  ;;  %6985 = vmatprep.subr.bf16.mxu1 %v9111_v12  ;;  %v3812_v0 = vrot.slane %v8989_v43, 5  ;;  %7664 = vpow2.f32 %v6030_v54  ;;  %v9142_v30 = vadd.f32 %v9128_v3, %v8297_v49 }
 0x2d2   : > { %6945 = vmatprep.mubr.bf16.mxu1 %v6221_v35  ;;  %v3525_v47 = vsel %vm8457_vm4, %v3520_v6, %v3524_v36  ;;  %v3802_v46 = vsel %vm9119_vm7, %v3800_v27, %v3801_v32  ;;  %v6158_v29 = vcombine.low %v8964_v8, %v8968_v60  ;;  %v3799_v1 = vsel %vm9119_vm7, %v6231_v40, %v3798_v25  ;;  %v2655_v25 = vld [vmem:[#allocation2 + $0x18] sm:$0xe]  ;;  %v7852_v40 = vld [vmem:[#allocation2 + $0x1c] sm:$0xf] }
 0x2d3   : > { %v6222_v52 = vcombine.low %v3515_v14, %v3525_v47  ;;  %v3807_v59 = vrot.slane %v3805_v33, 4  ;;  %6854 = vmatpush3.bf16.msra.mxu0 %v7443_v5  ;;  %v6167_v43 = vrot.slane %v2653_v21, 9  ;;  %v6241_v4 = vcombine.low %v3799_v1, %v3802_v46  ;;  %v3759_v14 = vld [vmem:[#allocation2 + $0x30] sm:$0xe] }
 0x2d4   : > { %v3814_v48 = vrot.slane %v3812_v0, 4  ;;  %6855 = vmatprep.subr.bf16.mxu0 %v7444_v34  ;;  %v2688_v49 = vrot.slane %v8945_v50, 5  ;;  %v2691_v63 = vrot.slane %v7849_v55, 5  ;;  %v9152_v15 = vmul.f32 -1.442695, %v9132_v16 }
 0x2d5   : > { %6946 = vmatmul.mubr.bf16.gmra.mrb[44].mxu1 %v6222_v52  ;;  %v6232_v8 = vrot.slane %v3757_v28, 9  ;;  %v3808_v11 = vrot.slane %v8983_v51, 5  ;;  %v2695_v61 = vrot.slane %v7850_v18, 5  ;;  %v6233_v5 = vrot.slane %v3758_v37, 9  ;;  %v7853_v52 = vld [vmem:[#allocation2 + $0x20] sm:$0x1] }
 0x2d6   : > { %6965 = vmatprep.mubr.bf16.mxu1 %v6241_v4  ;;  %6838 = vmatmul.mubr.bf16.gmra.mrb[60].mxu0 %v6158_v29  ;;  %v3815_v31 = vrot.slane %v8994_v2, 5  ;;  %v2689_v50 = vsel %vm9119_vm7, %v6167_v43, %v2688_v49  ;;  %v2690_v45 = vrot.slane %v2688_v49, 4  ;;  %v6168_v17 = vrot.slane %v2654_v38, 9  ;;  %v7851_v2 = vld [vmem:[#allocation2 + $0x14] sm:$0x1]  ;;  %v7445_v43 = vld [vmem:[#allocation3 + $0x188] sm:$0xff]  }
 0x2d7   : > { %v3809_v54 = vsel %vm9119_vm7, %v3807_v59, %v3808_v11  ;;  %6856 = vmatpush3.bf16.msra.mxu0 %v7444_v34  ;;  %v2697_v36 = vrot.slane %v2695_v61, 4  ;;  %v3819_v51 = vrot.slane %v9000_v22, 5  ;;  %v2698_v6 = vrot.slane %v7851_v2, 5  ;;  %v9170_v22 = vpop.eup %7662  ;;  %v7854_v38 = vld [vmem:[#allocation2 + $0x28] sm:$0xf]  ;;  %v10111_v2 = vld [vmem:[#allocation17_spill] sm:$0xff] }
 0x2d8   : > { %v3816_v35 = vsel %vm9119_vm7, %v3814_v48, %v3815_v31  ;;  %v2692_v19 = vsel %vm9119_vm7, %v2690_v45, %v2691_v63  ;;  %v2702_v27 = vrot.slane %v7852_v40, 5  ;;  %v9166_v32 = vmul.f32 -1.442695, %v9142_v30 }
 0x2d9   : > { %v3806_v34 = vsel %vm9119_vm7, %v6232_v8, %v3805_v33  ;;  %v6177_v21 = vcombine.low %v2689_v50, %v2692_v19  ;;  %v6169_v47 = vrot.slane %v2655_v25, 9  ;;  %v3813_v46 = vsel %vm9119_vm7, %v6233_v5, %v3812_v0  ;;  %v3760_v33 = vld [vmem:[#allocation2 + $0x3c] sm:$0xe]  ;;  %v7855_v19 = vld [vmem:[#allocation2 + $0x34] sm:$0xf] }
 0x2da   : > { %v2699_v29 = vsel %vm9119_vm7, %v2697_v36, %v2698_v6  ;;  %v2704_v28 = vrot.slane %v2702_v27, 4  ;;  %v2705_v1 = vrot.slane %v7853_v52, 5  ;;  %v6242_v59 = vcombine.low %v3806_v34, %v3809_v54  ;;  %v2657_v54 = vld [vmem:[#allocation2 + $0x30] sm:$0xe]  ;;  %v7446_v36 = vld [vmem:[#allocation3 + $0x190] sm:$0xff]  }
 0x2db   : > { %v6243_v37 = vcombine.low %v3813_v46, %v3816_v35  ;;  %6857 = vmatprep.mubr.bf16.mxu0 %v6177_v21  ;;  %v3821_v4 = vrot.slane %v3819_v51, 4  ;;  %v3826_v48 = vrot.slane %v9013_v39, 5  ;;  %v9177_v49 = vpop.eup %7664  ;;  %v2696_v55 = vsel %vm9119_vm7, %v6168_v17, %v2695_v61  ;;  %v2656_v39 = vld [vmem:[#allocation2 + $0x24] sm:$0xe] }
 0x2dc   : > { %v6234_v0 = vrot.slane %v3759_v14, 9  ;;  %v2706_v63 = vsel %vm9119_vm7, %v2704_v28, %v2705_v1  ;;  %v2709_v8 = vrot.slane %v7854_v38, 5  ;;  %v6178_v11 = vcombine.low %v2696_v55, %v2699_v29  ;;  %v7858_v55 = vld [vmem:[#allocation2 + $0x40] sm:$0xf] }
 0x2dd   : > { %6966 = vmatmul.mubr.bf16.vlgmr.msra.gmra.mrb[48].mxu1 %v6242_v59  ;;  %v3822_v18 = vrot.slane %v9005_v56, 5  ;;  %v2703_v5 = vsel %vm9119_vm7, %v6169_v47, %v2702_v27  ;;  %v3828_v31 = vrot.slane %v3826_v48, 4  ;;  %v9188_v50 = vadd.f32 %v9128_v3, %v8303_v53  ;;  %v7856_v27 = vld [vmem:[#allocation2 + $0x2c] sm:$0x1]  ;;  %v7857_v47 = vld [vmem:[#allocation2 + $0x38] sm:$0x1] }
 0x2de   : > { %6986 = vmatpush3.bf16.msra.mxu1 %v9111_v12  ;;  %6969 = vmatprep.mubr.bf16.mxu1 %v6243_v37  ;;  %v6179_v61 = vcombine.low %v2703_v5, %v2706_v63  ;;  %v6235_v45 = vrot.slane %v3760_v33, 9  ;;  %v2711_v25 = vrot.slane %v2709_v8, 4  ;;  %v3829_v17 = vrot.slane %v9021_v9, 5  ;;  %v7447_v59 = vld [vmem:[#allocation3 + $0x198] sm:$0xff]   ;;  %v10112_v63 = vld [vmem:[#allocation18_spill] sm:$0xff] }
 0x2df   : > { %6987 = vmatprep.subr.bf16.mxu1 %v7445_v43  ;;  %6858 = vmatmul.mubr.bf16.vlgmr.msra.gmra.mrb[64].mxu0 %v6178_v11  ;;  %v3823_v56 = vsel %vm9119_vm7, %v3821_v4, %v3822_v18  ;;  %v3833_v35 = vrot.slane %v9027_v13, 5  ;;  %v2716_v53 = vrot.slane %v7855_v19, 5  ;;  %v9197_v12 = vadd.f32 %v9128_v3, %v10111_v2  ;;  %v3761_v37 = vld [vmem:[#allocation2 + $0x48] sm:$0xe]  ;;  %v3762_v11 = vld [vmem:[#allocation2 + $0x54] sm:$0xe] }
 0x2e0   : > { %v3820_v6 = vsel %vm9119_vm7, %v6234_v0, %v3819_v51  ;;  %6861 = vmatprep.mubr.bf16.mxu0 %v6179_v61  ;;  %v6170_v40 = vrot.slane %v2656_v39, 9  ;;  %v2712_v34 = vrot.slane %v7856_v27, 5  ;;  %v3830_v21 = vsel %vm9119_vm7, %v3828_v31, %v3829_v17  ;;  %v2658_v61 = vld [vmem:[#allocation2 + $0x3c] sm:$0xe]  ;;  %v7859_v17 = vld [vmem:[#allocation2 + $0x4c] sm:$0xf] }
 0x2e1   : > { %v6171_v9 = vrot.slane %v2657_v54, 9  ;;  %v2718_v14 = vrot.slane %v2716_v53, 4  ;;  %v2719_v46 = vrot.slane %v7857_v47, 5  ;;  %v9204_v29 = vmul.f32 -1.442695, %v9188_v50  ;;  %v7448_v2 = vld [vmem:[#allocation3 + $0x1a0] sm:$0xff]  }
 0x2e2   : > { %6988 = vmatpush3.bf16.msra.mxu1 %v7445_v43  ;;  %v6244_v28 = vcombine.low %v3820_v6, %v3823_v56  ;;  %v2713_v52 = vsel %vm9119_vm7, %v2711_v25, %v2712_v34  ;;  %v3840_v51 = vrot.slane %v9049_v7, 5  ;;  %v3827_v1 = vsel %vm9119_vm7, %v6235_v45, %v3826_v48  ;;  %v2659_v56 = vld [vmem:[#allocation2 + $0x48] sm:$0xe]  ;;  %v3763_v13 = vld [vmem:[#allocation2 + $0x60] sm:$0xe] }
 0x2e3   : > { %6989 = vmatprep.subr.bf16.mxu1 %v7446_v36  ;;  %v3835_v4 = vrot.slane %v3833_v35, 4  ;;  %v2720_v33 = vsel %vm9119_vm7, %v2718_v14, %v2719_v46  ;;  %v2723_v43 = vrot.slane %v7858_v55, 5  ;;  %v9216_v0 = vmul.f32 -1.442695, %v9197_v12 }
 0x2e4   : > { %v9220_v7 = vadd.f32 %v9128_v3, %v10112_v63  ;;  %v6245_v38 = vcombine.low %v3827_v1, %v3830_v21  ;;  %v2710_v48 = vsel %vm9119_vm7, %v6170_v40, %v2709_v8  ;;  %v3836_v5 = vrot.slane %v9034_v62, 5  ;;  %v10113_v1 = vld [vmem:[#allocation19_spill] sm:$0xff] }
 0x2e5   : > { %6970 = vmatmul.mubr.bf16.gmra.mrb[24].mxu1 %v6244_v28  ;;  %v6180_v18 = vcombine.low %v2710_v48, %v2713_v52  ;;  %v2717_v31 = vsel %vm9119_vm7, %v6171_v9, %v2716_v53  ;;  %v3842_v39 = vrot.slane %v3840_v51, 4  ;;  %v6236_v45 = vrot.slane %v3761_v37, 9  ;;  %v7861_v9 = vld [vmem:[#allocation2 + $0x50] sm:$0x1]  ;;  %v9244_v28 = vld [vmem:[#allocation2 + $0x58] sm:$0xf] }
 0x2e6   : > { %6973 = vmatprep.mubr.bf16.mxu1 %v6245_v38  ;;  %6990 = vmatpush3.bf16.msra.mxu1 %v7446_v36  ;;  %v6181_v25 = vcombine.low %v2717_v31, %v2720_v33  ;;  %v2725_v54 = vrot.slane %v2723_v43, 4  ;;  %v2730_v19 = vrot.slane %v7859_v17, 5  ;;  %7666 = vpow2.f32 %v9152_v15  ;;  %v7860_v36 = vld [vmem:[#allocation2 + $0x44] sm:$0x1]  ;;  %v10114_v33 = vld [vmem:[#allocation20_spill] sm:$0xff] }
 0x2e7   : > { %6991 = vmatprep.subr.bf16.mxu1 %v7447_v59  ;;  %6862 = vmatmul.mubr.bf16.gmra.mrb[40].mxu0 %v6180_v18  ;;  %v3837_v62 = vsel %vm9119_vm7, %v3835_v4, %v3836_v5  ;;  %v6237_v8 = vrot.slane %v3762_v11, 9  ;;  %v3843_v53 = vrot.slane %v9055_v26, 5  ;;  %v6172_v6 = vrot.slane %v2658_v61, 9  ;;  %v7449_v4 = vld [vmem:[#allocation3 + $0x1a8] sm:$0xff]   ;;  %v3764_v11 = vld [vmem:[#allocation2 + $0x6c] sm:$0xe] }
 0x2e8   : > { %6865 = vmatprep.mubr.bf16.mxu0 %v6181_v25  ;;  %v2726_v40 = vrot.slane %v7860_v36, 5  ;;  %v3847_v27 = vrot.slane %v9062_v57, 5  ;;  %v2732_v34 = vrot.slane %v2730_v19, 4  ;;  %v6173_v15 = vrot.slane %v2659_v56, 9  ;;  %v2660_v31 = vld [vmem:[#allocation2 + $0x54] sm:$0xe] }
 0x2e9   : > { %v3844_v21 = vsel %vm9119_vm7, %v3842_v39, %v3843_v53  ;;  %v2733_v14 = vrot.slane %v7861_v9, 5  ;;  %v3854_v47 = vrot.slane %v9079_v23, 5  ;;  %v9236_v46 = vmul.f32 -1.442695, %v9220_v7  ;;  %v7863_v39 = vld [vmem:[#allocation2 + $0x64] sm:$0xf] }
 0x2ea   : > { %6992 = vmatpush3.bf16.msra.mxu1 %v7447_v59  ;;  %v3834_v26 = vsel %vm9119_vm7, %v6236_v45, %v3833_v35  ;;  %v2727_v57 = vsel %vm9119_vm7, %v2725_v54, %v2726_v40  ;;  %v2737_v52 = vrot.slane %v9244_v28, 5  ;;  %v9249_v37 = vadd.f32 %v9128_v3, %v10113_v1  ;;  %v2661_v17 = vld [vmem:[#allocation2 + $0x60] sm:$0xe] }
 0x2eb   : > { %v6246_v23 = vcombine.low %v3834_v26, %v3837_v62  ;;  %v3841_v59 = vsel %vm9119_vm7, %v6237_v8, %v3840_v51  ;;  %6993 = vmatprep.subr.bf16.mxu1 %v7448_v2  ;;  %v2734_v35 = vsel %vm9119_vm7, %v2732_v34, %v2733_v14  ;;  %v9257_v55 = vadd.f32 %v9128_v3, %v10114_v33  ;;  %v7450_v53 = vld [vmem:[#allocation3 + $0x1b0] sm:$0xff]   ;;  %v7452_v33 = vld [vmem:[#allocation3 + $0x1b8] sm:$0xff]  }
 0x2ec   : > { %v6247_v63 = vcombine.low %v3841_v59, %v3844_v21  ;;  %v2724_v38 = vsel %vm9119_vm7, %v6172_v6, %v2723_v43  ;;  %v3849_v48 = vrot.slane %v3847_v27, 4  ;;  %v2731_v51 = vsel %vm9119_vm7, %v6173_v15, %v2730_v19  ;;  %v10115_v43 = vld [vmem:[#allocation21_spill] sm:$0xff] }
 0x2ed   : > { %6974 = vmatmul.mubr.bf16.gmra.mrb[28].mxu1 %v6246_v23  ;;  %v6182_v18 = vcombine.low %v2724_v38, %v2727_v57  ;;  %v3856_v5 = vrot.slane %v3854_v47, 4  ;;  %v2744_v61 = vrot.slane %v7863_v39, 5  ;;  %v6238_v45 = vrot.slane %v3763_v13, 9  ;;  %v3765_v13 = vld [vmem:[#allocation2 + $0x78] sm:$0xe] }
 0x2ee   : > { %6977 = vmatprep.mubr.bf16.mxu1 %v6247_v63  ;;  %6994 = vmatpush3.bf16.msra.mxu1 %v7448_v2  ;;  %v3850_v25 = vrot.slane %v9075_v42, 5  ;;  %v6183_v54 = vcombine.low %v2731_v51, %v2734_v35  ;;  %v2739_v56 = vrot.slane %v2737_v52, 4  ;;  %v9266_v62 = vadd.f32 %v9128_v3, %v10115_v43  ;;  %v7864_v42 = vld [vmem:[#allocation2 + $0x5c] sm:$0x1]  ;;  %v2662_v38 = vld [vmem:[#allocation2 + $0x6c] sm:$0xe] }
 0x2ef   : > { %6866 = vmatmul.mubr.bf16.gmra.mrb[44].mxu0 %v6182_v18  ;;  %6995 = vmatprep.subr.bf16.mxu1 %v7449_v4  ;;  %v6239_v8 = vrot.slane %v3764_v11, 9  ;;  %v3857_v19 = vrot.slane %v9088_v20, 5  ;;  %v2746_v6 = vrot.slane %v2744_v61, 4  ;;  %v6174_v36 = vrot.slane %v2660_v31, 9  ;;  %v7865_v20 = vld [vmem:[#allocation2 + $0x68] sm:$0x1] }
 0x2f0   : > { %v3851_v2 = vsel %vm9119_vm7, %v3849_v48, %v3850_v25  ;;  %6869 = vmatprep.mubr.bf16.mxu0 %v6183_v54  ;;  %v2740_v40 = vrot.slane %v7864_v42, 5  ;;  %v3861_v34 = vrot.slane %v9092_v58, 5  ;;  %v9272_v21 = vpop.eup %7666  ;;  %v6037_v15 = vmul.f32 -1.442695, %v9249_v37  ;;  %v10117_v51 = vld [vmem:[#allocation23_spill] sm:$0xff]  ;;  %v7453_v31 = vld [vmem:[#allocation3 + $0x1c0] sm:$0xff]  }
 0x2f1   : > { %v3858_v9 = vsel %vm9119_vm7, %v3856_v5, %v3857_v19  ;;  %v6175_v14 = vrot.slane %v2661_v17, 9  ;;  %v2747_v26 = vrot.slane %v7865_v20, 5  ;;  %v6040_v57 = vmul.f32 -1.442695, %v9257_v55  ;;  %v10118_v25 = vld [vmem:[#allocation24_spill] sm:$0xff] }
 0x2f2   : > { %v3848_v28 = vsel %vm9119_vm7, %v6238_v45, %v3847_v27  ;;  %6996 = vmatpush3.bf16.msra.mxu1 %v7449_v4  ;;  %v2741_v1 = vsel %vm9119_vm7, %v2739_v56, %v2740_v40  ;;  %v2751_v58 = vrot.slane %v8968_v60, 5  ;;  %7668 = vpow2.f32 %v9166_v32 }
 0x2f3   : > { %v6248_v23 = vcombine.low %v3848_v28, %v3851_v2  ;;  %v3855_v59 = vsel %vm9119_vm7, %v6239_v8, %v3854_v47  ;;  %6997 = vmatprep.subr.bf16.mxu1 %v7450_v53  ;;  %v2748_v35 = vsel %vm9119_vm7, %v2746_v6, %v2747_v26  ;;  %7670 = vpow2.f32 %v9204_v29  ;;  %v10119_v8 = vld [vmem:[#allocation25_spill] sm:$0xff]  ;;  %v7451_v6 = vld [vmem:[#allocation2 + $0x18] sm:$0xff]  }
 0x2f4   : > { %v6249_v27 = vcombine.low %v3855_v59, %v3858_v9  ;;  %v2738_v4 = vsel %vm9119_vm7, %v6174_v36, %v2737_v52  ;;  %v3863_v63 = vrot.slane %v3861_v34, 4  ;;  %7672 = vpow2.f32 %v9216_v0  ;;  %v10116_v52 = vld [vmem:[#allocation22_spill] sm:$0xff] }
 0x2f5   : > { %v6038_v60 = vmul.f32 -1.442695, %v9266_v62  ;;  %6978 = vmatmul.mubr.bf16.gmra.mrb[32].mxu1 %v6248_v23  ;;  %v6184_v32 = vcombine.low %v2738_v4, %v2741_v1  ;;  %v2745_v47 = vsel %vm9119_vm7, %v6175_v14, %v2744_v61  ;;  %v6240_v48 = vrot.slane %v3765_v13, 9  ;;  %v7866_v61 = vld [vmem:[#allocation2 + $0x74] sm:$0x1]  ;;  %v7456_v23 = vld [vmem:[#allocation3 + $0x1c8] sm:$0xff]  }
 0x2f6   : > { %6981 = vmatprep.mubr.bf16.mxu1 %v6249_v27  ;;  %6998 = vmatpush3.bf16.msra.mxu1 %v7450_v53  ;;  %v3864_v29 = vrot.slane %v9095_v44, 5  ;;  %v6185_v11 = vcombine.low %v2745_v47, %v2748_v35  ;;  %v2753_v18 = vrot.slane %v2751_v58, 4  ;;  %7674 = vpow2.f32 %v9236_v46  ;;  %v7455_v35 = vld [vmem:[#allocation2 + $0x30] sm:$0xff]   ;;  %v7459_v4 = vld [vmem:[#allocation3 + $0x1d0] sm:$0xff]  }
 0x2f7   : > { %v9299_v0 = vadd.f32 %v9128_v3, %v10116_v52  ;;  %v9303_v5 = vadd.f32 %v9128_v3, %v10117_v51  ;;  %6870 = vmatmul.mubr.bf16.gmra.mrb[48].mxu0 %v6184_v32  ;;  %6999 = vmatprep.subr.bf16.mxu1 %v7452_v33  ;;  %7676 = vpow2.f32 %v6037_v15  ;;  %v6176_v44 = vrot.slane %v2662_v38, 9  ;;  %v4367_v32 = vld [vmem:[#allocation2 + $0x18] sm:$0xf]  ;;  %v7458_v51 = vld [vmem:[#allocation2 + $0x48] sm:$0xff]  }
 0x2f8   : > { %v3865_v39 = vsel %vm9119_vm7, %v3863_v63, %v3864_v29  ;;  %6873 = vmatprep.mubr.bf16.mxu0 %v6185_v11  ;;  %v2754_v45 = vrot.slane %v7866_v61, 5  ;;  %v814_v46 = vadd.f32 1.0, %v9170_v22  ;;  %7678 = vpow2.f32 %v6040_v57  ;;  %v7460_v29 = vld [vmem:[#allocation3 + $0x1d8] sm:$0xff]   ;;  %v9328_v11 = vld [vmem:[#allocation2 + $0x1c] sm:$0xf] }
 0x2f9   : > { %7680 = vpow2.f32 %v6038_v60  ;;  %v9310_v54 = vadd.f32 %v9128_v3, %v10118_v25  ;;  %v3862_v56 = vsel %vm9119_vm7, %v6240_v48, %v3861_v34  ;;  %v6043_v43 = vmul.f32 -1.442695, %v9299_v0  ;;  %v7457_v48 = vld [vmem:[#allocation2 + $0x3c] sm:$0xff]  }
 0x2fa   : > { %7000 = vmatpush3.bf16.msra.mxu1 %v7452_v33  ;;  %v2755_v17 = vsel %vm9119_vm7, %v2753_v18, %v2754_v45  ;;  %v9319_v19 = vadd.f32 %v9128_v3, %v10119_v8  ;;  %v6250_v22 = vcombine.low %v3862_v56, %v3865_v39  ;;  %v6041_v53 = vmul.f32 -1.442695, %v9303_v5  ;;  %v4370_v56 = vld [vmem:[#allocation2 + $0x24] sm:$0xf] }
 0x2fb   : > { %7021 = vmatprep.subr.bf16.mxu1 %v7453_v31  ;;  %v2752_v2 = vsel %vm9119_vm7, %v6176_v44, %v2751_v58  ;;  %v815_v42 = vadd.f32 1.0, %v9177_v49  ;;  %7682 = vrcp.f32 %v814_v46  ;;  %v6044_v15 = vmul.f32 -1.442695, %v9310_v54  ;;  %v7454_v58 = vld [vmem:[#allocation2 + $0x24] sm:$0xff]  }
 0x2fc   : > { %v7669_v36 = vpop.eup %7668  ;;  %v6186_v40 = vcombine.low %v2752_v2, %v2755_v17  ;;  %7684 = vpow2.f32 %v6043_v43  ;;  %v6042_v9 = vmul.f32 -1.442695, %v9319_v19  ;;  %v820_v14 = vadd.f32 1.0, %v9272_v21  ;;  %v9332_v17 = vld [vmem:[#allocation2 + $0x28] sm:$0xf] }
 0x2fd   : > { %6982 = vmatmul.mubr.bf16.gmra.mrb[52].mxu1 %v6250_v22  ;;  %v7671_v34 = vpop.eup %7670  ;;  %7686 = vpow2.f32 %v6041_v53  ;;  %v818_v26 = vadd.f32 1.0, %v7669_v36  ;;  %v4401_v39 = vshll.u32 %v4367_v32, 16  ;;  %v4407_v46 = vshll.u32 %v9328_v11, 16  ;;  %v7463_v22 = vld [vmem:[#allocation3 + $0x1e0] sm:$0xff]  }
 0x2fe   : > { %7001 = vmatprep.mubr.bf16.mxu1 %v7451_v6  ;;  %v7673_v3 = vpop.eup %7672  ;;  %7688 = vrcp.f32 %v815_v42  ;;  %v821_v49 = vadd.f32 1.0, %v7671_v34  ;;  %v4411_v25 = vshrl.u32 %v9328_v11, 16  ;;  %v4422_v34 = vshrl.u32 %v4370_v56, 16 }
 0x2ff   : > { %6874 = vmatmul.mubr.bf16.gmra.mrb[68].mxu0 %v6186_v40  ;;  %7690 = vpow2.f32 %v6044_v15  ;;  %v819_v1 = vadd.f32 1.0, %v7673_v3  ;;  %v4403_v36 = vrot.slane %v4401_v39, 5  ;;  %v9334_v40 = vld [vmem:[#allocation2 + $0x20] sm:$0x1]  ;;  %v4425_v15 = vshll.u32 %v4370_v56, 16 }
 0x300   : > { %v7675_v20 = vpop.eup %7674  ;;  %7692 = vpow2.f32 %v6042_v9  ;;  %v4431_v3 = vshll.u32 %v9332_v17, 16  ;;  %v4435_v9 = vshrl.u32 %v9332_v17, 16  ;;  %v9370_v39 = vld [vmem:[#allocation2 + $0x2c] sm:$0x1] }
 0x301   : > { %v7677_v57 = vpop.eup %7676  ;;  %7694 = vrcp.f32 %v820_v14  ;;  %v824_v13 = vadd.f32 1.0, %v7675_v20  ;;  %v9338_v20 = vrot.slane %v4407_v46, 5 }
 0x302   : > { %v7679_v28 = vpop.eup %7678  ;;  %7696 = vrcp.f32 %v818_v26  ;;  %v822_v33 = vadd.f32 1.0, %v7677_v57  ;;  %v4413_v26 = vrot.slane %v4411_v25, 4 }
 0x303   : > { %v7681_v59 = vpop.eup %7680  ;;  %7698 = vrcp.f32 %v821_v49  ;;  %v825_v21 = vadd.f32 1.0, %v7679_v28  ;;  %v10120_v49 = vld [vmem:[#allocation44_spill] sm:$0xff] }
 0x304   : > { %7700 = vrcp.f32 %v819_v1  ;;  %v823_v27 = vadd.f32 1.0, %v7681_v59  ;;  %v4373_v59 = vld [vmem:[#allocation2 + $0x30] sm:$0xf] }
 0x305   : > { %7002 = vmatmul.mubr.bf16.vlgmr.msra.gmra.mrb[56].mxu1 %v7454_v58  ;;  %v7683_v63 = vpop.eup %7682  ;;  %7702 = vrcp.f32 %v824_v13  ;;  %v7461_v58 = vld [vmem:[#allocation2 + $0x54] sm:$0xff]  }
 0x306   : > { %7022 = vmatpush3.bf16.msra.mxu1 %v7453_v31  ;;  %7005 = vmatprep.mubr.bf16.mxu1 %v7455_v35  ;;  %v7685_v60 = vpop.eup %7684  ;;  %7704 = vrcp.f32 %v822_v33  ;;  %v4398_v31 = vshrl.u32 %v4367_v32, 16  ;;  %v9341_v28 = vmul.f32 %v7683_v63, %v10120_v49  ;;  %v7462_v33 = vld [vmem:[#allocation2 + $0x60] sm:$0xff]   ;;  %v4424_v63 = vrot.slane %v4422_v34, 4 }
 0x307   : > { %7023 = vmatprep.subr.bf16.mxu1 %v7456_v23  ;;  %v7687_v47 = vpop.eup %7686  ;;  %7706 = vrcp.f32 %v825_v21  ;;  %v828_v52 = vadd.f32 1.0, %v7685_v60  ;;  %v4427_v60 = vrot.slane %v4425_v15, 5  ;;  %v4437_v32 = vrot.slane %v4435_v9, 4 }
 0x308   : > { %v7689_v38 = vpop.eup %7688  ;;  %7708 = vrcp.f32 %v823_v27  ;;  %v826_v61 = vadd.f32 1.0, %v7687_v47  ;;  %v4400_v2 = vrot.slane %v4398_v31, 4  ;;  %v4417_v27 = vshll.u32 %v9334_v40, 16  ;;  %v9352_v47 = vld [vmem:[#allocation2 + $0x34] sm:$0xf] }
 0x309   : > { %v7691_v18 = vpop.eup %7690  ;;  %7710 = vrcp.f32 %v828_v52  ;;  %v9344_v1 = vmul.f32 %v7689_v38, %v8539_v41  ;;  %v9350_v41 = vrot.slane %v4431_v3, 5  ;;  %v4428_v25 = vor.u32 %v4427_v60, %v4424_v63 }
 0x30a   : > { %7024 = vmatpush3.bf16.msra.mxu1 %v7456_v23  ;;  %v7693_v44 = vpop.eup %7692  ;;  %v829_v8 = vadd.f32 1.0, %v7691_v18  ;;  %7712 = vrcp.f32 %v826_v61  ;;  %v7465_v23 = vld [vmem:[#allocation3 + $0x1e8] sm:$0xff]   ;;  %v4404_v21 = vor.u32 %v4403_v36, %v4400_v2  ;;  %v7464_v2 = vld [vmem:[#allocation2 + $0x6c] sm:$0xff]  }
 0x30b   : > { %7025 = vmatprep.subr.bf16.mxu1 %v7459_v4  ;;  %v7695_v45 = vpop.eup %7694  ;;  %v827_v6 = vadd.f32 1.0, %v7693_v44  ;;  %v4438_v56 = vor.u32 %v4437_v32, %v9350_v41  ;;  %v7469_v36 = vld [vmem:[#allocation3 + $0x1f8] sm:$0xff]  }
 0x30c   : > { %v7697_v43 = vpop.eup %7696  ;;  %7714 = vrcp.f32 %v829_v8  ;;  %v9347_v35 = vmul.f32 %v7695_v45, %v9132_v16  ;;  %v4414_v16 = vor.u32 %v4413_v26, %v9338_v20  ;;  %v4376_v45 = vld [vmem:[#allocation2 + $0x3c] sm:$0xf]  ;;  %v4405_v46 = vrot.slane %v4404_v21, 4 }
 0x30d   : > { %7006 = vmatmul.mubr.bf16.gmra.mrb[24].mxu1 %v7457_v48  ;;  %v7699_v53 = vpop.eup %7698  ;;  %7716 = vrcp.f32 %v827_v6  ;;  %v9355_v38 = vmul.f32 %v7697_v43, %v9142_v30  ;;  %v4446_v48 = vshrl.u32 %v4373_v59, 16  ;;  %v7467_v30 = vld [vmem:[#allocation3 + $0x1f0] sm:$0xff]   ;;  %v4379_v43 = vld [vmem:[#allocation2 + $0x48] sm:$0xf]  ;;  %v9384_v6 = vld [vmem:[#allocation2 + $0x4c] sm:$0xf] }
 0x30e   : > { %7009 = vmatprep.mubr.bf16.mxu1 %v7458_v51  ;;  %7026 = vmatpush3.bf16.msra.mxu1 %v7459_v4  ;;  %v7701_v42 = vpop.eup %7700  ;;  %v9359_v18 = vmul.f32 %v7699_v53, %v9188_v50  ;;  %v4455_v50 = vshll.u32 %v9352_v47, 16  ;;  %v4473_v34 = vshll.u32 %v4376_v45, 16  ;;  %v4494_v49 = vshrl.u32 %v4379_v43, 16 }
 0x30f   : > { %7027 = vmatprep.subr.bf16.mxu1 %v7460_v29  ;;  %v7703_v14 = vpop.eup %7702  ;;  %v9362_v52 = vmul.f32 %v7701_v42, %v9197_v12  ;;  %v4459_v12 = vshrl.u32 %v9352_v47, 16  ;;  %v4470_v42 = vshrl.u32 %v4376_v45, 16  ;;  %v4503_v21 = vshll.u32 %v9384_v6, 16 }
 0x310   : > { %v7705_v57 = vpop.eup %7704  ;;  %v9365_v51 = vmul.f32 %v7703_v14, %v9220_v7  ;;  %v9380_v7 = vld [vmem:[#allocation2 + $0x40] sm:$0xf]  ;;  %v7466_v14 = vld [vmem:[#allocation2 + $0x78] sm:$0xff]   ;;  %v9388_v26 = vrot.slane %v4455_v50, 5  ;;  %v4410_v63 = vsel %vm8457_vm4, %v4405_v46, %v9338_v20  ;;  %v4475_v50 = vrot.slane %v4473_v34, 5  ;;  %v7468_v20 = vld [vmem:[#allocation2 + $0x84] sm:$0xff]  }
 0x311   : > { %v7707_v13 = vpop.eup %7706  ;;  %v9368_v31 = vmul.f32 %v7705_v57, %v9249_v37  ;;  %v4419_v37 = vrot.slane %v4417_v27, 5  ;;  %v4479_v15 = vshll.u32 %v9380_v7, 16  ;;  %v4483_v3 = vshrl.u32 %v9380_v7, 16  ;;  %v4382_v34 = vld [vmem:[#allocation2 + $0x54] sm:$0xf] }
 0x312   : > { %7028 = vmatpush3.bf16.msra.mxu1 %v7460_v29  ;;  %v7709_v4 = vpop.eup %7708  ;;  %v4449_v29 = vshll.u32 %v4373_v59, 16  ;;  %10121 = vst [vmem:[#allocation17_spill] sm:$0xff] %v9365_v51  ;;  %v9373_v44 = vmul.f32 %v7707_v13, %v9257_v55  ;;  %v4415_v55 = vrot.slane %v4414_v16, 4  ;;  %v4461_v57 = vrot.slane %v4459_v12, 4 }
 0x313   : > { %7029 = vmatprep.subr.bf16.mxu1 %v7463_v22  ;;  %10122 = vst [vmem:[#allocation18_spill] sm:$0xff] %v9368_v31  ;;  %v9376_v61 = vmul.f32 %v7709_v4, %v9266_v62  ;;  %v7711_v8 = vpop.eup %7710  ;;  %v4448_v62 = vrot.slane %v4446_v48, 4  ;;  %v4429_v59 = vrot.slane %v4428_v25, 4  ;;  %v4439_v13 = vrot.slane %v4438_v56, 4  ;;  %v9399_v48 = vld [vmem:[#allocation3 + $0x200] sm:$0xff]  }
 0x314   : > { %10123 = vst [vmem:[#allocation19_spill] sm:$0xff] %v9373_v44  ;;  %v4451_v53 = vrot.slane %v4449_v29, 5  ;;  %v7713_v9 = vpop.eup %7712  ;;  %v4507_v27 = vshrl.u32 %v9384_v6, 16  ;;  %v4420_v60 = vsel %vm8457_vm4, %v4415_v55, %v4419_v37  ;;  %v4472_v29 = vrot.slane %v4470_v42, 4 }
 0x315   : > { %7010 = vmatmul.mubr.bf16.gmra.mrb[28].mxu1 %v7461_v58  ;;  %v4497_v58 = vshll.u32 %v4379_v43, 16  ;;  %v9401_v12 = vrot.slane %v4479_v15, 5  ;;  %v4485_v45 = vrot.slane %v4483_v3, 4  ;;  %v4462_v25 = vor.u32 %v4461_v57, %v9388_v26 }
 0x316   : > { %7013 = vmatprep.mubr.bf16.mxu1 %v7462_v33  ;;  %7030 = vmatpush3.bf16.msra.mxu1 %v7463_v22  ;;  %v4441_v22 = vshll.u32 %v9370_v39, 16  ;;  %v9390_v33 = vld [vmem:[#allocation2 + $0x38] sm:$0x1]  ;;  %v4452_v16 = vor.u32 %v4451_v53, %v4448_v62  ;;  %v4496_v56 = vrot.slane %v4494_v49, 4  ;;  %v4434_v46 = vsel %vm8457_vm4, %v4429_v59, %v9350_v41  ;;  %v9424_v41 = vld [vmem:[#allocation2 + $0x44] sm:$0x1] }
 0x317   : > { %7031 = vmatprep.subr.bf16.mxu1 %v7465_v23  ;;  %v4499_v43 = vrot.slane %v4497_v58, 5  ;;  %v9410_v55 = vrot.slane %v4503_v21, 5  ;;  %v9413_v62 = vmul.f32 %v7711_v8, %v9299_v0  ;;  %v9416_v53 = vmul.f32 %v7713_v9, %v9303_v5  ;;  %v9428_v8 = vld [vmem:[#allocation2 + $0x58] sm:$0xf]  ;;  %v4385_v5 = vld [vmem:[#allocation2 + $0x60] sm:$0xf] }
 0x318   : > { %v4443_v32 = vrot.slane %v4441_v22, 5  ;;  %v4509_v22 = vrot.slane %v4507_v27, 4  ;;  %v6277_v15 = vcombine.low %v4410_v63, %v4420_v60  ;;  %v4453_v3 = vrot.slane %v4452_v16, 4  ;;  %v9430_v49 = vld [vmem:[#allocation2 + $0x50] sm:$0x1] }
 0x319   : > { %10124 = vst [vmem:[#allocation20_spill] sm:$0xff] %v9413_v62  ;;  %10125 = vst [vmem:[#allocation21_spill] sm:$0xff] %v9416_v53  ;;  %v4486_v0 = vor.u32 %v4485_v45, %v9401_v12  ;;  %v4521_v59 = vshll.u32 %v4382_v34, 16  ;;  %v4527_v21 = vshll.u32 %v9428_v8, 16  ;;  %v4531_v27 = vshrl.u32 %v9428_v8, 16 }
 0x31a   : > { %7032 = vmatpush3.bf16.msra.mxu1 %v7465_v23  ;;  %v7715_v23 = vpop.eup %7714  ;;  %v4444_v37 = vsel %vm8457_vm4, %v4439_v13, %v4443_v32  ;;  %v4510_v58 = vor.u32 %v4509_v22, %v9410_v55  ;;  %v9434_v13 = vld [vmem:[#allocation2 + $0x64] sm:$0xf]  ;;  %v4545_v63 = vshll.u32 %v4385_v5, 16  ;;  %v4458_v60 = vsel %vm8457_vm4, %v4453_v3, %v9388_v26  ;;  %v7471_v3 = vld [vmem:[#allocation3 + $0x208] sm:$0xff]   ;;  %v9495_v53 = vld [vmem:[#allocation2 + $0x88] sm:$0xf] }
 0x31b   : > { %7033 = vmatprep.subr.bf16.mxu1 %v7467_v30  ;;  %v7717_v4 = vpop.eup %7716  ;;  %v6278_v9 = vcombine.low %v4434_v46, %v4444_v37  ;;  %v4487_v16 = vrot.slane %v4486_v0, 4  ;;  %v4523_v46 = vrot.slane %v4521_v59, 5  ;;  %v9446_v37 = vrot.slane %v4527_v21, 5  ;;  %v9464_v21 = vld [vmem:[#allocation2 + $0x70] sm:$0xf] }
 0x31c   : > { %v9422_v42 = vmul.f32 %v7717_v4, %v9319_v19  ;;  %v4500_v19 = vor.u32 %v4499_v43, %v4496_v56  ;;  %v4542_v4 = vshrl.u32 %v4385_v5, 16  ;;  %v4511_v43 = vrot.slane %v4510_v58, 4  ;;  %v4388_v58 = vld [vmem:[#allocation2 + $0x6c] sm:$0xf] }
 0x31d   : > { %7014 = vmatmul.mubr.bf16.gmra.mrb[32].mxu1 %v7464_v2  ;;  %v9419_v2 = vmul.f32 %v7715_v23, %v9310_v54  ;;  %v4463_v54 = vrot.slane %v4462_v25, 4  ;;  %v4518_v23 = vshrl.u32 %v4382_v34, 16  ;;  %v4551_v25 = vshll.u32 %v9434_v13, 16 }
 0x31e   : > { %7017 = vmatprep.mubr.bf16.mxu1 %v7466_v14  ;;  %7034 = vmatpush3.bf16.msra.mxu1 %v7467_v30  ;;  %v4465_v30 = vshll.u32 %v9390_v33, 16  ;;  %10127 = vst [vmem:[#allocation23_spill] sm:$0xff] %v9422_v42  ;;  %v4476_v14 = vor.u32 %v4475_v50, %v4472_v29  ;;  %v4513_v29 = vshll.u32 %v9430_v49, 16  ;;  %v4501_v45 = vrot.slane %v4500_v19, 4 }
 0x31f   : > { %7035 = vmatprep.subr.bf16.mxu1 %v7469_v36  ;;  %10126 = vst [vmem:[#allocation22_spill] sm:$0xff] %v9419_v2  ;;  %v4533_v22 = vrot.slane %v4531_v27, 4  ;;  %v4544_v26 = vrot.slane %v4542_v4, 4  ;;  %v4547_v34 = vrot.slane %v4545_v63, 5  ;;  %v9458_v19 = vrot.slane %v4551_v25, 5 }
 0x320   : > { %v4467_v57 = vrot.slane %v4465_v30, 5  ;;  %v4477_v32 = vrot.slane %v4476_v14, 4  ;;  %v4555_v30 = vshrl.u32 %v9434_v13, 16  ;;  %v4515_v5 = vrot.slane %v4513_v29, 5  ;;  %v7472_v29 = vld [vmem:[#allocation3 + $0x210] sm:$0xff]  }
 0x321   : > { %v4534_v4 = vor.u32 %v4533_v22, %v9446_v37  ;;  %v4579_v22 = vshrl.u32 %v9464_v21, 16 }
 0x322   : > { %7036 = vmatpush3.bf16.msra.mxu1 %v7469_v36  ;;  %v4489_v36 = vshll.u32 %v9424_v41, 16  ;;  %v4468_v50 = vsel %vm8457_vm4, %v4463_v54, %v4467_v57  ;;  %v4482_v14 = vsel %vm8457_vm4, %v4477_v32, %v9401_v12  ;;  %v9453_v54 = vld [vmem:[#allocation2 + $0x5c] sm:$0x1]  ;;  %v4506_v57 = vsel %vm8457_vm4, %v4501_v45, %v9410_v55  ;;  %v7473_v55 = vld [vmem:[#allocation3 + $0x218] sm:$0xff]  }
 0x323   : > { %7057 = vmatprep.subr.bf16.mxu1 %v9399_v48  ;;  %v4516_v12 = vsel %vm8457_vm4, %v4511_v43, %v4515_v5  ;;  %v4537_v63 = vshll.u32 %v9453_v54, 16  ;;  %v9473_v32 = vld [vmem:[#allocation2 + $0x7c] sm:$0xf]  ;;  %v4535_v62 = vrot.slane %v4534_v4, 4  ;;  %v4581_v31 = vrot.slane %v4579_v22, 4 }
 0x324   : > { %v4491_v56 = vrot.slane %v4489_v36, 5  ;;  %v4557_v36 = vrot.slane %v4555_v30, 4  ;;  %v4599_v5 = vshll.u32 %v9473_v32, 16  ;;  %v4623_v4 = vshll.u32 %v9495_v53, 16 }
 0x325   : > { %7018 = vmatmul.mubr.bf16.gmra.mrb[60].mxu1 %v7468_v20  ;;  %v4520_v20 = vrot.slane %v4518_v23, 4 }
 0x326   : > { %7037 = vmatprep.mubr.bf16.mxu1 %v6277_v15  ;;  %v6279_v15 = vcombine.low %v4458_v60, %v4468_v50  ;;  %v4492_v0 = vsel %vm8457_vm4, %v4487_v16, %v4491_v56  ;;  %v4391_v60 = vld [vmem:[#allocation2 + $0x78] sm:$0xf]  ;;  %v4566_v50 = vshrl.u32 %v4388_v58, 16  ;;  %v9485_v56 = vld [vmem:[#allocation2 + $0x68] sm:$0x1]  ;;  %v4558_v43 = vor.u32 %v4557_v36, %v9458_v19 }
 0x327   : > { %v4524_v59 = vor.u32 %v4523_v46, %v4520_v20  ;;  %v4569_v20 = vshll.u32 %v4388_v58, 16  ;;  %v4575_v46 = vshll.u32 %v9464_v21, 16  ;;  %v6280_v30 = vcombine.low %v4482_v14, %v4492_v0  ;;  %v4394_v58 = vld [vmem:[#allocation2 + $0x84] sm:$0xf] }
 0x328   : > { %v6281_v16 = vcombine.low %v4506_v57, %v4516_v12  ;;  %v4539_v36 = vrot.slane %v4537_v63, 5  ;;  %v4559_v42 = vrot.slane %v4558_v43, 4  ;;  %v4601_v0 = vrot.slane %v4599_v5, 5 }
 0x329   : > { %v4525_v27 = vrot.slane %v4524_v59, 4  ;;  %v4571_v51 = vrot.slane %v4569_v20, 5  ;;  %v4577_v44 = vrot.slane %v4575_v46, 5  ;;  %v4614_v12 = vshrl.u32 %v4394_v58, 16  ;;  %v9509_v20 = vld [vmem:[#allocation2 + $0x80] sm:$0x1] }
 0x32a   : > { %v4617_v59 = vshll.u32 %v4394_v58, 16  ;;  %v4627_v63 = vshrl.u32 %v9495_v53, 16  ;;  %v4625_v5 = vrot.slane %v4623_v4, 5  ;;  %v7475_v58 = vld [vmem:[#allocation3 + $0x228] sm:$0xff]  }
 0x32b   : > { %v9477_v45 = vpop.f32.mrb[20].mxu1  ;;  %v4582_v43 = vor.u32 %v4581_v31, %v4577_v44  ;;  %v9515_v31 = vld [vmem:[#allocation2 + $0x8c] sm:$0x1] }
 0x32d   : > { %7038 = vmatmul.mubr.bf16.vlgmr.msra.gmra.mrb[64].mxu1 %v6278_v9  ;;  %v4548_v9 = vor.u32 %v4547_v34, %v4544_v26  ;;  %v3165_v26 = vpop.f32.mrb[21].mxu1  ;;  %v4590_v34 = vshrl.u32 %v4391_v60, 16 }
 0x32e   : > { %7058 = vmatpush3.bf16.msra.mxu1 %v9399_v48  ;;  %7041 = vmatprep.mubr.bf16.mxu1 %v6279_v15  ;;  %v4593_v15 = vshll.u32 %v4391_v60, 16  ;;  %v4603_v48 = vshrl.u32 %v9473_v32, 16  ;;  %v9492_v25 = vpop.f32.mrb[22].mxu1  ;;  %v4561_v26 = vshll.u32 %v9485_v56, 16  ;;  %v4568_v60 = vrot.slane %v4566_v50, 4 }
 0x32f   : > { %7059 = vmatprep.subr.bf16.mxu1 %v7471_v3  ;;  %v3167_v23 = vpop.f32.mrb[23].mxu1  ;;  %v4549_v2 = vrot.slane %v4548_v9, 4  ;;  %v4530_v9 = vsel %vm8457_vm4, %v4525_v27, %v9446_v37  ;;  %v4616_v27 = vrot.slane %v4614_v12, 4 }
 0x330   : > { %v4595_v14 = vrot.slane %v4593_v15, 5  ;;  %v4605_v57 = vrot.slane %v4603_v48, 4  ;;  %v9497_v23 = vld [vmem:[#allocation2 + $0x74] sm:$0x1]  ;;  %v4563_v50 = vrot.slane %v4561_v26, 5  ;;  %v4540_v48 = vsel %vm8457_vm4, %v4535_v62, %v4539_v36 }
 0x331   : > { %v4585_v22 = vshll.u32 %v9497_v23, 16  ;;  %v4619_v15 = vrot.slane %v4617_v59, 5  ;;  %v4629_v62 = vrot.slane %v4627_v63, 4  ;;  %v6282_v36 = vcombine.low %v4530_v9, %v4540_v48  ;;  %v7476_v59 = vld [vmem:[#allocation3 + $0x230] sm:$0xff]  }
 0x332   : > { %7060 = vmatpush3.bf16.msra.mxu1 %v7471_v3  ;;  %v4592_v3 = vrot.slane %v4590_v34, 4  ;;  %v4564_v46 = vsel %vm8457_vm4, %v4559_v42, %v4563_v50  ;;  %v4606_v37 = vor.u32 %v4605_v57, %v4601_v0  ;;  %v4583_v26 = vrot.slane %v4582_v43, 4 }
 0x333   : > { %7061 = vmatprep.subr.bf16.mxu1 %v7472_v29  ;;  %v4633_v57 = vshll.u32 %v9515_v31, 16 }
 0x334   : > { %v4596_v34 = vor.u32 %v4595_v14, %v4592_v3  ;;  %v4620_v3 = vor.u32 %v4619_v15, %v4616_v27  ;;  %v4630_v14 = vor.u32 %v4629_v62, %v4625_v5  ;;  %v4912_v27 = vrot.slane %v9334_v40, 5  ;;  %v4869_v40 = vld [vmem:[#allocation2 + $0x30] sm:$0xe] }
 0x335   : > { %7042 = vmatmul.mubr.bf16.gmra.mrb[24].mxu1 %v6280_v30  ;;  %v7474_v30 = vld [vmem:[#allocation3 + $0x220] sm:$0xff]   ;;  %v4916_v15 = vrot.slane %v9332_v17, 5 }
 0x336   : > { %7045 = vmatprep.mubr.bf16.mxu1 %v6281_v16  ;;  %7062 = vmatpush3.bf16.msra.mxu1 %v7472_v29  ;;  %v4554_v16 = vsel %vm8457_vm4, %v4549_v2, %v9458_v19  ;;  %v4572_v29 = vor.u32 %v4571_v51, %v4568_v60  ;;  %v4609_v51 = vshll.u32 %v9509_v20, 16  ;;  %v4597_v42 = vrot.slane %v4596_v34, 4 }
 0x337   : > { %7063 = vmatprep.subr.bf16.mxu1 %v7473_v55  ;;  %v6283_v2 = vcombine.low %v4554_v16, %v4564_v46  ;;  %v4607_v60 = vrot.slane %v4606_v37, 4  ;;  %v4621_v48 = vrot.slane %v4620_v3, 4  ;;  %v4631_v16 = vrot.slane %v4630_v14, 4  ;;  %v7477_v46 = vld [vmem:[#allocation3 + $0x238] sm:$0xff]  }
 0x338   : > { %v4573_v19 = vrot.slane %v4572_v29, 4  ;;  %v4611_v12 = vrot.slane %v4609_v51, 5  ;;  %v4602_v9 = vsel %vm8457_vm4, %v4597_v42, %v4601_v0  ;;  %v4635_v29 = vrot.slane %v4633_v57, 5 }
 0x339   : > { %v4626_v0 = vsel %vm8457_vm4, %v4621_v48, %v4625_v5  ;;  %v6297_v3 = vrot.slane %v4869_v40, 9  ;;  %v4926_v14 = vrot.slane %v9390_v33, 5  ;;  %v4871_v48 = vld [vmem:[#allocation2 + $0x48] sm:$0xe] }
 0x33a   : > { %7064 = vmatpush3.bf16.msra.mxu1 %v7473_v55  ;;  %v4587_v55 = vrot.slane %v4585_v22, 5  ;;  %v4578_v4 = vsel %vm8457_vm4, %v4573_v19, %v4577_v44  ;;  %v4612_v50 = vsel %vm8457_vm4, %v4607_v60, %v4611_v12  ;;  %v4867_v44 = vld [vmem:[#allocation2 + $0x18] sm:$0xe]  ;;  %v4636_v37 = vsel %vm8457_vm4, %v4631_v16, %v4635_v29 }
 0x33b   : > { %7065 = vmatprep.subr.bf16.mxu1 %v7474_v30  ;;  %v6285_v22 = vcombine.low %v4602_v9, %v4612_v50  ;;  %v6286_v62 = vcombine.low %v4626_v0, %v4636_v37  ;;  %v4930_v12 = vrot.slane %v9380_v7, 5  ;;  %v4870_v50 = vld [vmem:[#allocation2 + $0x3c] sm:$0xe]  ;;  %v4933_v29 = vrot.slane %v9424_v41, 5 }
 0x33c   : > { %v4588_v63 = vsel %vm8457_vm4, %v4583_v26, %v4587_v55  ;;  %v4918_v26 = vrot.slane %v4916_v15, 4  ;;  %v6296_v55 = vrot.slane %v4868_v24, 9  ;;  %v6298_v7 = vrot.slane %v4870_v50, 9 }
 0x33d   : > { %7046 = vmatmul.mubr.bf16.gmra.mrb[28].mxu1 %v6282_v36  ;;  %v6284_v43 = vcombine.low %v4578_v4, %v4588_v63  ;;  %v4937_v4 = vrot.slane %v9384_v6, 5  ;;  %v4932_v33 = vrot.slane %v4930_v12, 4  ;;  %v4940_v6 = vrot.slane %v9430_v49, 5 }
 0x33e   : > { %7049 = vmatprep.mubr.bf16.mxu1 %v6283_v2  ;;  %7066 = vmatpush3.bf16.msra.mxu1 %v7474_v30  ;;  %v4909_v30 = vrot.slane %v9328_v11, 5  ;;  %v6295_v11 = vrot.slane %v4867_v44, 9  ;;  %v4917_v63 = vsel %vm9119_vm7, %v6296_v55, %v4916_v15  ;;  %v4931_v0 = vsel %vm9119_vm7, %v6298_v7, %v4930_v12  ;;  %v4873_v15 = vld [vmem:[#allocation2 + $0x60] sm:$0xe]  ;;  %v4875_v55 = vld [vmem:[#allocation2 + $0x78] sm:$0xe] }
 0x33f   : > { %7067 = vmatprep.subr.bf16.mxu1 %v7475_v58  ;;  %v4939_v16 = vrot.slane %v4937_v4, 4  ;;  %v4958_v24 = vrot.slane %v9464_v21, 5  ;;  %v4876_v12 = vld [vmem:[#allocation2 + $0x84] sm:$0xe]  ;;  %v4975_v50 = vrot.slane %v9515_v31, 5 }
 0x340   : > { %v4911_v34 = vrot.slane %v4909_v30, 4  ;;  %v4910_v5 = vsel %vm9119_vm7, %v6295_v11, %v4909_v30  ;;  %v4872_v11 = vld [vmem:[#allocation2 + $0x54] sm:$0xe] }
 0x341   : > { %v4941_v44 = vsel %vm9119_vm7, %v4939_v16, %v4940_v6 }
 0x342   : > { %7068 = vmatpush3.bf16.msra.mxu1 %v7475_v58  ;;  %v4913_v36 = vsel %vm9119_vm7, %v4911_v34, %v4912_v27  ;;  %v4923_v58 = vrot.slane %v9352_v47, 5  ;;  %v4919_v47 = vrot.slane %v9370_v39, 5  ;;  %v4951_v34 = vrot.slane %v9434_v13, 5 }
 0x343   : > { %7069 = vmatprep.subr.bf16.mxu1 %v7476_v59  ;;  %v6305_v19 = vcombine.low %v4910_v5, %v4913_v36  ;;  %v4947_v36 = vrot.slane %v9453_v54, 5  ;;  %v4954_v13 = vrot.slane %v9485_v56, 5  ;;  %v4960_v56 = vrot.slane %v4958_v24, 4 }
 0x344   : > { %v4925_v17 = vrot.slane %v4923_v58, 4  ;;  %v4920_v57 = vsel %vm9119_vm7, %v4918_v26, %v4919_v47  ;;  %v4924_v39 = vsel %vm9119_vm7, %v6297_v3, %v4923_v58  ;;  %v6301_v58 = vrot.slane %v4873_v15, 9 }
 0x345   : > { %7050 = vmatmul.mubr.bf16.gmra.mrb[32].mxu1 %v6284_v43  ;;  %v6306_v9 = vcombine.low %v4917_v63, %v4920_v57  ;;  %v6299_v43 = vrot.slane %v4871_v48, 9  ;;  %v4961_v3 = vrot.slane %v9497_v23, 5  ;;  %v4968_v57 = vrot.slane %v9509_v20, 5 }
 0x346   : > { %7053 = vmatprep.mubr.bf16.mxu1 %v6285_v22  ;;  %7070 = vmatpush3.bf16.msra.mxu1 %v7476_v59  ;;  %v4927_v59 = vsel %vm9119_vm7, %v4925_v17, %v4926_v14  ;;  %v4944_v22 = vrot.slane %v9428_v8, 5  ;;  %v6300_v8 = vrot.slane %v4872_v11, 9  ;;  %v4952_v54 = vsel %vm9119_vm7, %v6301_v58, %v4951_v34  ;;  %v4874_v17 = vld [vmem:[#allocation2 + $0x6c] sm:$0xe] }
 0x347   : > { %7071 = vmatprep.subr.bf16.mxu1 %v7477_v46  ;;  %v6307_v30 = vcombine.low %v4924_v39, %v4927_v59  ;;  %v4938_v41 = vsel %vm9119_vm7, %v6299_v43, %v4937_v4  ;;  %v6302_v21 = vrot.slane %v4874_v17, 9  ;;  %v4972_v14 = vrot.slane %v9495_v53, 5 }
 0x348   : > { %v6309_v27 = vcombine.low %v4938_v41, %v4941_v44  ;;  %v4946_v49 = vrot.slane %v4944_v22, 4  ;;  %v4945_v26 = vsel %vm9119_vm7, %v6300_v8, %v4944_v22  ;;  %v4962_v59 = vsel %vm9119_vm7, %v4960_v56, %v4961_v3 }
 0x349   : > { %v9536_v51 = vpop.f32.mrb[36].mxu0  ;;  %v4959_v63 = vsel %vm9119_vm7, %v6302_v21, %v4958_v24  ;;  %v4974_v39 = vrot.slane %v4972_v14, 4 }
 0x34a   : > { %7072 = vmatpush3.bf16.msra.mxu1 %v7477_v46  ;;  %v2361_v2 = vpop.f32.mrb[37].mxu0  ;;  %v4934_v46 = vsel %vm9119_vm7, %v4932_v33, %v4933_v29  ;;  %v4948_v5 = vsel %vm9119_vm7, %v4946_v49, %v4947_v36  ;;  %v6312_v23 = vcombine.low %v4959_v63, %v4962_v59 }
 0x34b   : > { %v9540_v42 = vpop.f32.mrb[38].mxu0  ;;  %v6308_v37 = vcombine.low %v4931_v0, %v4934_v46  ;;  %v6310_v40 = vcombine.low %v4945_v26, %v4948_v5  ;;  %v4976_v33 = vsel %vm9119_vm7, %v4974_v39, %v4975_v50 }
 0x34c   : > { %v2363_v60 = vpop.f32.mrb[39].mxu0 }
 0x34d   : > { %7054 = vmatmul.mubr.bf16.gmra.mrb[68].mxu1 %v6286_v62  ;;  %v4953_v62 = vrot.slane %v4951_v34, 4 }
 0x34e   : > { %7073 = vmatprep.mubr.bf16.mxu1 %v6305_v19  ;;  %v4965_v19 = vrot.slane %v9473_v32, 5  ;;  %v6303_v32 = vrot.slane %v4875_v55, 9 }
 0x34f   : > { %v4955_v2 = vsel %vm9119_vm7, %v4953_v62, %v4954_v13 }
 0x350   : > { %v6311_v60 = vcombine.low %v4952_v54, %v4955_v2  ;;  %v4967_v47 = vrot.slane %v4965_v19, 4  ;;  %v4966_v53 = vsel %vm9119_vm7, %v6303_v32, %v4965_v19 }
 0x352   : > { %v4969_v4 = vsel %vm9119_vm7, %v4967_v47, %v4968_v57 }
 0x355   : > { %7074 = vmatmul.mubr.bf16.vlgmr.msra.gmra.mrb[72].mxu1 %v6306_v9  ;;  %v6304_v9 = vrot.slane %v4876_v12, 9 }
 0x356   : > { %7077 = vmatprep.mubr.bf16.mxu1 %v6307_v30  ;;  %v6313_v30 = vcombine.low %v4966_v53, %v4969_v4 }
 0x357   : > { %v4973_v20 = vsel %vm9119_vm7, %v6304_v9, %v4972_v14 }
 0x358   : > { %v6314_v7 = vcombine.low %v4973_v20, %v4976_v33 }
 0x35d   : > { %7078 = vmatmul.mubr.bf16.gmra.mrb[24].mxu1 %v6308_v37 }
 0x35e   : > { %7081 = vmatprep.mubr.bf16.mxu1 %v6309_v27 }
 0x365   : > { %7082 = vmatmul.mubr.bf16.gmra.mrb[28].mxu1 %v6310_v40 }
 0x366   : > { %7085 = vmatprep.mubr.bf16.mxu1 %v6311_v60 }
 0x36d   : > { %7086 = vmatmul.mubr.bf16.gmra.mrb[32].mxu1 %v6312_v23 }
 0x36e   : > { %7089 = vmatprep.mubr.bf16.mxu1 %v6313_v30  ;;  %v6911_v48 = vpop.f32.mrb[36].mxu1 }
 0x36f   : > { %v9594_v16 = vpop.f32.mrb[37].mxu1 }
 0x370   : > { %v6912_v29 = vpop.f32.mrb[38].mxu1 }
 0x371   : > { %v9596_v43 = vpop.f32.mrb[39].mxu1 }
 0x375   : > { %7090 = vmatmul.mubr.bf16.gmra.mrb[76].mxu1 %v6314_v7 }
 0x381   : > { %v6803_v31 = vpop.f32.mrb[52].mxu0 }
 0x382   : > { %v2423_v6 = vpop.f32.mrb[53].mxu0 }
 0x383   : > { %v6804_v46 = vpop.f32.mrb[54].mxu0 }
 0x384   : > { %v2426_v22 = vpop.f32.mrb[55].mxu0 }
 0x385   : > { %v6931_v44 = vpop.f32.mrb[40].mxu1 }
 0x386   : > { %v3665_v34 = vpop.f32.mrb[41].mxu1 }
 0x387   : > { %v6932_v0 = vpop.f32.mrb[42].mxu1 }
 0x388   : > { %v3667_v37 = vpop.f32.mrb[43].mxu1 }
 0x389   : > { %v6823_v41 = vpop.f32.mrb[56].mxu0 }
 0x38a   : > { %v2585_v10 = vadd.f32 %v6823_v41, %v9536_v51  ;;  %v2578_v11 = vpop.f32.mrb[57].mxu0 }
 0x38b   : > { %v6824_v27 = vpop.f32.mrb[58].mxu0 }
 0x38c   : > { %v2588_v49 = vadd.f32 %v6824_v27, %v9540_v42  ;;  %v2580_v15 = vpop.f32.mrb[59].mxu0 }
 0x38d   : > { %v7480_v15 = vld [vmem:[%s9996_s11 + $0x10] sm:$0xff]  }
 0x3a8   : > { %v6947_v62 = vpop.f32.mrb[44].mxu1 }
 0x3a9   : > { %v3727_v8 = vpop.f32.mrb[45].mxu1  ;;  %v6839_v36 = vpop.f32.mrb[60].mxu0 }
 0x3aa   : > { %v6948_v58 = vpop.f32.mrb[46].mxu1  ;;  %v2640_v13 = vpop.f32.mrb[61].mxu0 }
 0x3ab   : > { %v3730_v5 = vpop.f32.mrb[47].mxu1  ;;  %v2641_v24 = vadd.f32 %v2640_v13, %v2423_v6  ;;  %v6840_v2 = vpop.f32.mrb[62].mxu0 }
 0x3ac   : > { %v2643_v19 = vpop.f32.mrb[63].mxu0 }
 0x3ad   : > { %v2644_v26 = vadd.f32 %v2643_v19, %v2426_v22 }
 0x3b0   : > { %v6967_v40 = vpop.f32.mrb[48].mxu1 }
 0x3b1   : > { %v4005_v54 = vpop.f32.mrb[49].mxu1 }
 0x3b2   : > { %v6968_v17 = vpop.f32.mrb[50].mxu1  ;;  %v6859_v60 = vpop.f32.mrb[64].mxu0  ;;  %v9655_v54 = vld [vmem:[%s9995_s10] sm:$0xff]  }
 0x3b3   : > { %v4007_v51 = vpop.f32.mrb[51].mxu1  ;;  %v2970_v56 = vadd.f32 %v6859_v60, %v2585_v10  ;;  %v2895_v55 = vpop.f32.mrb[65].mxu0  ;;  %v7479_v10 = vld [vmem:[%s9996_s11 + $0x8] sm:$0xff]  }
 0x3b4   : > { %v6860_v47 = vpop.f32.mrb[66].mxu0 }
 0x3b5   : > { %v3240_v42 = vadd.f32 %v9477_v45, %v2970_v56  ;;  %v2971_v21 = vadd.f32 %v6860_v47, %v2588_v49  ;;  %v2897_v3 = vpop.f32.mrb[67].mxu0 }
 0x3b7   : > { %v3241_v14 = vadd.f32 %v9492_v25, %v2971_v21  ;;  %v3740_v32 = vadd.f32 %v6931_v44, %v3240_v42  ;;  %v7478_v25 = vld [vmem:[%s9996_s11] sm:$0xff]  }
 0x3b8   : > { %7093 = vmatprep.subr.bf16.mxu0 %v7478_v25 }
 0x3b9   : > { %v4080_v57 = vadd.f32 %v6967_v40, %v3740_v32  ;;  %v3741_v12 = vadd.f32 %v6932_v0, %v3241_v14  ;;  %7094 = vmatpush3.bf16.msra.mxu0 %v7478_v25  ;;  %v7485_v40 = vld [vmem:[%s9996_s11 + $0x38] sm:$0xff]  }
 0x3ba   : > { %v9602_v59 = vpop.f32.mrb[40].mxu0  ;;  %7095 = vmatprep.subr.bf16.mxu0 %v7479_v10 }
 0x3bb   : > { %v9604_v4 = vpop.f32.mrb[41].mxu0  ;;  %v4081_v63 = vadd.f32 %v6968_v17, %v3741_v12 }
 0x3bc   : > { %v9606_v9 = vpop.f32.mrb[42].mxu0 }
 0x3bd   : > { %v9608_v39 = vpop.f32.mrb[43].mxu0  ;;  %7096 = vmatpush3.bf16.msra.mxu0 %v7479_v10 }
 0x3be   : > { %7097 = vmatprep.subr.bf16.mxu0 %v7480_v15 }
 0x3c1   : > { %7098 = vmatpush3.bf16.msra.mxu0 %v7480_v15 }
 0x3c2   : > { %v9610_v50 = vpop.f32.mrb[44].mxu0 }
 0x3c3   : > { %v9612_v23 = vpop.f32.mrb[45].mxu0 }
 0x3c4   : > { %v9614_v45 = vpop.f32.mrb[46].mxu0 }
 0x3c5   : > { %v9616_v53 = vpop.f32.mrb[47].mxu0 }
 0x3ca   : > { %v9621_v30 = vpop.f32.mrb[48].mxu0 }
 0x3cb   : > { %v9623_v20 = vpop.f32.mrb[49].mxu0 }
 0x3cc   : > { %v9625_v33 = vpop.f32.mrb[50].mxu0 }
 0x3cd   : > { %v9627_v48 = vpop.f32.mrb[51].mxu0 }
 0x3d0   : > { %v6983_v7 = vpop.f32.mrb[52].mxu1 }
 0x3d1   : > { %v4067_v29 = vpop.f32.mrb[53].mxu1 }
 0x3d2   : > { %v6984_v31 = vpop.f32.mrb[54].mxu1  ;;  %v6875_v6 = vpop.f32.mrb[68].mxu0 }
 0x3d3   : > { %v4070_v46 = vpop.f32.mrb[55].mxu1  ;;  %v2957_v22 = vpop.f32.mrb[69].mxu0  ;;  %v9665_v6 = vld [vmem:[%s9994_s9] ss:$0 sm:$0xff] }
 0x3d4   : > { %v2984_v44 = vadd.f32 %v2957_v22, %v2641_v24  ;;  %v6876_v34 = vpop.f32.mrb[70].mxu0  ;;  %v7481_v24 = vld [vmem:[%s9996_s11 + $0x18] sm:$0xff]  }
 0x3d5   : > { %v2960_v0 = vpop.f32.mrb[71].mxu0  ;;  %7099 = vmatprep.subr.bf16.mxu0 %v7481_v24 }
 0x3d6   : > { %v3254_v37 = vadd.f32 %v9594_v16, %v2984_v44  ;;  %v2985_v41 = vadd.f32 %v2960_v0, %v2644_v26  ;;  %7100 = vmatpush3.bf16.msra.mxu0 %v7481_v24  ;;  %v7483_v26 = vld [vmem:[%s9996_s11 + $0x28] sm:$0xff]  }
 0x3d8   : > { %v7003_v11 = vpop.f32.mrb[56].mxu1  ;;  %v3255_v27 = vadd.f32 %v9596_v43, %v2985_v41  ;;  %v3754_v49 = vadd.f32 %v3727_v8, %v3254_v37  ;;  %v7482_v8 = vld [vmem:[%s9996_s11 + $0x20] sm:$0xff]  }
 0x3d9   : > { %v4351_v62 = vadd.f32 %v7003_v11, %v4080_v57  ;;  %v4276_v36 = vpop.f32.mrb[57].mxu1  ;;  %7101 = vmatprep.subr.bf16.mxu0 %v7482_v8 }
 0x3da   : > { %v7004_v58 = vpop.f32.mrb[58].mxu1  ;;  %v4094_v13 = vadd.f32 %v4067_v29, %v3754_v49  ;;  %v3755_v16 = vadd.f32 %v3730_v5, %v3255_v27  ;;  %7102 = vmatpush3.bf16.msra.mxu0 %v7482_v8  ;;  %v7484_v5 = vld [vmem:[%s9996_s11 + $0x30] sm:$0xff]  }
 0x3db   : > { %v4352_v2 = vadd.f32 %v7004_v58, %v4081_v63  ;;  %v4278_v19 = vpop.f32.mrb[59].mxu1  ;;  %7103 = vmatprep.subr.bf16.mxu0 %v7483_v26 }
 0x3dc   : > { %v4095_v43 = vadd.f32 %v4070_v46, %v3755_v16 }
 0x3de   : > { %7104 = vmatpush3.bf16.msra.mxu0 %v7483_v26 }
 0x3df   : > { %7105 = vmatprep.subr.bf16.mxu0 %v7484_v5 }
 0x3e2   : > { %7106 = vmatpush3.bf16.msra.mxu0 %v7484_v5 }
 0x3e3   : > { %7107 = vmatprep.subr.bf16.mxu0 %v7485_v40 }
 0x3e6   : > { %7108 = vmatpush3.bf16.msra.mxu0 %v7485_v40 }
 0x3e7   : > { %7125 = vmatprep.subr.bf16.mxu0 %v9655_v54 }
 0x3f8   : > { %v7019_v17 = vpop.f32.mrb[60].mxu1 }
 0x3f9   : > { %v4338_v60 = vpop.f32.mrb[61].mxu1 }
 0x3fa   : > { %v4365_v51 = vadd.f32 %v4338_v60, %v4094_v13  ;;  %v7020_v56 = vpop.f32.mrb[62].mxu1 }
 0x3fb   : > { %v4341_v55 = vpop.f32.mrb[63].mxu1 }
 0x3fc   : > { %v4366_v47 = vadd.f32 %v4341_v55, %v4095_v43 }
 0x400   : > { %v7039_v42 = vpop.f32.mrb[64].mxu1 }
 0x401   : > { %v4851_v21 = vadd.f32 %v7039_v42, %v4351_v62  ;;  %v4776_v3 = vpop.f32.mrb[65].mxu1 }
 0x402   : > { %v7040_v14 = vpop.f32.mrb[66].mxu1 }
 0x403   : > { %v4852_v32 = vadd.f32 %v7040_v14, %v4352_v2  ;;  %v4778_v57 = vpop.f32.mrb[67].mxu1 }
 0x420   : > { %v7055_v12 = vpop.f32.mrb[68].mxu1 }
 0x421   : > { %v4838_v63 = vpop.f32.mrb[69].mxu1 }
 0x422   : > { %v9658_v25 = vadd.f32 %v4838_v63, %v4365_v51  ;;  %v7056_v7 = vpop.f32.mrb[70].mxu1 }
 0x423   : > { %v4841_v29 = vpop.f32.mrb[71].mxu1 }
 0x424   : > { %v9660_v31 = vadd.f32 %v4841_v29, %v4366_v47 }
 0x428   : > { %v7075_v46 = vpop.f32.mrb[72].mxu1 }
 0x429   : > { %v5191_v22 = vadd.f32 %v7075_v46, %v4851_v21  ;;  %v5116_v44 = vpop.f32.mrb[73].mxu1 }
 0x42a   : > { %v7076_v34 = vpop.f32.mrb[74].mxu1 }
 0x42b   : > { %v9668_v0 = vadd.f32 %v9665_v6, %v5191_v22  ;;  %v5192_v37 = vadd.f32 %v7076_v34, %v4852_v32  ;;  %v5118_v41 = vpop.f32.mrb[75].mxu1 }
 0x42d   : > { %v6324_v10 = vmul.f32 -1.442695, %v9668_v0  ;;  %v9672_v11 = vadd.f32 %v9665_v6, %v5192_v37 }
 0x42f   : > { %7718 = vpow2.f32 %v6324_v10  ;;  %v6325_v27 = vmul.f32 -1.442695, %v9672_v11 }
 0x430   : > { %v7079_v49 = vpop.f32.mrb[24].mxu1 }
 0x431   : > { %7720 = vpow2.f32 %v6325_v27  ;;  %v7157_v15 = vadd.f32 %v7079_v49, %v9602_v59  ;;  %v5130_v62 = vpop.f32.mrb[25].mxu1 }
 0x432   : > { %v7158_v36 = vadd.f32 %v5130_v62, %v9604_v4  ;;  %v7080_v58 = vpop.f32.mrb[26].mxu1 }
 0x433   : > { %v9678_v13 = vadd.f32 %v7157_v15, %v9665_v6  ;;  %v7159_v16 = vadd.f32 %v7080_v58, %v9606_v9  ;;  %v5133_v24 = vpop.f32.mrb[27].mxu1 }
 0x434   : > { %v9682_v2 = vadd.f32 %v7158_v36, %v9665_v6  ;;  %v7160_v19 = vadd.f32 %v5133_v24, %v9608_v39 }
 0x435   : > { %v6328_v43 = vmul.f32 -1.442695, %v9678_v13  ;;  %v9687_v8 = vadd.f32 %v7159_v16, %v9665_v6 }
 0x436   : > { %v6326_v59 = vmul.f32 -1.442695, %v9682_v2  ;;  %v9691_v4 = vadd.f32 %v7160_v19, %v9665_v6 }
 0x437   : > { %7722 = vpow2.f32 %v6328_v43  ;;  %v6329_v26 = vmul.f32 -1.442695, %v9687_v8 }
 0x438   : > { %7724 = vpow2.f32 %v6326_v59  ;;  %v6327_v9 = vmul.f32 -1.442695, %v9691_v4  ;;  %v7083_v5 = vpop.f32.mrb[28].mxu1 }
 0x439   : > { %v7719_v40 = vpop.eup %7718  ;;  %7726 = vpow2.f32 %v6329_v26  ;;  %v7161_v39 = vadd.f32 %v7083_v5, %v9610_v50  ;;  %v5146_v17 = vpop.f32.mrb[29].mxu1 }
 0x43a   : > { %v5277_v60 = vadd.f32 1.0, %v7719_v40  ;;  %7728 = vpow2.f32 %v6327_v9  ;;  %v7162_v51 = vadd.f32 %v5146_v17, %v9612_v23  ;;  %v7084_v56 = vpop.f32.mrb[30].mxu1 }
 0x43b   : > { %v7721_v55 = vpop.eup %7720  ;;  %v9698_v47 = vadd.f32 %v7161_v39, %v9665_v6  ;;  %v7163_v42 = vadd.f32 %v7084_v56, %v9614_v45  ;;  %v5149_v21 = vpop.f32.mrb[31].mxu1 }
 0x43c   : > { %7730 = vrcp.f32 %v5277_v60  ;;  %v5278_v3 = vadd.f32 1.0, %v7721_v55  ;;  %v9702_v14 = vadd.f32 %v7162_v51, %v9665_v6  ;;  %v7164_v50 = vadd.f32 %v5149_v21, %v9616_v53 }
 0x43d   : > { %v6332_v32 = vmul.f32 -1.442695, %v9698_v47  ;;  %v9707_v57 = vadd.f32 %v7163_v42, %v9665_v6 }
 0x43e   : > { %7732 = vrcp.f32 %v5278_v3  ;;  %v6330_v23 = vmul.f32 -1.442695, %v9702_v14  ;;  %v9711_v12 = vadd.f32 %v7164_v50, %v9665_v6  ;;  %v10128_v3 = vld [vmem:[#allocation26_spill] sm:$0xff] }
 0x43f   : > { %7734 = vpow2.f32 %v6332_v32  ;;  %v6333_v45 = vmul.f32 -1.442695, %v9707_v57  ;;  %v10129_v32 = vld [vmem:[#allocation27_spill] sm:$0xff] }
 0x440   : > { %7736 = vpow2.f32 %v6330_v23  ;;  %v6331_v63 = vmul.f32 -1.442695, %v9711_v12  ;;  %v7087_v7 = vpop.f32.mrb[32].mxu1 }
 0x441   : > { %v7723_v29 = vpop.eup %7722  ;;  %7738 = vpow2.f32 %v6333_v45  ;;  %v7165_v53 = vadd.f32 %v7087_v7, %v9621_v30  ;;  %v5162_v46 = vpop.f32.mrb[33].mxu1 }
 0x442   : > { %v7725_v22 = vpop.eup %7724  ;;  %v5281_v44 = vadd.f32 1.0, %v7723_v29  ;;  %7740 = vpow2.f32 %v6331_v63  ;;  %v7166_v34 = vadd.f32 %v5162_v46, %v9623_v20  ;;  %v7088_v37 = vpop.f32.mrb[34].mxu1 }
 0x443   : > { %v7727_v41 = vpop.eup %7726  ;;  %v5279_v10 = vadd.f32 1.0, %v7725_v22  ;;  %v9718_v27 = vadd.f32 %v7165_v53, %v9665_v6  ;;  %v7167_v49 = vadd.f32 %v7088_v37, %v9625_v33  ;;  %v5165_v15 = vpop.f32.mrb[35].mxu1 }
 0x444   : > { %v7729_v62 = vpop.eup %7728  ;;  %7742 = vrcp.f32 %v5281_v44  ;;  %v5282_v36 = vadd.f32 1.0, %v7727_v41  ;;  %v9722_v30 = vadd.f32 %v7166_v34, %v9665_v6  ;;  %v7168_v58 = vadd.f32 %v5165_v15, %v9627_v48 }
 0x445   : > { %7744 = vrcp.f32 %v5279_v10  ;;  %v5280_v16 = vadd.f32 1.0, %v7729_v62  ;;  %v6336_v20 = vmul.f32 -1.442695, %v9718_v27  ;;  %v9727_v24 = vadd.f32 %v7167_v49, %v9665_v6 }
 0x446   : > { %v7731_v19 = vpop.eup %7730  ;;  %7746 = vrcp.f32 %v5282_v36  ;;  %v6334_v33 = vmul.f32 -1.442695, %v9722_v30  ;;  %v9731_v43 = vadd.f32 %v7168_v58, %v9665_v6  ;;  %v10130_v58 = vld [vmem:[#allocation31_spill] sm:$0xff] }
 0x447   : > { %v5325_v59 = vmul.f32 %v7731_v19, %v9668_v0  ;;  %7748 = vrcp.f32 %v5280_v16  ;;  %v6337_v26 = vmul.f32 -1.442695, %v9727_v24 }
 0x448   : > { %v7733_v48 = vpop.eup %7732  ;;  %7750 = vpow2.f32 %v6336_v20  ;;  %v6335_v9 = vmul.f32 -1.442695, %v9731_v43  ;;  %v7091_v5 = vpop.f32.mrb[76].mxu1 }
 0x449   : > { %v7735_v40 = vpop.eup %7734  ;;  %v5326_v39 = vmul.f32 %v7733_v48, %v9672_v11  ;;  %7752 = vpow2.f32 %v6334_v33  ;;  %v5178_v17 = vpop.f32.mrb[77].mxu1  ;;  %v5341_v50 = vadd.f32 %v5325_v59, %v10128_v3  ;;  %v10132_v33 = vld [vmem:[#allocation29_spill] sm:$0xff] }
 0x44a   : > { %v7737_v60 = vpop.eup %7736  ;;  %v5285_v51 = vadd.f32 1.0, %v7735_v40  ;;  %7754 = vpow2.f32 %v6337_v26  ;;  %v5205_v56 = vadd.f32 %v5178_v17, %v9658_v25  ;;  %v7092_v55 = vpop.f32.mrb[78].mxu1  ;;  %v7487_v17 = vld [vmem:[%s9995_s10 + $0x8] sm:$0xff]  }
 0x44b   : > { %v7739_v0 = vpop.eup %7738  ;;  %v5283_v42 = vadd.f32 1.0, %v7737_v60  ;;  %7756 = vpow2.f32 %v6335_v9  ;;  %v5181_v21 = vpop.f32.mrb[79].mxu1  ;;  %v5342_v23 = vadd.f32 %v5326_v39, %v10129_v32  ;;  %v10134_v32 = vld [vmem:[#allocation35_spill] sm:$0xff] }
 0x44c   : > { %v7741_v45 = vpop.eup %7740  ;;  %7758 = vrcp.f32 %v5285_v51  ;;  %v5286_v63 = vadd.f32 1.0, %v7739_v0  ;;  %v9741_v11 = vadd.f32 %v9665_v6, %v5205_v56  ;;  %v5206_v7 = vadd.f32 %v5181_v21, %v9660_v31 }
 0x44d   : > { %7760 = vrcp.f32 %v5283_v42  ;;  %v5284_v29 = vadd.f32 1.0, %v7741_v45  ;;  %v5357_v25 = vpack.c.bf16 %v5342_v23, %v5341_v50 }
 0x44e   : > { %v7743_v53 = vpop.eup %7742  ;;  %7762 = vrcp.f32 %v5286_v63  ;;  %v6338_v46 = vmul.f32 -1.442695, %v9741_v11  ;;  %v9746_v22 = vadd.f32 %v9665_v6, %v5206_v7  ;;  %v10136_v7 = vld [vmem:[#allocation33_spill] sm:$0xff] }
 0x44f   : > { %v7745_v44 = vpop.eup %7744  ;;  %v5329_v34 = vmul.f32 %v7743_v53, %v9678_v13  ;;  %7764 = vrcp.f32 %v5284_v29  ;;  %7109 = vmatprep.mubr.bf16.mxu0 %v5357_v25  ;;  %v10131_v13 = vld [vmem:[#allocation28_spill] sm:$0xff] }
 0x450   : > { %v7747_v37 = vpop.eup %7746  ;;  %v5327_v41 = vmul.f32 %v7745_v44, %v9682_v2  ;;  %7766 = vpow2.f32 %v6338_v46  ;;  %v6339_v31 = vmul.f32 -1.442695, %v9746_v22  ;;  %v10133_v2 = vld [vmem:[#allocation30_spill] sm:$0xff] }
 0x451   : > { %v7749_v10 = vpop.eup %7748  ;;  %v5330_v49 = vmul.f32 %v7747_v37, %v9687_v8  ;;  %v5345_v16 = vadd.f32 %v5329_v34, %v10130_v58  ;;  %v7489_v46 = vld [vmem:[%s9995_s10 + $0x18] sm:$0xff]   ;;  %v10139_v58 = vld [vmem:[#allocation36_spill] sm:$0xff] }
 0x452   : > { %v7751_v15 = vpop.eup %7750  ;;  %v5328_v62 = vmul.f32 %v7749_v10, %v9691_v4  ;;  %7768 = vpow2.f32 %v6339_v31  ;;  %v5343_v59 = vadd.f32 %v5327_v41, %v10132_v33 }
 0x453   : > { %v7753_v6 = vpop.eup %7752  ;;  %v5289_v36 = vadd.f32 1.0, %v7751_v15  ;;  %v5346_v20 = vadd.f32 %v5330_v49, %v10131_v13  ;;  %v7490_v15 = vld [vmem:[%s9995_s10 + $0x20] sm:$0xff]  }
 0x454   : > { %v7755_v19 = vpop.eup %7754  ;;  %v5344_v26 = vadd.f32 %v5328_v62, %v10133_v2  ;;  %v5287_v48 = vadd.f32 1.0, %v7753_v6  ;;  %v10138_v6 = vld [vmem:[#allocation40_spill] sm:$0xff] }
 0x455   : > { %v7757_v9 = vpop.eup %7756  ;;  %7770 = vrcp.f32 %v5289_v36  ;;  %v5290_v5 = vadd.f32 1.0, %v7755_v19  ;;  %v5359_v8 = vpack.c.bf16 %v5346_v20, %v5345_v16  ;;  %v10140_v16 = vld [vmem:[#allocation37_spill] sm:$0xff] }
 0x456   : > { %v7759_v40 = vpop.eup %7758  ;;  %v5358_v39 = vpack.c.bf16 %v5344_v26, %v5343_v59  ;;  %7772 = vrcp.f32 %v5287_v48  ;;  %v5288_v4 = vadd.f32 1.0, %v7757_v9  ;;  %v7491_v59 = vld [vmem:[%s9995_s10 + $0x28] sm:$0xff]   ;;  %v7492_v48 = vld [vmem:[%s9995_s10 + $0x30] sm:$0xff]   ;;  %v10142_v9 = vld [vmem:[#allocation42_spill] sm:$0xff] }
 0x457   : > { %v7761_v60 = vpop.eup %7760  ;;  %v5333_v51 = vmul.f32 %v7759_v40, %v9698_v47  ;;  %7774 = vrcp.f32 %v5290_v5  ;;  %v7488_v47 = vld [vmem:[%s9995_s10 + $0x10] sm:$0xff]  }
 0x458   : > { %v7763_v56 = vpop.eup %7762  ;;  %v5331_v55 = vmul.f32 %v7761_v60, %v9702_v14  ;;  %7776 = vrcp.f32 %v5288_v4  ;;  %7110 = vmatmul.mubr.bf16.vlgmr.msra.gmra.mrb[72].mxu0 %v5358_v39  ;;  %v10135_v14 = vld [vmem:[#allocation32_spill] sm:$0xff]  ;;  %v10145_v4 = vld [vmem:[#allocation41_spill] sm:$0xff] }
 0x459   : > { %v7765_v0 = vpop.eup %7764  ;;  %v5334_v42 = vmul.f32 %v7763_v56, %v9707_v57  ;;  %7126 = vmatpush3.bf16.msra.mxu0 %v9655_v54  ;;  %7113 = vmatprep.mubr.bf16.mxu0 %v5359_v8  ;;  %v5349_v23 = vadd.f32 %v5333_v51, %v10134_v32  ;;  %v10137_v57 = vld [vmem:[#allocation34_spill] sm:$0xff]  ;;  %v10143_v8 = vld [vmem:[#allocation43_spill] sm:$0xff]  ;;  %v10148_v51 = vpack.c.bf16 %v9362_v52, %v9355_v38  ;;  %v10159_v32 = vld [vmem:[#allocation20_spill] sm:$0xff] }
 0x45a   : > { %v7767_v21 = vpop.eup %7766  ;;  %v5332_v3 = vmul.f32 %v7765_v0, %v9711_v12  ;;  %7127 = vmatprep.subr.bf16.mxu0 %v7487_v17  ;;  %v5347_v29 = vadd.f32 %v5331_v55, %v10136_v7  ;;  %v10149_v56 = vpack.c.bf16 %v9359_v18, %v9347_v35  ;;  %v10150_v55 = vld [vmem:[#allocation18_spill] sm:$0xff]  ;;  %v9826_v35 = vld [vmem:[%s9997_s12] ss:$0 sm:$0xff] }
 0x45b   : > { %v5291_v50 = vadd.f32 1.0, %v7767_v21  ;;  %v5350_v45 = vadd.f32 %v5334_v42, %v10135_v14  ;;  %v10151_v0 = vpack.c.bf16 %v9376_v61, %v10150_v55  ;;  %v10155_v21 = vld [vmem:[#allocation23_spill] sm:$0xff] }
 0x45c   : > { %v7769_v63 = vpop.eup %7768  ;;  %v5348_v25 = vadd.f32 %v5332_v3, %v10137_v57  ;;  %v10156_v3 = vld [vmem:[#allocation21_spill] sm:$0xff] }
 0x45d   : > { %7778 = vrcp.f32 %v5291_v50  ;;  %v5292_v54 = vadd.f32 1.0, %v7769_v63  ;;  %7128 = vmatpush3.bf16.msra.mxu0 %v7487_v17  ;;  %v5361_v53 = vpack.c.bf16 %v5350_v45, %v5349_v23  ;;  %v10146_v17 = vld [vmem:[#allocation39_spill] sm:$0xff]  ;;  %v10158_v50 = vld [vmem:[#allocation22_spill] sm:$0xff] }
 0x45e   : > { %7129 = vmatprep.subr.bf16.mxu0 %v7488_v47  ;;  %v5360_v12 = vpack.c.bf16 %v5348_v25, %v5347_v29  ;;  %v10147_v60 = vpack.c.bf16 %v10145_v4, %v10146_v17  ;;  %v10160_v38 = vpack.c.bf16 %v10158_v50, %v10159_v32 }
 0x45f   : > { %v7771_v44 = vpop.eup %7770  ;;  %7780 = vrcp.f32 %v5292_v54 }
 0x460   : > { %v7773_v34 = vpop.eup %7772  ;;  %v5337_v37 = vmul.f32 %v7771_v44, %v9718_v27  ;;  %7114 = vmatmul.mubr.bf16.gmra.mrb[76].mxu0 %v5360_v12 }
 0x461   : > { %v7775_v41 = vpop.eup %7774  ;;  %v5335_v31 = vmul.f32 %v7773_v34, %v9722_v30  ;;  %7130 = vmatpush3.bf16.msra.mxu0 %v7488_v47  ;;  %7117 = vmatprep.mubr.bf16.mxu0 %v5361_v53  ;;  %v10141_v30 = vld [vmem:[#allocation38_spill] sm:$0xff]  ;;  %v10157_v47 = vpack.c.bf16 %v10155_v21, %v10156_v3 }
 0x462   : > { %v7777_v10 = vpop.eup %7776  ;;  %v5338_v49 = vmul.f32 %v7775_v41, %v9727_v24  ;;  %7131 = vmatprep.subr.bf16.mxu0 %v7489_v46  ;;  %v5353_v36 = vadd.f32 %v5337_v37, %v10138_v6 }
 0x463   : > { %v5336_v62 = vmul.f32 %v7777_v10, %v9731_v43  ;;  %v5351_v13 = vadd.f32 %v5335_v31, %v10140_v16 }
 0x464   : > { %v5354_v27 = vadd.f32 %v5338_v49, %v10139_v58 }
 0x465   : > { %7132 = vmatpush3.bf16.msra.mxu0 %v7489_v46  ;;  %v5352_v20 = vadd.f32 %v5336_v62, %v10141_v30 }
 0x466   : > { %7133 = vmatprep.subr.bf16.mxu0 %v7490_v15  ;;  %v5363_v19 = vpack.c.bf16 %v5354_v27, %v5353_v36 }
 0x467   : > { %v7779_v33 = vpop.eup %7778  ;;  %v5362_v24 = vpack.c.bf16 %v5352_v20, %v5351_v13 }
 0x468   : > { %v5339_v2 = vmul.f32 %v7779_v33, %v9741_v11  ;;  %v7493_v11 = vld [vmem:[%s9995_s10 + $0x38] sm:$0xff]  }
 0x469   : > { %v7781_v43 = vpop.eup %7780  ;;  %7118 = vmatmul.mubr.bf16.gmra.mrb[80].mxu0 %v5362_v24 }
 0x46a   : > { %v5340_v26 = vmul.f32 %v7781_v43, %v9746_v22  ;;  %7134 = vmatpush3.bf16.msra.mxu0 %v7490_v15  ;;  %7121 = vmatprep.mubr.bf16.mxu0 %v5363_v19  ;;  %v5355_v5 = vadd.f32 %v5339_v2, %v10142_v9  ;;  %v10144_v22 = vpack.c.bf16 %v9344_v1, %v9341_v28  ;;  %v10152_v28 = vld [vmem:[#allocation19_spill] sm:$0xff]  ;;  %v10153_v1 = vld [vmem:[#allocation17_spill] sm:$0xff] }
 0x46b   : > { %7135 = vmatprep.subr.bf16.mxu0 %v7491_v59  ;;  %v10154_v42 = vpack.c.bf16 %v10152_v28, %v10153_v1 }
 0x46c   : > { %v5356_v40 = vadd.f32 %v5340_v26, %v10143_v8 }
 0x46e   : > { %7136 = vmatpush3.bf16.msra.mxu0 %v7491_v59  ;;  %v5364_v39 = vpack.c.bf16 %v5356_v40, %v5355_v5 }
 0x46f   : > { %7137 = vmatprep.subr.bf16.mxu0 %v7492_v48 }
 0x471   : > { %7122 = vmatmul.mubr.bf16.gmra.mrb[84].mxu0 %v5364_v39 }
 0x472   : > { %7138 = vmatpush3.bf16.msra.mxu0 %v7492_v48  ;;  %7141 = vmatprep.mubr.bf16.mxu0 %v10144_v22 }
 0x473   : > { %7139 = vmatprep.subr.bf16.mxu0 %v7493_v11 }
 0x476   : > { %7140 = vmatpush3.bf16.msra.mxu0 %v7493_v11 }
 0x479   : > { %7142 = vmatmul.mubr.bf16.vlgmr.msra.gmra.mrb[72].mxu0 %v10147_v60 }
 0x47a   : > { %7145 = vmatprep.mubr.bf16.mxu0 %v10148_v51 }
 0x481   : > { %7146 = vmatmul.mubr.bf16.gmra.mrb[76].mxu0 %v10149_v56 }
 0x482   : > { %7149 = vmatprep.mubr.bf16.mxu0 %v10151_v0 }
 0x489   : > { %7150 = vmatmul.mubr.bf16.gmra.mrb[80].mxu0 %v10154_v42 }
 0x48a   : > { %7153 = vmatprep.mubr.bf16.mxu0 %v10157_v47 }
 0x491   : > { %7154 = vmatmul.mubr.bf16.gmra.mrb[84].mxu0 %v10160_v38 }
 0x54c   : > { %v7143_v18 = vpop.f32.mrb[72].mxu0 }
 0x54d   : > { %v9829_v52 = vadd.f32 %v7143_v18, %v9826_v35  ;;  %v5592_v61 = vpop.f32.mrb[73].mxu0 }
 0x54e   : > { %v9832_v23 = vadd.f32 %v9826_v35, %v5592_v61  ;;  %v7144_v14 = vpop.f32.mrb[74].mxu0 }
 0x54f   : > { %v6359_v45 = vmul.f32 -1.442695, %v9829_v52  ;;  %v9836_v63 = vadd.f32 %v7144_v14, %v9826_v35  ;;  %v5595_v7 = vpop.f32.mrb[75].mxu0 }
 0x550   : > { %v6357_v29 = vmul.f32 -1.442695, %v9832_v23  ;;  %v9840_v57 = vadd.f32 %v9826_v35, %v5595_v7 }
 0x551   : > { %7782 = vpow2.f32 %v6359_v45  ;;  %v6360_v25 = vmul.f32 -1.442695, %v9836_v63 }
 0x552   : > { %7784 = vpow2.f32 %v6357_v29  ;;  %v6358_v54 = vmul.f32 -1.442695, %v9840_v57 }
 0x553   : > { %7786 = vpow2.f32 %v6360_v25 }
 0x554   : > { %7788 = vpow2.f32 %v6358_v54  ;;  %v7147_v53 = vpop.f32.mrb[76].mxu0 }
 0x555   : > { %v9845_v12 = vadd.f32 %v7147_v53, %v9826_v35  ;;  %v5608_v46 = vpop.f32.mrb[77].mxu0 }
 0x556   : > { %v9848_v44 = vadd.f32 %v9826_v35, %v5608_v46  ;;  %v7148_v34 = vpop.f32.mrb[78].mxu0 }
 0x557   : > { %v6363_v37 = vmul.f32 -1.442695, %v9845_v12  ;;  %v9852_v41 = vadd.f32 %v7148_v34, %v9826_v35  ;;  %v5611_v31 = vpop.f32.mrb[79].mxu0 }
 0x558   : > { %v6361_v10 = vmul.f32 -1.442695, %v9848_v44  ;;  %v9856_v49 = vadd.f32 %v9826_v35, %v5611_v31 }
 0x559   : > { %7790 = vpow2.f32 %v6363_v37  ;;  %v6364_v15 = vmul.f32 -1.442695, %v9852_v41 }
 0x55a   : > { %7792 = vpow2.f32 %v6361_v10  ;;  %v6362_v62 = vmul.f32 -1.442695, %v9856_v49 }
 0x55b   : > { %v7783_v6 = vpop.eup %7782  ;;  %7794 = vpow2.f32 %v6364_v15 }
 0x55c   : > { %v7785_v36 = vpop.eup %7784  ;;  %v5727_v58 = vadd.f32 1.0, %v7783_v6  ;;  %7796 = vpow2.f32 %v6362_v62  ;;  %v7151_v27 = vpop.f32.mrb[80].mxu0 }
 0x55d   : > { %v7787_v16 = vpop.eup %7786  ;;  %v5725_v13 = vadd.f32 1.0, %v7785_v36  ;;  %v9861_v30 = vadd.f32 %v7151_v27, %v9826_v35  ;;  %v5624_v20 = vpop.f32.mrb[81].mxu0 }
 0x55e   : > { %v7789_v19 = vpop.eup %7788  ;;  %7798 = vrcp.f32 %v5727_v58  ;;  %v5728_v33 = vadd.f32 1.0, %v7787_v16  ;;  %v9864_v24 = vadd.f32 %v9826_v35, %v5624_v20  ;;  %v7152_v59 = vpop.f32.mrb[82].mxu0 }
 0x55f   : > { %7800 = vrcp.f32 %v5725_v13  ;;  %v5726_v2 = vadd.f32 1.0, %v7789_v19  ;;  %v6367_v43 = vmul.f32 -1.442695, %v9861_v30  ;;  %v9868_v26 = vadd.f32 %v7152_v59, %v9826_v35  ;;  %v5627_v48 = vpop.f32.mrb[83].mxu0 }
 0x560   : > { %7802 = vrcp.f32 %v5728_v33  ;;  %v6365_v9 = vmul.f32 -1.442695, %v9864_v24  ;;  %v9872_v5 = vadd.f32 %v9826_v35, %v5627_v48 }
 0x561   : > { %7804 = vrcp.f32 %v5726_v2  ;;  %v6368_v8 = vmul.f32 -1.442695, %v9868_v26 }
 0x562   : > { %7806 = vpow2.f32 %v6367_v43  ;;  %v6366_v40 = vmul.f32 -1.442695, %v9872_v5 }
 0x563   : > { %v7791_v39 = vpop.eup %7790  ;;  %7808 = vpow2.f32 %v6365_v9 }
 0x564   : > { %v7793_v11 = vpop.eup %7792  ;;  %v5731_v22 = vadd.f32 1.0, %v7791_v39  ;;  %7810 = vpow2.f32 %v6368_v8  ;;  %v7155_v4 = vpop.f32.mrb[84].mxu0 }
 0x565   : > { %v7795_v17 = vpop.eup %7794  ;;  %v5729_v60 = vadd.f32 1.0, %v7793_v11  ;;  %7812 = vpow2.f32 %v6366_v40  ;;  %v9877_v51 = vadd.f32 %v7155_v4, %v9826_v35  ;;  %v5640_v56 = vpop.f32.mrb[85].mxu0 }
 0x566   : > { %v7797_v55 = vpop.eup %7796  ;;  %7814 = vrcp.f32 %v5731_v22  ;;  %v5732_v0 = vadd.f32 1.0, %v7795_v17  ;;  %v9881_v28 = vadd.f32 %v9826_v35, %v5640_v56  ;;  %v7156_v1 = vpop.f32.mrb[86].mxu0 }
 0x567   : > { %7816 = vrcp.f32 %v5729_v60  ;;  %v5730_v42 = vadd.f32 1.0, %v7797_v55  ;;  %v6371_v21 = vmul.f32 -1.442695, %v9877_v51  ;;  %v9885_v3 = vadd.f32 %v7156_v1, %v9826_v35  ;;  %v5643_v47 = vpop.f32.mrb[87].mxu0 }
 0x568   : > { %v7799_v50 = vpop.eup %7798  ;;  %7818 = vrcp.f32 %v5732_v0  ;;  %v6369_v32 = vmul.f32 -1.442695, %v9881_v28  ;;  %v9889_v38 = vadd.f32 %v9826_v35, %v5643_v47 }
 0x569   : > { %v7801_v18 = vpop.eup %7800  ;;  %7820 = vrcp.f32 %v5730_v42  ;;  %v6372_v61 = vmul.f32 -1.442695, %v9885_v3  ;;  %v5775_v29 = vmul.f32 %v7799_v50, %v9829_v52 }
 0x56a   : > { %v7803_v14 = vpop.eup %7802  ;;  %7822 = vpow2.f32 %v6371_v21  ;;  %v6370_v45 = vmul.f32 -1.442695, %v9889_v38  ;;  %v5773_v35 = vmul.f32 %v7801_v18, %v9832_v23 }
 0x56b   : > { %v7805_v7 = vpop.eup %7804  ;;  %v5776_v25 = vmul.f32 %v7803_v14, %v9836_v63  ;;  %7824 = vpow2.f32 %v6369_v32 }
 0x56c   : > { %v7807_v54 = vpop.eup %7806  ;;  %v5774_v53 = vmul.f32 %v7805_v7, %v9840_v57  ;;  %7826 = vpow2.f32 %v6372_v61 }
 0x56d   : > { %v7809_v46 = vpop.eup %7808  ;;  %v6422_v34 = vpack.c.bf16 %v5776_v25, %v5775_v29  ;;  %v5735_v37 = vadd.f32 1.0, %v7807_v54  ;;  %7828 = vpow2.f32 %v6370_v45 }
 0x56e   : > { %v7811_v31 = vpop.eup %7810  ;;  %v6417_v10 = vpack.c.bf16 %v5774_v53, %v5773_v35  ;;  %v5733_v15 = vadd.f32 1.0, %v7809_v46 }
 0x56f   : > { %v7813_v62 = vpop.eup %7812  ;;  %6454 = vst [vmem:[%s9899_s23 + $0x8] sm:$0xff] %v6422_v34   ;;  %7830 = vrcp.f32 %v5735_v37  ;;  %v5736_v52 = vadd.f32 1.0, %v7811_v31 }
 0x570   : > { %v7815_v63 = vpop.eup %7814  ;;  %6418 = vst [vmem:[%s9899_s23] sm:$0xff] %v6417_v10   ;;  %7832 = vrcp.f32 %v5733_v15  ;;  %v5734_v23 = vadd.f32 1.0, %v7813_v62 }
 0x571   : > { %v7817_v57 = vpop.eup %7816  ;;  %7834 = vrcp.f32 %v5736_v52  ;;  %v5779_v58 = vmul.f32 %v7815_v63, %v9845_v12 }
 0x572   : > { %v7819_v6 = vpop.eup %7818  ;;  %7836 = vrcp.f32 %v5734_v23  ;;  %v5777_v13 = vmul.f32 %v7817_v57, %v9848_v44 }
 0x573   : > { %v7821_v36 = vpop.eup %7820  ;;  %v5780_v27 = vmul.f32 %v7819_v6, %v9852_v41 }
 0x574   : > { %v7823_v16 = vpop.eup %7822  ;;  %v5778_v20 = vmul.f32 %v7821_v36, %v9856_v49 }
 0x575   : > { %v7825_v19 = vpop.eup %7824  ;;  %v6432_v33 = vpack.c.bf16 %v5780_v27, %v5779_v58  ;;  %v5739_v59 = vadd.f32 1.0, %v7823_v16 }
 0x576   : > { %v7827_v2 = vpop.eup %7826  ;;  %v6427_v43 = vpack.c.bf16 %v5778_v20, %v5777_v13  ;;  %v5737_v48 = vadd.f32 1.0, %v7825_v19 }
 0x577   : > { %v7829_v9 = vpop.eup %7828  ;;  %6456 = vst [vmem:[%s9899_s23 + $0x18] sm:$0xff] %v6432_v33   ;;  %7838 = vrcp.f32 %v5739_v59  ;;  %v5740_v8 = vadd.f32 1.0, %v7827_v2 }
 0x578   : > { %6455 = vst [vmem:[%s9899_s23 + $0x10] sm:$0xff] %v6427_v43   ;;  %7840 = vrcp.f32 %v5737_v48  ;;  %v5738_v12 = vadd.f32 1.0, %v7829_v9 }
 0x579   : > { %v7831_v41 = vpop.eup %7830  ;;  %7842 = vrcp.f32 %v5740_v8 }
 0x57a   : > { %v7833_v44 = vpop.eup %7832  ;;  %7844 = vrcp.f32 %v5738_v12  ;;  %v5783_v39 = vmul.f32 %v7831_v41, %v9861_v30 }
 0x57b   : > { %v7835_v49 = vpop.eup %7834  ;;  %v5781_v22 = vmul.f32 %v7833_v44, %v9864_v24 }
 0x57c   : > { %v7837_v40 = vpop.eup %7836  ;;  %v5784_v11 = vmul.f32 %v7835_v49, %v9868_v26 }
 0x57d   : > { %v5782_v4 = vmul.f32 %v7837_v40, %v9872_v5 }
 0x57e   : > { %v6442_v17 = vpack.c.bf16 %v5784_v11, %v5783_v39 }
 0x57f   : > { %v6437_v60 = vpack.c.bf16 %v5782_v4, %v5781_v22 }
 0x580   : > { %6458 = vst [vmem:[%s9899_s23 + $0x28] sm:$0xff] %v6442_v17  }
 0x581   : > { %v7839_v56 = vpop.eup %7838  ;;  %6457 = vst [vmem:[%s9899_s23 + $0x20] sm:$0xff] %v6437_v60  }
 0x582   : > { %v7841_v55 = vpop.eup %7840  ;;  %v5787_v24 = vmul.f32 %v7839_v56, %v9877_v51 }
 0x583   : > { %v7843_v0 = vpop.eup %7842  ;;  %v5785_v5 = vmul.f32 %v7841_v55, %v9881_v28 }
 0x584   : > { %v7845_v30 = vpop.eup %7844  ;;  %v5788_v26 = vmul.f32 %v7843_v0, %v9885_v3 }
 0x585   : > { %v5786_v1 = vmul.f32 %v7845_v30, %v9889_v38 }
 0x586   : > { %v6452_v42 = vpack.c.bf16 %v5788_v26, %v5787_v24 }
 0x587   : > { %v6447_v21 = vpack.c.bf16 %v5786_v1, %v5785_v5 }
 0x588   : > { %6460 = vst [vmem:[%s9899_s23 + $0x38] sm:$0xff] %v6452_v42  }
 0x589   : > { %6459 = vst [vmem:[%s9899_s23 + $0x30] sm:$0xff] %v6447_v21  }
 0x58a   : > { %7908 = shalt.err (!%p7905_p11)
}
 0x58b   : > { %s7909_s13 = scalar_lea.hbm %s9925_s27, 1024  ;;  %s7913_s21 = scalar_lea.hbm %s10161_s8, 4096 }
 0x58c   : > { %p7910_p13 = scmp.ne.s32.totalorder %s9925_s27, %s7909_s13  ;;  %p7914_p3 = scmp.lt.u32.totalorder %s9925_s27, %s10161_s8 }
 0x58d   : > { %p7915_p8 = scmp.lt.u32.totalorder %s7913_s21, %s7909_s13  ;;  %p7917_p12 = scmp.lt.u32.totalorder %s7909_s13, %s9925_s27 }
 0x58e   : > { %p7911_p1 = pnand %p7910_p13, %p10162_p0 }
 0x58f   : > { %p7916_p10 = por %p7915_p8, %p7914_p3 }
 0x590   : > { %p7912_p4 = pneg %p7911_p1 }
 0x591   : > { %p7918_p2 = por %p7917_p12, %p7916_p10 }
 0x593   : > { %p7919_p5 = pnand %p7918_p2, %p7912_p4 }
 0x595   : > { %7922 = shalt.err (!%p7919_p5)
}
 0x596   : > { %s8000_s28 = smov 64   ;;  %s8001_s29 = smov 4  }
 0x597   : > { %7275 = dma.vmem_to_hbm [thread:$0]  (%p10162_p0), %s9927_s16, 1024, %s9925_s27, %s9933_s25, %s8000_s28, %s8000_s28, %s8001_s29  }
 0x598 PF: > { %s10163_s14 = sld [smem:[#allocation9_spill]]  ;;  %s10164_s19 = sld [smem:[#allocation15_spill]] }
 0x599   : > { %p7287_p6 = scmp.ge.s32.totalorder %s7993_s15, 2 }
 0x59e   : > { %s5901_s24 = sand.u32 1, %s10163_s14   ;;  %p10165_p7 = scmp.ne.s32.totalorder %s10164_s19, 0 }
 0x59f   : > { %s5902_s17 = scalar_lea.sflag [#allocation5], %s5901_s24 }
 0x5a0   : > { %p7282_p9 = pnand %p7287_p6, %p10165_p7 }
 0x5a2   : > { %7960 = dma.done.wait (!%p7282_p9), %s5902_s17, 1024  }
 0x5a3   : > { %7962 = vsyncadd (!%p7282_p9), %s5902_s17, 4294966272  ;;  %s27_s15 = sadd.s32 1, %s7993_s15   ;;  %s10166_s13 = sld [smem:[#allocation10_spill]] }
 0x5a4   : > { %p24_p11 = scmp.ge.s32.totalorder %s27_s15, 6   ;;  %s10167_s27 = sld [smem:[#allocation16_spill]] }
 0x5a5   : > { %s10168_s28 = sld [smem:[#allocation11_spill]]  ;;  %s10169_s29 = sld [smem:[#allocation12_spill]] }
 0x5a6   : > { %s10170_s30 = sld [smem:[#allocation13_spill]]  ;;  %s10171_s14 = sld [smem:[#allocation14_spill]] }
 0x5a7   : > { %s10172_s25 = smov %s7969_s26  ;;  %26 = sbr.rel (!%p24_p11) target bundleno = 9 (0x9), region = 126 }
 0x5a9   : > { %s10173_s26 = smov %s10166_s13 }
 0x5ae   :  { %5907 = vsyncpa [#allocation4], 1 }
 0x5af   :  { %5909 = vsyncpa [#allocation4 + $0x1], 1 }
 0x5b0   :  { %5910 = vsyncpa [#allocation5], 1 }
 0x5b1   :  { %5912 = vsyncpa [#allocation5 + $0x1], 1 }

</bundles_post_ra>
